<compile_context>
chip_gen: v7x
topology: tpu7x:2x2x1
jax: 0.10.0
libtpu: 0.0.40
codegen_flags: <defaults>
</compile_context>

<pallas_src>
import jax
import jax.numpy as jnp
import numpy as np
from jax.experimental import pallas as pl
from jax.experimental.pallas import tpu as pltpu

EMBED_DIM = 128
EPS = 1e-5   # torch.nn.InstanceNorm2d default
LANE = 128


def spade_kernel(prev_ref, mask_ref, stats_ref, w_emb_ref, b_emb_ref,
                 w_gb_ref, b_gb_ref, out_ref, pad_x_ref):
    # prev_ref:  (1, TH, W, Cop) f32          mask_ref: (1, H+4, W+2, Cc) bf16
    # stats_ref: (1, 2, Cop) f32  [row 0 = mean, row 1 = rsqrt(var+eps)]
    # w_emb_ref: (9, Cc, 128) bf16            b_emb_ref: (1, 128) f32
    # w_gb_ref:  (3, 384, 2*Cop) bf16         b_gb_ref:  (1, 2*Cop) f32
    # out_ref:   (1, TH, W, Cop) f32
    # pad_x_ref: (TH+2, W+2, 128) bf16 scratch (W-padded embedding rows + halo)
    TH = out_ref.shape[1]
    W = out_ref.shape[2]
    Cop = out_ref.shape[3]
    Cc = mask_ref.shape[3]
    THp = TH + 2

    r = pl.program_id(1)
    row0 = pl.multiple_of(r * TH, TH)

    # ---- embedding conv: 9 accumulating K=Cc matmuls over TH+2 halo rows ----
    # mask_ref is spatially pre-padded (2 rows top/bottom, 1 col left/right),
    # so every tap slice is in bounds and conv zero-padding comes for free.
    emb = None
    for dy in range(3):
        for dx in range(3):
            tap = mask_ref[0, pl.ds(row0 + dy, THp), dx:dx + W, :]
            tap = tap.reshape(THp * W, Cc)
            d = jnp.dot(tap, w_emb_ref[dy * 3 + dx],
                        preferred_element_type=jnp.float32)
            emb = d if emb is None else emb + d
    emb = jnp.maximum(emb + b_emb_ref[...], 0.0)                  # (THp*W, 128) f32

    # ---- stage ReLU'd embedding into the W-padded bf16 scratch --------------
    pad_x_ref[:, 0:1, :] = jnp.zeros((THp, 1, EMBED_DIM), jnp.bfloat16)
    pad_x_ref[:, W + 1:W + 2, :] = jnp.zeros((THp, 1, EMBED_DIM), jnp.bfloat16)
    pad_x_ref[:, 1:W + 1, :] = emb.reshape(THp, W, EMBED_DIM).astype(jnp.bfloat16)

    # Halo rows that fall OUTSIDE the image are the gamma/beta conv's zero
    # padding, not real embedding values -> zero them.  These pl.when's are
    # keyed on the tile position (not "first iteration"), so they are safe with
    # "parallel" grid semantics on megacore.
    @pl.when(r == 0)
    def _():
        pad_x_ref[0:1, :, :] = jnp.zeros((1, W + 2, EMBED_DIM), jnp.bfloat16)

    @pl.when(r == pl.num_programs(1) - 1)
    def _():
        pad_x_ref[THp - 1:THp, :, :] = jnp.zeros((1, W + 2, EMBED_DIM), jnp.bfloat16)

    # ---- fused gamma/beta conv: 3 matmuls with K = 3*128 = 384 ---------------
    # dx taps are lane-concatenated (each 128 lanes -> lane-aligned concat) so
    # each matmul contracts 384 wide, filling the 256-wide MXU on v6e/v7x.
    gb = None
    for dy in range(3):
        patch = jnp.concatenate(
            [pad_x_ref[dy:dy + TH, 0:W, :],
             pad_x_ref[dy:dy + TH, 1:W + 1, :],
             pad_x_ref[dy:dy + TH, 2:W + 2, :]], axis=-1)
        patch = patch.reshape(TH * W, 3 * EMBED_DIM)
        d = jnp.dot(patch, w_gb_ref[dy], preferred_element_type=jnp.float32)
        gb = d if gb is None else gb + d
    gb = gb + b_gb_ref[...]                   # single broadcast bias add
    gamma = gb[:, :Cop]
    beta = gb[:, Cop:]

    # ---- fuse with the precomputed InstanceNorm statistics -------------------
    prev = prev_ref[0].reshape(TH * W, Cop)
    mean = stats_ref[0, 0:1, :]
    inv = stats_ref[0, 1:2, :]
    out = gamma * ((prev - mean) * inv) + beta
    out_ref[0] = out.reshape(TH, W, Cop).astype(out_ref.dtype)


def _round_up(x, m):
    return -(-x // m) * m


def _physical_vmem_bytes():
    try:
        info = pltpu.get_tpu_info()
        v = int(getattr(info, "vmem_capacity_bytes", 0))
        if v > 0:
            return v
    except Exception:
        pass
    return 64 * 1024 * 1024          # conservative default: v7x per-TensorCore VMEM


def _select_row_tile(H, W, Cc, Cop):
    """Generation-aware row-tile height + VMEM limit for the pallas_call."""
    phys = _physical_vmem_bytes()
    budget = int(phys * 0.40)        # headroom for compiler-managed temporaries
    vmem_limit = min(int(phys * 0.70), 100 * 1024 * 1024)

    # Resident-per-batch mask block and weights (lane/sublane padded, x2 buffers).
    mask_block = 2 * (H + 4) * _round_up(W + 2, 16) * _round_up(Cc, 128) * 2
    weights = 2 * (9 * _round_up(Cc, 8) * EMBED_DIM * 2
                   + 3 * 3 * EMBED_DIM * 2 * Cop * 2)

    def est(th):
        pad_x = (th + 2) * _round_up(W + 2, 16) * EMBED_DIM * 2      # bf16 scratch
        io = 2 * 2 * th * W * Cop * 4                                # prev + out blocks
        tmp = ((th + 2) * W * EMBED_DIM * 4                          # emb f32
               + th * W * 3 * EMBED_DIM * 2                          # K=384 patch bf16
               + th * W * 2 * Cop * 4)                               # gb accumulator
        return pad_x + io + tmp + mask_block + weights

    cands = [d for d in range(8, H + 1, 8) if H % d == 0] or [H]
    # Prefer >= 2 row tiles when possible (megacore row-parallelism / overlap).
    pref = [d for d in cands if H // d >= 2] or cands
    th = pref[0]
    for d in pref:
        if est(d) <= budget:
            th = d                    # largest candidate that fits the budget
    return th, vmem_limit


def spade_forward(prev_nchw, onehot_mask_nchw, params):
    """Wrapper. prev_nchw: (N, Co, H, W); onehot_mask_nchw: (N, Cc, Hm, Wm)."""
    N, Co, H, W = prev_nchw.shape
    Cc = onehot_mask_nchw.shape[1]
    Hm, Wm = onehot_mask_nchw.shape[2], onehot_mask_nchw.shape[3]
    Cop = -(-Co // LANE) * LANE      # lane-dense padded output-channel count

    # --- InstanceNorm statistics: cheap plain-JAX per-(n,c) reduction ---------
    prev_f32 = prev_nchw.astype(jnp.float32)
    mean_c = jnp.mean(prev_f32, axis=(2, 3))                               # (N, Co)
    var_c = jnp.mean(jnp.square(prev_f32 - mean_c[:, :, None, None]), axis=(2, 3))
    inv_c = jax.lax.rsqrt(var_c + EPS)
    if Cop != Co:
        mean_c = jnp.pad(mean_c, ((0, 0), (0, Cop - Co)))
        inv_c = jnp.pad(inv_c, ((0, 0), (0, Cop - Co)))
    stats = jnp.stack([mean_c, inv_c], axis=1)                             # (N, 2, Cop)

    # --- nearest interpolation (matches torch F.interpolate mode='nearest') ---
    rows = (jnp.arange(H) * Hm) // H
    cols = (jnp.arange(W) * Wm) // W
    mask = onehot_mask_nchw[:, :, rows, :][:, :, :, cols]                  # (N,Cc,H,W)
    # NHWC, bf16 (one-hot values are exact in bf16) + spatial conv halo padding:
    # 2 rows top/bottom (embedding halo + conv zero-pad) and 1 col left/right.
    mask = jnp.transpose(mask, (0, 2, 3, 1)).astype(jnp.bfloat16)
    mask = jnp.pad(mask, ((0, 0), (2, 2), (1, 1), (0, 0)))                 # (N,H+4,W+2,Cc)

    # --- prev: NCHW -> NHWC, lane padding on the output channel axis ----------
    # TODO(synk): if the surrounding model stays NHWC end-to-end these transposes
    # (and the one on the output) disappear -- they are pure HBM bandwidth.
    prev = jnp.transpose(prev_nchw, (0, 2, 3, 1)).astype(jnp.float32)
    if Cop != Co:
        prev = jnp.pad(prev, ((0, 0), (0, 0), (0, 0), (0, Cop - Co)))

    # --- weight prep (once, outside the kernel) --------------------------------
    w_emb = params["w_emb"].reshape(9, Cc, EMBED_DIM).astype(jnp.bfloat16)
    b_emb = params["b_emb"].reshape(1, EMBED_DIM).astype(jnp.float32)

    def pad_w(w):
        return jnp.pad(w, ((0, 0), (0, 0), (0, 0), (0, Cop - Co))) if Cop != Co else w

    def pad_b(b):
        return jnp.pad(b, ((0, Cop - Co),)) if Cop != Co else b

    # gamma & beta fused along out-channels, reshaped (dy, dx*128+c, o) so the
    # kernel contracts K = 384 per dy tap-row.
    w_gb = jnp.concatenate([pad_w(params["w_gamma"]), pad_w(params["w_beta"])],
                           axis=-1).reshape(3, 3 * EMBED_DIM, 2 * Cop).astype(jnp.bfloat16)
    b_gb = jnp.concatenate([pad_b(params["b_gamma"]), pad_b(params["b_beta"])]
                           ).reshape(1, 2 * Cop).astype(jnp.float32)

    TH, vmem_limit = _select_row_tile(H, W, Cc, Cop)
    nR = H // TH

    # TODO(synk): if profiling shows exposed prev/out DMAs at small TH, add
    # pipeline_mode=pl.Buffered(3) to those BlockSpecs (VMEM headroom permitting).
    grid_spec = pltpu.PrefetchScalarGridSpec(
        num_scalar_prefetch=0,
        grid=(N, nR),
        in_specs=[
            pl.BlockSpec((1, TH, W, Cop), lambda n, r: (n, r, 0, 0)),       # prev tile
            pl.BlockSpec((1, H + 4, W + 2, Cc), lambda n, r: (n, 0, 0, 0)),  # mask (resident per n)
            pl.BlockSpec((1, 2, Cop), lambda n, r: (n, 0, 0)),               # IN stats
            pl.BlockSpec((9, Cc, EMBED_DIM), lambda n, r: (0, 0, 0)),
            pl.BlockSpec((1, EMBED_DIM), lambda n, r: (0, 0)),
            pl.BlockSpec((3, 3 * EMBED_DIM, 2 * Cop), lambda n, r: (0, 0, 0)),
            pl.BlockSpec((1, 2 * Cop), lambda n, r: (0, 0)),
        ],
        out_specs=pl.BlockSpec((1, TH, W, Cop), lambda n, r: (n, r, 0, 0)),
        scratch_shapes=[pltpu.VMEM((TH + 2, W + 2, EMBED_DIM), jnp.bfloat16)],
    )

    out_nhwc = pl.pallas_call(
        spade_kernel,
        out_shape=jax.ShapeDtypeStruct((N, H, W, Cop), jnp.float32),
        grid_spec=grid_spec,
        compiler_params=pltpu.CompilerParams(
            dimension_semantics=("parallel", "parallel"),   # batch and row tiles independent
            vmem_limit_bytes=vmem_limit),
    )(prev, mask, stats, w_emb, b_emb, w_gb, b_gb)

    # Slice back to Co channels before the transpose (no padded-channel traffic).
    return jnp.transpose(out_nhwc[..., :Co], (0, 3, 1, 2))   # NCHW


def spade_reference(prev_nchw, onehot_mask_nchw, params):
    """Pure-JAX reference (f32 lax.conv) for correctness checking."""
    N, Co, H, W = prev_nchw.shape
    Hm, Wm = onehot_mask_nchw.shape[2], onehot_mask_nchw.shape[3]
    rows = (jnp.arange(H) * Hm) // H
    cols = (jnp.arange(W) * Wm) // W
    mask = onehot_mask_nchw.astype(jnp.float32)[:, :, rows, :][:, :, :, cols]

    prev = jnp.transpose(prev_nchw, (0, 2, 3, 1)).astype(jnp.float32)
    mask = jnp.transpose(mask, (0, 2, 3, 1))

    mean = jnp.mean(prev, axis=(1, 2), keepdims=True)
    var = jnp.mean((prev - mean) ** 2, axis=(1, 2), keepdims=True)
    normalized = (prev - mean) / jnp.sqrt(var + EPS)

    dn = ("NHWC", "HWIO", "NHWC")
    x = jax.lax.conv_general_dilated(mask, params["w_emb"], (1, 1), "SAME",
                                     dimension_numbers=dn) + params["b_emb"]
    x = jnp.maximum(x, 0.0)
    gamma = jax.lax.conv_general_dilated(x, params["w_gamma"], (1, 1), "SAME",
                                         dimension_numbers=dn) + params["b_gamma"]
    beta = jax.lax.conv_general_dilated(x, params["w_beta"], (1, 1), "SAME",
                                        dimension_numbers=dn) + params["b_beta"]
    out = gamma * normalized + beta
    return jnp.transpose(out, (0, 3, 1, 2))


def init_params(key, num_classes, out_channels):
    ks = jax.random.split(key, 6)
    # Weights stored directly in HWIO (kh, kw, in, out); equivalent to the
    # PyTorch OIHW weights transposed via (2, 3, 1, 0).
    return {
        "w_emb": 0.1 * jax.random.normal(ks[0], (3, 3, num_classes, EMBED_DIM), jnp.float32),
        "b_emb": 0.1 * jax.random.normal(ks[1], (EMBED_DIM,), jnp.float32),
        "w_gamma": 0.05 * jax.random.normal(ks[2], (3, 3, EMBED_DIM, out_channels), jnp.float32),
        "b_gamma": 0.1 * jax.random.normal(ks[3], (out_channels,), jnp.float32),
        "w_beta": 0.05 * jax.random.normal(ks[4], (3, 3, EMBED_DIM, out_channels), jnp.float32),
        "b_beta": 0.1 * jax.random.normal(ks[5], (out_channels,), jnp.float32),
    }


if __name__ == "__main__":
    key = jax.random.PRNGKey(0)
    k_prev, k_lbl, k_par = jax.random.split(key, 3)

    N, Co, H, W = 2, 4, 16, 16      # prev_input (NCHW)
    num_classes = 8
    Hm, Wm = 8, 8                    # segmentation mask at lower resolution

    prev_input = jax.random.normal(k_prev, (N, Co, H, W), jnp.float32)
    labels = jax.random.randint(k_lbl, (N, Hm, Wm), 0, num_classes)
    onehot_mask = jnp.transpose(
        jax.nn.one_hot(labels, num_classes, dtype=jnp.float32), (0, 3, 1, 2))  # (N,Cc,Hm,Wm)

    params = init_params(k_par, num_classes, Co)

    out = spade_forward(prev_input, onehot_mask, params)
    out = jax.block_until_ready(out)

    ref = jax.block_until_ready(spade_reference(prev_input, onehot_mask, params))
    # Tolerance accounts for bf16 matmul inputs (f32 accumulation) vs the f32 reference.
    np.testing.assert_allclose(np.asarray(out), np.asarray(ref), rtol=3e-2, atol=3e-2)

    print("KERNEL_OK")
</pallas_src>

<mosaic_0001>
module attributes {stable_mosaic.version = 11 : i64} {
  func.func @spade_kernel(%arg0: i32, %arg1: i32, %arg2: memref<1x8x16x128xf32, #tpu.memory_space<vmem>>, %arg3: memref<1x20x18x8xbf16, #tpu.memory_space<vmem>>, %arg4: memref<1x2x128xf32, #tpu.memory_space<vmem>>, %arg5: memref<9x8x128xbf16, #tpu.memory_space<vmem>>, %arg6: memref<1x128xf32, #tpu.memory_space<vmem>>, %arg7: memref<3x384x256xbf16, #tpu.memory_space<vmem>>, %arg8: memref<1x256xf32, #tpu.memory_space<vmem>>, %arg9: memref<1x8x16x128xf32, #tpu.memory_space<vmem>>, %arg10: memref<10x18x128xbf16, #tpu.memory_space<vmem>>) attributes {dimension_semantics = [#tpu.dimension_semantics<parallel>, #tpu.dimension_semantics<parallel>], iteration_bounds = array<i64: 2, 2>, scalar_prefetch = 0 : i64, scratch_operands = 1 : i64, tpu.core_type = #tpu.core_type<tc>, window_params = [{transform_indices = @transform_0, window_bounds = array<i64: 1, 8, 16, 128>}, {transform_indices = @transform_1, window_bounds = array<i64: 1, 20, 18, 8>}, {transform_indices = @transform_2, window_bounds = array<i64: 1, 2, 128>}, {pipeline_mode = #tpu.pipeline_mode<synchronous>, transform_indices = @transform_3, window_bounds = array<i64: 9, 8, 128>}, {pipeline_mode = #tpu.pipeline_mode<synchronous>, transform_indices = @transform_4, window_bounds = array<i64: 1, 128>}, {pipeline_mode = #tpu.pipeline_mode<synchronous>, transform_indices = @transform_5, window_bounds = array<i64: 3, 384, 256>}, {pipeline_mode = #tpu.pipeline_mode<synchronous>, transform_indices = @transform_6, window_bounds = array<i64: 1, 256>}, {transform_indices = @transform_7, window_bounds = array<i64: 1, 8, 16, 128>}]} {
    %c8_i32 = arith.constant 8 : i32
    %0 = arith.muli %arg1, %c8_i32 : i32
    %1 = tpu.assume_multiple %0, 8 : i32
    %c0_i32 = arith.constant 0 : i32
    %2 = arith.addi %1, %c0_i32 : i32
    %c0 = arith.constant 0 : index
    %3 = arith.index_cast %2 : i32 to index
    %c0_0 = arith.constant 0 : index
    %c0_1 = arith.constant 0 : index
    %4 = vector.load %arg3[%c0, %3, %c0_0, %c0_1] : memref<1x20x18x8xbf16, #tpu.memory_space<vmem>>, vector<1x10x16x8xbf16>
    %5 = vector.shape_cast %4 : vector<1x10x16x8xbf16> to vector<10x16x8xbf16>
    %6 = vector.shape_cast %5 : vector<10x16x8xbf16> to vector<160x8xbf16>
    %c0_2 = arith.constant 0 : index
    %c0_3 = arith.constant 0 : index
    %c0_4 = arith.constant 0 : index
    %7 = vector.load %arg5[%c0_2, %c0_3, %c0_4] : memref<9x8x128xbf16, #tpu.memory_space<vmem>>, vector<1x8x128xbf16>
    %8 = vector.shape_cast %7 : vector<1x8x128xbf16> to vector<8x128xbf16>
    %cst = arith.constant dense<0.000000e+00> : vector<160x128xf32>
    %9 = tpu.matmul %6, %8, %cst {dimension_numbers = #tpu.dot_dimension_numbers<[1], [0], [0], [1], [0, 0, 1, 1], [], []>} : vector<160x8xbf16>, vector<8x128xbf16>, vector<160x128xf32> -> vector<160x128xf32>
    %c0_i32_5 = arith.constant 0 : i32
    %10 = arith.addi %1, %c0_i32_5 : i32
    %c0_6 = arith.constant 0 : index
    %11 = arith.index_cast %10 : i32 to index
    %c1 = arith.constant 1 : index
    %c0_7 = arith.constant 0 : index
    %12 = vector.load %arg3[%c0_6, %11, %c1, %c0_7] : memref<1x20x18x8xbf16, #tpu.memory_space<vmem>>, vector<1x10x16x8xbf16>
    %13 = vector.shape_cast %12 : vector<1x10x16x8xbf16> to vector<10x16x8xbf16>
    %14 = vector.shape_cast %13 : vector<10x16x8xbf16> to vector<160x8xbf16>
    %c1_8 = arith.constant 1 : index
    %c0_9 = arith.constant 0 : index
    %c0_10 = arith.constant 0 : index
    %15 = vector.load %arg5[%c1_8, %c0_9, %c0_10] : memref<9x8x128xbf16, #tpu.memory_space<vmem>>, vector<1x8x128xbf16>
    %16 = vector.shape_cast %15 : vector<1x8x128xbf16> to vector<8x128xbf16>
    %cst_11 = arith.constant dense<0.000000e+00> : vector<160x128xf32>
    %17 = tpu.matmul %14, %16, %cst_11 {dimension_numbers = #tpu.dot_dimension_numbers<[1], [0], [0], [1], [0, 0, 1, 1], [], []>} : vector<160x8xbf16>, vector<8x128xbf16>, vector<160x128xf32> -> vector<160x128xf32>
    %18 = arith.addf %9, %17 : vector<160x128xf32>
    %c0_i32_12 = arith.constant 0 : i32
    %19 = arith.addi %1, %c0_i32_12 : i32
    %c0_13 = arith.constant 0 : index
    %20 = arith.index_cast %19 : i32 to index
    %c2 = arith.constant 2 : index
    %c0_14 = arith.constant 0 : index
    %21 = vector.load %arg3[%c0_13, %20, %c2, %c0_14] : memref<1x20x18x8xbf16, #tpu.memory_space<vmem>>, vector<1x10x16x8xbf16>
    %22 = vector.shape_cast %21 : vector<1x10x16x8xbf16> to vector<10x16x8xbf16>
    %23 = vector.shape_cast %22 : vector<10x16x8xbf16> to vector<160x8xbf16>
    %c2_15 = arith.constant 2 : index
    %c0_16 = arith.constant 0 : index
    %c0_17 = arith.constant 0 : index
    %24 = vector.load %arg5[%c2_15, %c0_16, %c0_17] : memref<9x8x128xbf16, #tpu.memory_space<vmem>>, vector<1x8x128xbf16>
    %25 = vector.shape_cast %24 : vector<1x8x128xbf16> to vector<8x128xbf16>
    %cst_18 = arith.constant dense<0.000000e+00> : vector<160x128xf32>
    %26 = tpu.matmul %23, %25, %cst_18 {dimension_numbers = #tpu.dot_dimension_numbers<[1], [0], [0], [1], [0, 0, 1, 1], [], []>} : vector<160x8xbf16>, vector<8x128xbf16>, vector<160x128xf32> -> vector<160x128xf32>
    %27 = arith.addf %18, %26 : vector<160x128xf32>
    %c1_i32 = arith.constant 1 : i32
    %28 = arith.addi %1, %c1_i32 : i32
    %c0_19 = arith.constant 0 : index
    %29 = arith.index_cast %28 : i32 to index
    %c0_20 = arith.constant 0 : index
    %c0_21 = arith.constant 0 : index
    %30 = vector.load %arg3[%c0_19, %29, %c0_20, %c0_21] : memref<1x20x18x8xbf16, #tpu.memory_space<vmem>>, vector<1x10x16x8xbf16>
    %31 = vector.shape_cast %30 : vector<1x10x16x8xbf16> to vector<10x16x8xbf16>
    %32 = vector.shape_cast %31 : vector<10x16x8xbf16> to vector<160x8xbf16>
    %c3 = arith.constant 3 : index
    %c0_22 = arith.constant 0 : index
    %c0_23 = arith.constant 0 : index
    %33 = vector.load %arg5[%c3, %c0_22, %c0_23] : memref<9x8x128xbf16, #tpu.memory_space<vmem>>, vector<1x8x128xbf16>
    %34 = vector.shape_cast %33 : vector<1x8x128xbf16> to vector<8x128xbf16>
    %cst_24 = arith.constant dense<0.000000e+00> : vector<160x128xf32>
    %35 = tpu.matmul %32, %34, %cst_24 {dimension_numbers = #tpu.dot_dimension_numbers<[1], [0], [0], [1], [0, 0, 1, 1], [], []>} : vector<160x8xbf16>, vector<8x128xbf16>, vector<160x128xf32> -> vector<160x128xf32>
    %36 = arith.addf %27, %35 : vector<160x128xf32>
    %c1_i32_25 = arith.constant 1 : i32
    %37 = arith.addi %1, %c1_i32_25 : i32
    %c0_26 = arith.constant 0 : index
    %38 = arith.index_cast %37 : i32 to index
    %c1_27 = arith.constant 1 : index
    %c0_28 = arith.constant 0 : index
    %39 = vector.load %arg3[%c0_26, %38, %c1_27, %c0_28] : memref<1x20x18x8xbf16, #tpu.memory_space<vmem>>, vector<1x10x16x8xbf16>
    %40 = vector.shape_cast %39 : vector<1x10x16x8xbf16> to vector<10x16x8xbf16>
    %41 = vector.shape_cast %40 : vector<10x16x8xbf16> to vector<160x8xbf16>
    %c4 = arith.constant 4 : index
    %c0_29 = arith.constant 0 : index
    %c0_30 = arith.constant 0 : index
    %42 = vector.load %arg5[%c4, %c0_29, %c0_30] : memref<9x8x128xbf16, #tpu.memory_space<vmem>>, vector<1x8x128xbf16>
    %43 = vector.shape_cast %42 : vector<1x8x128xbf16> to vector<8x128xbf16>
    %cst_31 = arith.constant dense<0.000000e+00> : vector<160x128xf32>
    %44 = tpu.matmul %41, %43, %cst_31 {dimension_numbers = #tpu.dot_dimension_numbers<[1], [0], [0], [1], [0, 0, 1, 1], [], []>} : vector<160x8xbf16>, vector<8x128xbf16>, vector<160x128xf32> -> vector<160x128xf32>
    %45 = arith.addf %36, %44 : vector<160x128xf32>
    %c1_i32_32 = arith.constant 1 : i32
    %46 = arith.addi %1, %c1_i32_32 : i32
    %c0_33 = arith.constant 0 : index
    %47 = arith.index_cast %46 : i32 to index
    %c2_34 = arith.constant 2 : index
    %c0_35 = arith.constant 0 : index
    %48 = vector.load %arg3[%c0_33, %47, %c2_34, %c0_35] : memref<1x20x18x8xbf16, #tpu.memory_space<vmem>>, vector<1x10x16x8xbf16>
    %49 = vector.shape_cast %48 : vector<1x10x16x8xbf16> to vector<10x16x8xbf16>
    %50 = vector.shape_cast %49 : vector<10x16x8xbf16> to vector<160x8xbf16>
    %c5 = arith.constant 5 : index
    %c0_36 = arith.constant 0 : index
    %c0_37 = arith.constant 0 : index
    %51 = vector.load %arg5[%c5, %c0_36, %c0_37] : memref<9x8x128xbf16, #tpu.memory_space<vmem>>, vector<1x8x128xbf16>
    %52 = vector.shape_cast %51 : vector<1x8x128xbf16> to vector<8x128xbf16>
    %cst_38 = arith.constant dense<0.000000e+00> : vector<160x128xf32>
    %53 = tpu.matmul %50, %52, %cst_38 {dimension_numbers = #tpu.dot_dimension_numbers<[1], [0], [0], [1], [0, 0, 1, 1], [], []>} : vector<160x8xbf16>, vector<8x128xbf16>, vector<160x128xf32> -> vector<160x128xf32>
    %54 = arith.addf %45, %53 : vector<160x128xf32>
    %c2_i32 = arith.constant 2 : i32
    %55 = arith.addi %1, %c2_i32 : i32
    %c0_39 = arith.constant 0 : index
    %56 = arith.index_cast %55 : i32 to index
    %c0_40 = arith.constant 0 : index
    %c0_41 = arith.constant 0 : index
    %57 = vector.load %arg3[%c0_39, %56, %c0_40, %c0_41] : memref<1x20x18x8xbf16, #tpu.memory_space<vmem>>, vector<1x10x16x8xbf16>
    %58 = vector.shape_cast %57 : vector<1x10x16x8xbf16> to vector<10x16x8xbf16>
    %59 = vector.shape_cast %58 : vector<10x16x8xbf16> to vector<160x8xbf16>
    %c6 = arith.constant 6 : index
    %c0_42 = arith.constant 0 : index
    %c0_43 = arith.constant 0 : index
    %60 = vector.load %arg5[%c6, %c0_42, %c0_43] : memref<9x8x128xbf16, #tpu.memory_space<vmem>>, vector<1x8x128xbf16>
    %61 = vector.shape_cast %60 : vector<1x8x128xbf16> to vector<8x128xbf16>
    %cst_44 = arith.constant dense<0.000000e+00> : vector<160x128xf32>
    %62 = tpu.matmul %59, %61, %cst_44 {dimension_numbers = #tpu.dot_dimension_numbers<[1], [0], [0], [1], [0, 0, 1, 1], [], []>} : vector<160x8xbf16>, vector<8x128xbf16>, vector<160x128xf32> -> vector<160x128xf32>
    %63 = arith.addf %54, %62 : vector<160x128xf32>
    %c2_i32_45 = arith.constant 2 : i32
    %64 = arith.addi %1, %c2_i32_45 : i32
    %c0_46 = arith.constant 0 : index
    %65 = arith.index_cast %64 : i32 to index
    %c1_47 = arith.constant 1 : index
    %c0_48 = arith.constant 0 : index
    %66 = vector.load %arg3[%c0_46, %65, %c1_47, %c0_48] : memref<1x20x18x8xbf16, #tpu.memory_space<vmem>>, vector<1x10x16x8xbf16>
    %67 = vector.shape_cast %66 : vector<1x10x16x8xbf16> to vector<10x16x8xbf16>
    %68 = vector.shape_cast %67 : vector<10x16x8xbf16> to vector<160x8xbf16>
    %c7 = arith.constant 7 : index
    %c0_49 = arith.constant 0 : index
    %c0_50 = arith.constant 0 : index
    %69 = vector.load %arg5[%c7, %c0_49, %c0_50] : memref<9x8x128xbf16, #tpu.memory_space<vmem>>, vector<1x8x128xbf16>
    %70 = vector.shape_cast %69 : vector<1x8x128xbf16> to vector<8x128xbf16>
    %cst_51 = arith.constant dense<0.000000e+00> : vector<160x128xf32>
    %71 = tpu.matmul %68, %70, %cst_51 {dimension_numbers = #tpu.dot_dimension_numbers<[1], [0], [0], [1], [0, 0, 1, 1], [], []>} : vector<160x8xbf16>, vector<8x128xbf16>, vector<160x128xf32> -> vector<160x128xf32>
    %72 = arith.addf %63, %71 : vector<160x128xf32>
    %c2_i32_52 = arith.constant 2 : i32
    %73 = arith.addi %1, %c2_i32_52 : i32
    %c0_53 = arith.constant 0 : index
    %74 = arith.index_cast %73 : i32 to index
    %c2_54 = arith.constant 2 : index
    %c0_55 = arith.constant 0 : index
    %75 = vector.load %arg3[%c0_53, %74, %c2_54, %c0_55] : memref<1x20x18x8xbf16, #tpu.memory_space<vmem>>, vector<1x10x16x8xbf16>
    %76 = vector.shape_cast %75 : vector<1x10x16x8xbf16> to vector<10x16x8xbf16>
    %77 = vector.shape_cast %76 : vector<10x16x8xbf16> to vector<160x8xbf16>
    %c8 = arith.constant 8 : index
    %c0_56 = arith.constant 0 : index
    %c0_57 = arith.constant 0 : index
    %78 = vector.load %arg5[%c8, %c0_56, %c0_57] : memref<9x8x128xbf16, #tpu.memory_space<vmem>>, vector<1x8x128xbf16>
    %79 = vector.shape_cast %78 : vector<1x8x128xbf16> to vector<8x128xbf16>
    %cst_58 = arith.constant dense<0.000000e+00> : vector<160x128xf32>
    %80 = tpu.matmul %77, %79, %cst_58 {dimension_numbers = #tpu.dot_dimension_numbers<[1], [0], [0], [1], [0, 0, 1, 1], [], []>} : vector<160x8xbf16>, vector<8x128xbf16>, vector<160x128xf32> -> vector<160x128xf32>
    %81 = arith.addf %72, %80 : vector<160x128xf32>
    %c0_59 = arith.constant 0 : index
    %c0_60 = arith.constant 0 : index
    %82 = vector.load %arg6[%c0_59, %c0_60] : memref<1x128xf32, #tpu.memory_space<vmem>>, vector<1x128xf32>
    %83 = vector.broadcast %82 : vector<1x128xf32> to vector<160x128xf32>
    %84 = arith.addf %81, %83 : vector<160x128xf32>
    %cst_61 = arith.constant 0.000000e+00 : f32
    %85 = vector.broadcast %cst_61 : f32 to vector<160x128xf32>
    %86 = arith.maximumf %84, %85 : vector<160x128xf32>
    %cst_62 = arith.constant 0.000000e+00 : bf16
    %87 = vector.broadcast %cst_62 : bf16 to vector<10x1x128xbf16>
    %c0_63 = arith.constant 0 : index
    %c0_64 = arith.constant 0 : index
    %c0_65 = arith.constant 0 : index
    %88 = vector.load %arg10[%c0_63, %c0_64, %c0_65] : memref<10x18x128xbf16, #tpu.memory_space<vmem>>, vector<10x1x128xbf16>
    tpu.vector_store %arg10[%c0_63, %c0_64, %c0_65], %87 {strides = array<i32>} : memref<10x18x128xbf16, #tpu.memory_space<vmem>>, vector<10x1x128xbf16>,
    %cst_66 = arith.constant 0.000000e+00 : bf16
    %89 = vector.broadcast %cst_66 : bf16 to vector<10x1x128xbf16>
    %c0_67 = arith.constant 0 : index
    %c17 = arith.constant 17 : index
    %c0_68 = arith.constant 0 : index
    %90 = vector.load %arg10[%c0_67, %c17, %c0_68] : memref<10x18x128xbf16, #tpu.memory_space<vmem>>, vector<10x1x128xbf16>
    tpu.vector_store %arg10[%c0_67, %c17, %c0_68], %89 {strides = array<i32>} : memref<10x18x128xbf16, #tpu.memory_space<vmem>>, vector<10x1x128xbf16>,
    %91 = vector.shape_cast %86 : vector<160x128xf32> to vector<10x16x128xf32>
    %92 = arith.truncf %91 : vector<10x16x128xf32> to vector<10x16x128xbf16>
    %c0_69 = arith.constant 0 : index
    %c1_70 = arith.constant 1 : index
    %c0_71 = arith.constant 0 : index
    %93 = vector.load %arg10[%c0_69, %c1_70, %c0_71] : memref<10x18x128xbf16, #tpu.memory_space<vmem>>, vector<10x16x128xbf16>
    tpu.vector_store %arg10[%c0_69, %c1_70, %c0_71], %92 {strides = array<i32>} : memref<10x18x128xbf16, #tpu.memory_space<vmem>>, vector<10x16x128xbf16>,
    %c0_i32_72 = arith.constant 0 : i32
    %94 = arith.cmpi eq, %arg1, %c0_i32_72 : i32
    %95 = arith.extui %94 : i1 to i32
    %c0_i32_73 = arith.constant 0 : i32
    %96 = arith.cmpi ne, %95, %c0_i32_73 : i32
    scf.if %96 {
      %cst_131 = arith.constant 0.000000e+00 : bf16
      %148 = vector.broadcast %cst_131 : bf16 to vector<1x18x128xbf16>
      %c0_132 = arith.constant 0 : index
      %c0_133 = arith.constant 0 : index
      %c0_134 = arith.constant 0 : index
      %149 = vector.load %arg10[%c0_132, %c0_133, %c0_134] : memref<10x18x128xbf16, #tpu.memory_space<vmem>>, vector<1x18x128xbf16>
      tpu.vector_store %arg10[%c0_132, %c0_133, %c0_134], %148 {strides = array<i32>} : memref<10x18x128xbf16, #tpu.memory_space<vmem>>, vector<1x18x128xbf16>,
    } else {
    }
    %c1_i32_74 = arith.constant 1 : i32
    %97 = arith.cmpi eq, %arg1, %c1_i32_74 : i32
    %98 = arith.extui %97 : i1 to i32
    %c0_i32_75 = arith.constant 0 : i32
    %99 = arith.cmpi ne, %98, %c0_i32_75 : i32
    scf.if %99 {
      %cst_131 = arith.constant 0.000000e+00 : bf16
      %148 = vector.broadcast %cst_131 : bf16 to vector<1x18x128xbf16>
      %c9 = arith.constant 9 : index
      %c0_132 = arith.constant 0 : index
      %c0_133 = arith.constant 0 : index
      %149 = vector.load %arg10[%c9, %c0_132, %c0_133] : memref<10x18x128xbf16, #tpu.memory_space<vmem>>, vector<1x18x128xbf16>
      tpu.vector_store %arg10[%c9, %c0_132, %c0_133], %148 {strides = array<i32>} : memref<10x18x128xbf16, #tpu.memory_space<vmem>>, vector<1x18x128xbf16>,
    } else {
    }
    %c0_76 = arith.constant 0 : index
    %c0_77 = arith.constant 0 : index
    %c0_78 = arith.constant 0 : index
    %100 = vector.load %arg10[%c0_76, %c0_77, %c0_78] : memref<10x18x128xbf16, #tpu.memory_space<vmem>>, vector<8x16x128xbf16>
    %c0_79 = arith.constant 0 : index
    %c1_80 = arith.constant 1 : index
    %c0_81 = arith.constant 0 : index
    %101 = vector.load %arg10[%c0_79, %c1_80, %c0_81] : memref<10x18x128xbf16, #tpu.memory_space<vmem>>, vector<8x16x128xbf16>
    %c0_82 = arith.constant 0 : index
    %c2_83 = arith.constant 2 : index
    %c0_84 = arith.constant 0 : index
    %102 = vector.load %arg10[%c0_82, %c2_83, %c0_84] : memref<10x18x128xbf16, #tpu.memory_space<vmem>>, vector<8x16x128xbf16>
    %103 = tpu.concatenate %100, %101, %102 in 2 : vector<8x16x128xbf16>, vector<8x16x128xbf16>, vector<8x16x128xbf16> -> vector<8x16x384xbf16>
    %104 = vector.shape_cast %103 : vector<8x16x384xbf16> to vector<128x384xbf16>
    %c0_85 = arith.constant 0 : index
    %c0_86 = arith.constant 0 : index
    %c0_87 = arith.constant 0 : index
    %105 = vector.load %arg7[%c0_85, %c0_86, %c0_87] : memref<3x384x256xbf16, #tpu.memory_space<vmem>>, vector<1x384x256xbf16>
    %106 = vector.shape_cast %105 : vector<1x384x256xbf16> to vector<384x256xbf16>
    %cst_88 = arith.constant dense<0.000000e+00> : vector<128x256xf32>
    %107 = tpu.matmul %104, %106, %cst_88 {dimension_numbers = #tpu.dot_dimension_numbers<[1], [0], [0], [1], [0, 0, 1, 1], [], []>} : vector<128x384xbf16>, vector<384x256xbf16>, vector<128x256xf32> -> vector<128x256xf32>
    %c1_89 = arith.constant 1 : index
    %c0_90 = arith.constant 0 : index
    %c0_91 = arith.constant 0 : index
    %108 = vector.load %arg10[%c1_89, %c0_90, %c0_91] : memref<10x18x128xbf16, #tpu.memory_space<vmem>>, vector<8x16x128xbf16>
    %c1_92 = arith.constant 1 : index
    %c1_93 = arith.constant 1 : index
    %c0_94 = arith.constant 0 : index
    %109 = vector.load %arg10[%c1_92, %c1_93, %c0_94] : memref<10x18x128xbf16, #tpu.memory_space<vmem>>, vector<8x16x128xbf16>
    %c1_95 = arith.constant 1 : index
    %c2_96 = arith.constant 2 : index
    %c0_97 = arith.constant 0 : index
    %110 = vector.load %arg10[%c1_95, %c2_96, %c0_97] : memref<10x18x128xbf16, #tpu.memory_space<vmem>>, vector<8x16x128xbf16>
    %111 = tpu.concatenate %108, %109, %110 in 2 : vector<8x16x128xbf16>, vector<8x16x128xbf16>, vector<8x16x128xbf16> -> vector<8x16x384xbf16>
    %112 = vector.shape_cast %111 : vector<8x16x384xbf16> to vector<128x384xbf16>
    %c1_98 = arith.constant 1 : index
    %c0_99 = arith.constant 0 : index
    %c0_100 = arith.constant 0 : index
    %113 = vector.load %arg7[%c1_98, %c0_99, %c0_100] : memref<3x384x256xbf16, #tpu.memory_space<vmem>>, vector<1x384x256xbf16>
    %114 = vector.shape_cast %113 : vector<1x384x256xbf16> to vector<384x256xbf16>
    %cst_101 = arith.constant dense<0.000000e+00> : vector<128x256xf32>
    %115 = tpu.matmul %112, %114, %cst_101 {dimension_numbers = #tpu.dot_dimension_numbers<[1], [0], [0], [1], [0, 0, 1, 1], [], []>} : vector<128x384xbf16>, vector<384x256xbf16>, vector<128x256xf32> -> vector<128x256xf32>
    %116 = arith.addf %107, %115 : vector<128x256xf32>
    %c2_102 = arith.constant 2 : index
    %c0_103 = arith.constant 0 : index
    %c0_104 = arith.constant 0 : index
    %117 = vector.load %arg10[%c2_102, %c0_103, %c0_104] : memref<10x18x128xbf16, #tpu.memory_space<vmem>>, vector<8x16x128xbf16>
    %c2_105 = arith.constant 2 : index
    %c1_106 = arith.constant 1 : index
    %c0_107 = arith.constant 0 : index
    %118 = vector.load %arg10[%c2_105, %c1_106, %c0_107] : memref<10x18x128xbf16, #tpu.memory_space<vmem>>, vector<8x16x128xbf16>
    %c2_108 = arith.constant 2 : index
    %c2_109 = arith.constant 2 : index
    %c0_110 = arith.constant 0 : index
    %119 = vector.load %arg10[%c2_108, %c2_109, %c0_110] : memref<10x18x128xbf16, #tpu.memory_space<vmem>>, vector<8x16x128xbf16>
    %120 = tpu.concatenate %117, %118, %119 in 2 : vector<8x16x128xbf16>, vector<8x16x128xbf16>, vector<8x16x128xbf16> -> vector<8x16x384xbf16>
    %121 = vector.shape_cast %120 : vector<8x16x384xbf16> to vector<128x384xbf16>
    %c2_111 = arith.constant 2 : index
    %c0_112 = arith.constant 0 : index
    %c0_113 = arith.constant 0 : index
    %122 = vector.load %arg7[%c2_111, %c0_112, %c0_113] : memref<3x384x256xbf16, #tpu.memory_space<vmem>>, vector<1x384x256xbf16>
    %123 = vector.shape_cast %122 : vector<1x384x256xbf16> to vector<384x256xbf16>
    %cst_114 = arith.constant dense<0.000000e+00> : vector<128x256xf32>
    %124 = tpu.matmul %121, %123, %cst_114 {dimension_numbers = #tpu.dot_dimension_numbers<[1], [0], [0], [1], [0, 0, 1, 1], [], []>} : vector<128x384xbf16>, vector<384x256xbf16>, vector<128x256xf32> -> vector<128x256xf32>
    %125 = arith.addf %116, %124 : vector<128x256xf32>
    %c0_115 = arith.constant 0 : index
    %c0_116 = arith.constant 0 : index
    %126 = vector.load %arg8[%c0_115, %c0_116] : memref<1x256xf32, #tpu.memory_space<vmem>>, vector<1x256xf32>
    %127 = vector.broadcast %126 : vector<1x256xf32> to vector<128x256xf32>
    %128 = arith.addf %125, %127 : vector<128x256xf32>
    %129 = vector.extract_strided_slice %128 {offsets = [0, 0], sizes = [128, 128], strides = [1, 1]} : vector<128x256xf32> to vector<128x128xf32>
    %130 = vector.extract_strided_slice %128 {offsets = [0, 128], sizes = [128, 128], strides = [1, 1]} : vector<128x256xf32> to vector<128x128xf32>
    %c0_117 = arith.constant 0 : index
    %c0_118 = arith.constant 0 : index
    %c0_119 = arith.constant 0 : index
    %c0_120 = arith.constant 0 : index
    %131 = vector.load %arg2[%c0_117, %c0_118, %c0_119, %c0_120] : memref<1x8x16x128xf32, #tpu.memory_space<vmem>>, vector<1x8x16x128xf32>
    %132 = vector.shape_cast %131 : vector<1x8x16x128xf32> to vector<8x16x128xf32>
    %133 = vector.shape_cast %132 : vector<8x16x128xf32> to vector<128x128xf32>
    %c0_121 = arith.constant 0 : index
    %c0_122 = arith.constant 0 : index
    %c0_123 = arith.constant 0 : index
    %134 = vector.load %arg4[%c0_121, %c0_122, %c0_123] : memref<1x2x128xf32, #tpu.memory_space<vmem>>, vector<1x1x128xf32>
    %135 = vector.shape_cast %134 : vector<1x1x128xf32> to vector<1x128xf32>
    %c0_124 = arith.constant 0 : index
    %c1_125 = arith.constant 1 : index
    %c0_126 = arith.constant 0 : index
    %136 = vector.load %arg4[%c0_124, %c1_125, %c0_126] : memref<1x2x128xf32, #tpu.memory_space<vmem>>, vector<1x1x128xf32>
    %137 = vector.shape_cast %136 : vector<1x1x128xf32> to vector<1x128xf32>
    %138 = vector.broadcast %135 : vector<1x128xf32> to vector<128x128xf32>
    %139 = arith.subf %133, %138 : vector<128x128xf32>
    %140 = vector.broadcast %137 : vector<1x128xf32> to vector<128x128xf32>
    %141 = arith.mulf %139, %140 : vector<128x128xf32>
    %142 = arith.mulf %129, %141 : vector<128x128xf32>
    %143 = arith.addf %142, %130 : vector<128x128xf32>
    %144 = vector.shape_cast %143 : vector<128x128xf32> to vector<8x16x128xf32>
    %c0_127 = arith.constant 0 : index
    %c0_128 = arith.constant 0 : index
    %c0_129 = arith.constant 0 : index
    %c0_130 = arith.constant 0 : index
    %145 = vector.load %arg9[%c0_127, %c0_128, %c0_129, %c0_130] : memref<1x8x16x128xf32, #tpu.memory_space<vmem>>, vector<1x8x16x128xf32>
    %146 = vector.shape_cast %145 : vector<1x8x16x128xf32> to vector<8x16x128xf32>
    %147 = vector.shape_cast %144 : vector<8x16x128xf32> to vector<1x8x16x128xf32>
    tpu.vector_store %arg9[%c0_127, %c0_128, %c0_129, %c0_130], %147 {strides = array<i32>} : memref<1x8x16x128xf32, #tpu.memory_space<vmem>>, vector<1x8x16x128xf32>,
    return
  }
  func.func @transform_0(%arg0: i32, %arg1: i32) -> (i32, i32, i32, i32) {
    %c0_i32 = arith.constant 0 : i32
    %c0_i32_0 = arith.constant 0 : i32
    %c0_i32_1 = arith.constant 0 : i32
    return %arg0, %arg1, %c0_i32, %c0_i32_0 : i32, i32, i32, i32
  }
  func.func @transform_1(%arg0: i32, %arg1: i32) -> (i32, i32, i32, i32) {
    %c0_i32 = arith.constant 0 : i32
    %c0_i32_0 = arith.constant 0 : i32
    %c0_i32_1 = arith.constant 0 : i32
    %c0_i32_2 = arith.constant 0 : i32
    return %arg0, %c0_i32, %c0_i32_0, %c0_i32_1 : i32, i32, i32, i32
  }
  func.func @transform_2(%arg0: i32, %arg1: i32) -> (i32, i32, i32) {
    %c0_i32 = arith.constant 0 : i32
    %c0_i32_0 = arith.constant 0 : i32
    %c0_i32_1 = arith.constant 0 : i32
    return %arg0, %c0_i32, %c0_i32_0 : i32, i32, i32
  }
  func.func @transform_3(%arg0: i32, %arg1: i32) -> (i32, i32, i32) {
    %c0_i32 = arith.constant 0 : i32
    %c0_i32_0 = arith.constant 0 : i32
    %c0_i32_1 = arith.constant 0 : i32
    %c0_i32_2 = arith.constant 0 : i32
    return %c0_i32, %c0_i32_0, %c0_i32_1 : i32, i32, i32
  }
  func.func @transform_4(%arg0: i32, %arg1: i32) -> (i32, i32) {
    %c0_i32 = arith.constant 0 : i32
    %c0_i32_0 = arith.constant 0 : i32
    %c0_i32_1 = arith.constant 0 : i32
    return %c0_i32, %c0_i32_0 : i32, i32
  }
  func.func @transform_5(%arg0: i32, %arg1: i32) -> (i32, i32, i32) {
    %c0_i32 = arith.constant 0 : i32
    %c0_i32_0 = arith.constant 0 : i32
    %c0_i32_1 = arith.constant 0 : i32
    %c0_i32_2 = arith.constant 0 : i32
    return %c0_i32, %c0_i32_0, %c0_i32_1 : i32, i32, i32
  }
  func.func @transform_6(%arg0: i32, %arg1: i32) -> (i32, i32) {
    %c0_i32 = arith.constant 0 : i32
    %c0_i32_0 = arith.constant 0 : i32
    %c0_i32_1 = arith.constant 0 : i32
    return %c0_i32, %c0_i32_0 : i32, i32
  }
  func.func @transform_7(%arg0: i32, %arg1: i32) -> (i32, i32, i32, i32) {
    %c0_i32 = arith.constant 0 : i32
    %c0_i32_0 = arith.constant 0 : i32
    %c0_i32_1 = arith.constant 0 : i32
    return %arg0, %arg1, %c0_i32, %c0_i32_0 : i32, i32, i32, i32
  }
}

</mosaic_0001>

<bundles_post_ra>
// kernel: tpu_custom_call.1
= control target key start
LH: loop header
LB: loop body
LE: loop exit
PB: predicated region body
PF: predicated region fallthrough
CT: control target
= control target key end

     0   :  { %s10180_s0 = inlined_call_operand.vmem [shape: f32[2,16,16,128], index: 0, kind: input, shape index: {}]   ;;  %s10181_s1 = inlined_call_operand.vmem [shape: bf16[2,20,18,8], index: 1, kind: input, shape index: {}]   ;;  %s10182_s2 = inlined_call_operand.vmem [shape: f32[2,2,128], index: 2, kind: input, shape index: {}]   ;;  %s10183_s3 = inlined_call_operand.vmem [shape: bf16[9,8,128], index: 3, kind: input, shape index: {}]   ;;  %s10184_s4 = inlined_call_operand.vmem [shape: f32[1,128], index: 4, kind: input, shape index: {}]   ;;  %s10185_s5 = inlined_call_operand.hbm [shape: bf16[3,384,256], index: 5, kind: input, shape index: {}]   ;;  %s10186_s6 = inlined_call_operand.vmem [shape: f32[1,256], index: 6, kind: input, shape index: {}]   ;;  %s10187_s7 = inlined_call_operand.hbm [shape: f32[2,16,16,128], index: 7, kind: output, shape index: {}]  }
   0x1   :  { %10200 = sst [smem:[#allocation15_spill]] %s10185_s5 }
   0x2   :  { %12 = vsyncpa [#allocation4], 0 }
   0x3   :  { %13 = vsyncpa [#allocation5], 0 }
   0x4   :  { %15 = vsyncpa [#allocation5 + $0x1], 0  ;;  %s8342_s24 = smov 0   ;;  %s8344_s25 = smov 0  }
   0x5   :  { %s8346_s26 = smov 0   ;;  %s8348_s27 = smov 0  }
   0x6   :  { %s8350_s28 = smov 0   ;;  %s8352_s29 = smov 0  }
   0x7   :  { %s8354_s30 = smov 0   ;;  %s8356_s8 = smov 0  }
   0x8 LB: > { %10201 = sst [smem:[#allocation9_spill]] %s8271_s26  ;;  %s6486_s9 = sadd.s32 4294967295, %s8291_s8   ;;  %s8291_s8 = sphi %s8356_s8, %s21_s8   ;;  %s8287_s30 = sphi %s8354_s30, %s10236_s30   ;;  %s8283_s29 = sphi %s8352_s29, %s10235_s29   ;;  %s8279_s28 = sphi %s8350_s28, %s10234_s28   ;;  %s8275_s27 = sphi %s8348_s27, %s10233_s27   ;;  %s8271_s26 = sphi %s8346_s26, %s10232_s26   ;;  %s8267_s25 = sphi %s8344_s25, %s10238_s25   ;;  %s8263_s24 = sphi %s8342_s24, %s10237_s24  }
   0x9   : > { %10202 = sst [smem:[#allocation10_spill]] %s8283_s29  ;;  %s6487_s10 = sadd.s32 4294967294, %s8291_s8  }
   0xa   : > { %10203 = sst [smem:[#allocation11_spill]] %s8287_s30  ;;  %s30_s11 = sadd.s32 1, %s8283_s29 }
   0xb   : > { %s33_s12 = sadd.s32 1, %s8287_s30  ;;  %p31_p0 = scmp.ge.s32.totalorder %s30_s11, 2 }
   0xc   : > { %s206_s13 = sadd.s32 1, %s8271_s26  ;;  %p216_p1 = scmp.ne.s32.totalorder %s8271_s26, %s8267_s25 }
   0xd   : > { %p217_p2 = scmp.eq.s32.totalorder %s6486_s9, 3  ;;  %s10240_s11 = smov (%p31_p0, %s30_s11), 0 }
   0xe   : > { %10204 = sst [smem:[#allocation12_spill]] %s10240_s11  ;;  %s10242_s12 = smov (!%p31_p0, %s33_s12), %s8287_s30 }
   0xf   : > { %s202_s14 = ssub.s32 %s8283_s29, %s10240_s11  ;;  %p8394_p3 = por %p217_p2, %p216_p1 }
  0x10   : > { %p35_p4 = scmp.ge.s32.totalorder %s10242_s12, 2  ;;  %p222_p5 = scmp.ne.s32.totalorder %s8267_s25, %s8263_s24 }
  0x11   : > { %s10205_s15 = scalar_select %p8394_p3, 1, 0 }
  0x12   : > { %p223_p6 = scmp.eq.s32.totalorder %s6487_s10, 3  ;;  %p6488_p7 = scmp.ge.s32.totalorder %s8291_s8, 1 }
  0x13   : > { %s10244_s12 = smov (%p35_p4, %s10242_s12), 0  ;;  %p230_p9 = scmp.lt.s32.totalorder %s8291_s8, 5 }
  0x14   : > { %10206 = sst [smem:[#allocation13_spill]] %s10244_s12  ;;  %p8403_p8 = por %p223_p6, %p222_p5 }
  0x15   : > { %s201_s17 = ssub.s32 %s8287_s30, %s10244_s12  ;;  %p8410_p10 = pnand %p6488_p7, %p230_p9 }
  0x16   : > { %s10207_s16 = scalar_select %p8403_p8, 1, 0 }
  0x17   : > { %s203_s18 = sor.u32 %s202_s14, %s201_s17  ;;  %p8414_p12 = scmp.eq.s32.totalorder %s6486_s9, 0 }
  0x18   : > { %s10208_s19 = scalar_select %p8410_p10, 1, 0 }
  0x19   : > { %p204_p11 = scmp.eq.s32.totalorder %s203_s18, 0  ;;  %p7764_p13 = pneg %p8410_p10 }
  0x1a   : > { %s10209_s20 = scalar_select %p8414_p12, 1, 0 }
  0x1b   : > { %s8421_s21 = scalar_select %p204_p11, %s8271_s26, %s206_s13  }
  0x1c   : > { %s8293_s22 = smov [#allocation3]   ;;  %p8425_p0 = pnand %p8414_p12, %p7764_p13 }
  0x1d   : > { %10210 = sst [smem:[#allocation14_spill]] %s8421_s21  ;;  %s248_s23 = sshll.u32 %s8293_s22, 4  ;;  %s249_s23 = int_to_ptr.vmem [resolvable:$true] %s248_s23 }
  0x1e   : > { %s10212_s5 = sld [smem:[#allocation15_spill]]  ;;  %p8167_p2 = pneg %p8425_p0 }
  0x24   : > { %s8165_s9 = scalar_lea.hbm %s10212_s5, 18432 }
  0x25   : > { %p8166_p1 = scmp.ne.s32.totalorder %s10212_s5, %s8165_s9  ;;  %p8172_p6 = scmp.lt.u32.totalorder %s8165_s9, %s10212_s5 }
  0x27   : > { %p8168_p4 = pnand %p8167_p2, %p8166_p1 }
  0x29   : > { %p8169_p5 = pneg %p8168_p4 }
  0x2b   : > { %p8174_p7 = pnand %p8172_p6, %p8169_p5 }
  0x2d   : > { %8177 = shalt.err (!%p8174_p7)
}
  0x2e   : > { %s8178_s11 = scalar_lea.vmem %s249_s23, 18432  ;;  %p8186_p8 = scmp.lt.s32.totalorder %s249_s23, %s249_s23 }
  0x2f   : > { %p8179_p9 = scmp.ne.s32.totalorder %s249_s23, %s8178_s11  ;;  %p8187_p3 = scmp.lt.s32.totalorder %s8178_s11, %s8178_s11 }
  0x31   : > { %p8181_p11 = pnand %p8179_p9, %p8167_p2  ;;  %p8188_p12 = por %p8187_p3, %p8186_p8 }
  0x33   : > { %p8182_p13 = pneg %p8181_p11 }
  0x35   : > { %p8189_p10 = pnand %p8188_p12, %p8182_p13 }
  0x37   : > { %8192 = shalt.err (!%p8189_p10)
}
  0x38   : > { %s8294_s12 = smov 128   ;;  %s8295_s14 = smov 8  }
  0x39   : > { %7767 = dma.hbm_to_vmem [thread:$0]  (!%p8425_p0), %s10212_s5, 18432, %s249_s23, [#allocation4], %s8294_s12, %s8294_s12, %s8295_s14  }
  0x3a   : > { %p10213_p1 = scmp.ne.s32.totalorder %s10208_s19, 0 }
  0x3b   : > { %p10214_p4 = scmp.ne.s32.totalorder (!%p10213_p1), %s10209_s20, 0 }
  0x3c   : > { %296 = sbr.rel (%p10213_p1) target bundleno = 1333 (0x535), region = 48 }
  0x43   : > { %8254 = dma.done.wait (%p10214_p4), [#allocation4], 18432  }
  0x44   : > { %8256 = vsyncadd (%p10214_p4), [#allocation4], 4294948864  ;;  %s10194_s11 = sand.u32 1, %s8267_s25   ;;  %s6494_s10 = sshll.u32 %s8275_s27, 3  ;;  %vm705_vm0 = vcmask 1043456   ;;  %vm674_vm4 = vcmask 64512  }
  0x45   : > { %s8455_s9 = sshll.u32 %s10194_s11, 7  ;;  %p343_p3 = scmp.lt.s32.totalorder %s8279_s28, 1  ;;  %v6503_v0 = vld [vmem:[%s10183_s3 + $0x4] sm:$0xf]  ;;  %v388_v1 = vld [vmem:[%s10183_s3] sm:$0xf] }
  0x46   : > { %p345_p8 = scmp.lt.s32.totalorder %s6494_s10, 15  ;;  %7748 = vmatprep.subr.msk.bf16.mxu0 %vm705_vm0, %v6503_v0  ;;  %v707_v2 = vsel %vm705_vm0, %v6503_v0, 0  ;;  %vm399_vm1 = vsmask.f32 3328  ;;  %vm400_vm2 = vsmask.f32 7440 }
  0x47   : > { %s344_s19 = scalar_select %p343_p3, %s8279_s28, 1  ;;  %7215 = vmatpush3.bf16.msra.mxu0 %v707_v2  ;;  %vm8517_vm3 = vmor %vm399_vm1, %vm400_vm2  ;;  %v903_v35 = vsel %vm705_vm0, %v388_v1, 0  ;;  %vm1048_vm5 = vcmask 1042432   ;;  %vm1049_vm6 = vcmask 1046532   ;;  %vm3402_vm8 = vcmask 1040384  }
  0x48   : > { %s10246_s10 = smov (!%p345_p8, %s6494_s10), 15  ;;  %7749 = vmatprep.subr.msk.bf16.mxu0 %vm705_vm0, %v388_v1  ;;  %vm8698_vm7 = vmor %vm1048_vm5, %vm1049_vm6  ;;  %vm3403_vm9 = vsmask.f32 256  ;;  %vm3435_vm11 = vsmask.f32 7938  ;;  %p6866_p10 = scmp.ne.s32.totalorder %s8275_s27, 0 }
  0x49   : > { %s6496_s23 = sshll.u32 %s344_s19, 5  ;;  %s7757_s13 = smul.u32 240, %s344_s19  ;;  %vm9453_vm10 = vmand %vm3402_vm8, %vm3403_vm9  ;;  %vm3527_vm13 = vsmask.f32 4368 }
  0x4a   : > { %s6495_s20 = sshll.u32 %s10246_s10, 1  ;;  %s6499_s22 = sshll.u32 %s344_s19, 1  ;;  %vm9460_vm12 = vmand %vm3402_vm8, %vm3435_vm11 }
  0x4b   : > { %s349_s17 = sadd.s32 %s6496_s23, %s6495_s20  ;;  %s357_s11 = scalar_lea.vmem %s10181_s1, %s7757_s13  ;;  %vm9514_vm14 = vmand %vm705_vm0, %vm3435_vm11 }
  0x4c   : > { %s6497_s21 = sshll.u32 %s349_s17, 3  ;;  %s8473_s26 = scalar_lea.vmem %s10182_s2, %s6499_s22  ;;  %vm9521_vm15 = vmor %vm3403_vm9, %vm3527_vm13 }
  0x4d   : > { %s8478_s5 = scalar_lea.vmem %s10180_s0, %s6497_s21  ;;  %s7093_s13 = smul.u32 96, %s8275_s27 }
  0x4f   : > { %s8482_s29 = scalar_lea.vmem %s357_s11, %s7093_s13  ;;  %s9612_s11 = scalar_lea.vmem [#allocation6], %s8455_s9 }
  0x50   : > { %v8485_v3 = vld [vmem:[%s8482_s29] sm:$0xf]  ;;  %v8488_v4 = vld [vmem:[%s8482_s29 + $0x4] sm:$0xf]  ;;  %v8491_v5 = vld [vmem:[%s8482_s29 + $0x8] sm:$0x1] }
  0x51   : > { %v403_v6 = vshrl.u32 %v8485_v3, 16  ;;  %v406_v7 = vshll.u32 %v8485_v3, 16  ;;  %v412_v8 = vshll.u32 %v8488_v4, 16  ;;  %v416_v9 = vshrl.u32 %v8488_v4, 16  ;;  %v8498_v10 = vld [vmem:[%s8482_s29 + $0xc] sm:$0xf] }
  0x52   : > { %v422_v11 = vshll.u32 %v8491_v5, 16  ;;  %v8502_v12 = vld [vmem:[%s8482_s29 + $0x10] sm:$0xf]  ;;  %v8505_v13 = vld [vmem:[%s8482_s29 + $0x14] sm:$0x1]  ;;  %v427_v19 = vshrl.u32 %v8498_v10, 16 }
  0x53   : > { %v405_v14 = vrot.slane %v403_v6, 4  ;;  %v408_v15 = vrot.slane %v406_v7, 5  ;;  %v414_v16 = vrot.slane %v412_v8, 5  ;;  %v418_v17 = vrot.slane %v416_v9, 4  ;;  %v8513_v26 = vld [vmem:[%s8482_s29 + $0x18] sm:$0xf] }
  0x54   : > { %v424_v18 = vrot.slane %v422_v11, 5  ;;  %v430_v20 = vshll.u32 %v8498_v10, 16  ;;  %v436_v21 = vshll.u32 %v8502_v12, 16  ;;  %v440_v24 = vshrl.u32 %v8502_v12, 16  ;;  %v8522_v31 = vld [vmem:[%s8482_s29 + $0x1c] sm:$0xf] }
  0x55   : > { %v409_v22 = vor.u32 %v408_v15, %v405_v14  ;;  %v419_v23 = vor.u32 %v418_v17, %v414_v16  ;;  %v446_v25 = vshll.u32 %v8505_v13, 16  ;;  %v429_v28 = vrot.slane %v427_v19, 4  ;;  %v8526_v38 = vld [vmem:[%s8482_s29 + $0x20] sm:$0x1]  ;;  %v8536_v45 = vld [vmem:[%s8482_s29 + $0x24] sm:$0xf] }
  0x56   : > { %v432_v29 = vrot.slane %v430_v20, 5  ;;  %v438_v30 = vrot.slane %v436_v21, 5  ;;  %v442_v34 = vrot.slane %v440_v24, 4  ;;  %v451_v39 = vshrl.u32 %v8513_v26, 16  ;;  %v8539_v50 = vld [vmem:[%s8482_s29 + $0x28] sm:$0xf] }
  0x57   : > { %v410_v32 = vrot.slane %v409_v22, 4  ;;  %v420_v33 = vrot.slane %v419_v23, 4  ;;  %v448_v37 = vrot.slane %v446_v25, 5  ;;  %v454_v40 = vshll.u32 %v8513_v26, 16  ;;  %v8547_v57 = vld [vmem:[%s8482_s29 + $0x2c] sm:$0x1] }
  0x58   : > { %v433_v36 = vor.u32 %v432_v29, %v429_v28  ;;  %v443_v43 = vor.u32 %v442_v34, %v438_v30  ;;  %v460_v44 = vshll.u32 %v8522_v31, 16  ;;  %v453_v48 = vrot.slane %v451_v39, 4  ;;  %v8555_v0 = vld [vmem:[%s8482_s29 + $0x30] sm:$0xf]  ;;  %v8558_v8 = vld [vmem:[%s8482_s29 + $0x34] sm:$0xf] }
  0x59   : > { %v415_v41 = vsel %vm8517_vm3, %v410_v32, %v414_v16  ;;  %v425_v42 = vsel %vm8517_vm3, %v420_v33, %v424_v18  ;;  %v456_v49 = vrot.slane %v454_v40, 5  ;;  %v464_v53 = vshrl.u32 %v8522_v31, 16  ;;  %v8565_v16 = vld [vmem:[%s10183_s3 + $0x8] sm:$0xf]  ;;  %v8571_v19 = vld [vmem:[%s8482_s29 + $0x38] sm:$0x1] }
  0x5a   : > { %v6504_v46 = vcombine.low %v415_v41, %v425_v42  ;;  %v434_v47 = vrot.slane %v433_v36, 4  ;;  %v444_v51 = vrot.slane %v443_v43, 4  ;;  %v462_v52 = vrot.slane %v460_v44, 5  ;;  %v8578_v33 = vld [vmem:[%s8482_s29 + $0x3c] sm:$0xf] }
  0x5b   : > { %v470_v54 = vshll.u32 %v8526_v38, 16  ;;  %v457_v56 = vor.u32 %v456_v49, %v453_v48  ;;  %v475_v58 = vshrl.u32 %v8536_v45, 16  ;;  %v478_v59 = vshll.u32 %v8536_v45, 16  ;;  %v8586_v39 = vld [vmem:[%s8482_s29 + $0x40] sm:$0xf] }
  0x5c   : > { %7216 = vmatprep.mubr.msk.bf16.mxu0 %vm674_vm4, %v6504_v46  ;;  %v439_v55 = vsel %vm8517_vm3, %v434_v47, %v438_v30  ;;  %v449_v60 = vsel %vm8517_vm3, %v444_v51, %v448_v37  ;;  %v466_v61 = vrot.slane %v464_v53, 4  ;;  %v484_v63 = vshll.u32 %v8539_v50, 16  ;;  %v8591_v44 = vld [vmem:[%s8482_s29 + $0x44] sm:$0x1] }
  0x5d   : > { %v472_v62 = vrot.slane %v470_v54, 5  ;;  %v6505_v1 = vcombine.low %v439_v55, %v449_v60  ;;  %v458_v2 = vrot.slane %v457_v56, 4  ;;  %v477_v6 = vrot.slane %v475_v58, 4  ;;  %v8599_v55 = vld [vmem:[%s8482_s29 + $0x48] sm:$0xf] }
  0x5e   : > { %v480_v7 = vrot.slane %v478_v59, 5  ;;  %v467_v9 = vor.u32 %v466_v61, %v462_v52  ;;  %v486_v11 = vrot.slane %v484_v63, 5  ;;  %v488_v14 = vshrl.u32 %v8539_v50, 16  ;;  %v8605_v61 = vld [vmem:[%s8482_s29 + $0x4c] sm:$0xf] }
  0x5f   : > { %v494_v15 = vshll.u32 %v8547_v57, 16  ;;  %7217 = vmatmul.mubr.msk.bf16.vlgmr.msra.gmra.mrb[0].mxu0 %vm674_vm4, %v6505_v1  ;;  %v463_v17 = vsel %vm8517_vm3, %v458_v2, %v462_v52  ;;  %v499_v20 = vshrl.u32 %v8555_v0, 16  ;;  %v502_v21 = vshll.u32 %v8555_v0, 16 }
  0x60   : > { %v481_v18 = vor.u32 %v480_v7, %v477_v6  ;;  %7237 = vmatpush3.bf16.msra.mxu0 %v903_v35  ;;  %v468_v22 = vrot.slane %v467_v9, 4  ;;  %v490_v23 = vrot.slane %v488_v14, 4  ;;  %v508_v25 = vshll.u32 %v8558_v8, 16 }
  0x61   : > { %v496_v24 = vrot.slane %v494_v15, 5  ;;  %v501_v29 = vrot.slane %v499_v20, 4  ;;  %v504_v30 = vrot.slane %v502_v21, 5  ;;  %v512_v32 = vshrl.u32 %v8558_v8, 16  ;;  %7750 = vmatprep.subr.msk.bf16.mxu0 %vm705_vm0, %v8565_v16  ;;  %v8620_v21 = vld [vmem:[%s8482_s29 + $0x54] sm:$0xf] }
  0x62   : > { %v482_v28 = vrot.slane %v481_v18, 4  ;;  %v473_v34 = vsel %vm8517_vm3, %v468_v22, %v472_v62  ;;  %v491_v35 = vor.u32 %v490_v23, %v486_v11  ;;  %v510_v36 = vrot.slane %v508_v25, 5 }
  0x63   : > { %v518_v37 = vshll.u32 %v8571_v19, 16  ;;  %v6506_v40 = vcombine.low %v463_v17, %v473_v34  ;;  %v505_v42 = vor.u32 %v504_v30, %v501_v29  ;;  %v514_v43 = vrot.slane %v512_v32, 4 }
  0x64   : > { %v487_v41 = vsel %vm8517_vm3, %v482_v28, %v486_v11  ;;  %v492_v46 = vrot.slane %v491_v35, 4  ;;  %v523_v48 = vshrl.u32 %v8578_v33, 16  ;;  %v526_v49 = vshll.u32 %v8578_v33, 16  ;;  %v8610_v11 = vld [vmem:[%s8482_s29 + $0x50] sm:$0x1] }
  0x65   : > { %v520_v47 = vrot.slane %v518_v37, 5  ;;  %7220 = vmatprep.mubr.msk.bf16.mxu0 %vm674_vm4, %v6506_v40  ;;  %v506_v51 = vrot.slane %v505_v42, 4  ;;  %v515_v52 = vor.u32 %v514_v43, %v510_v36  ;;  %v532_v53 = vshll.u32 %v8586_v39, 16  ;;  %v8623_v28 = vld [vmem:[%s8482_s29 + $0x58] sm:$0xf] }
  0x66   : > { %v536_v54 = vshrl.u32 %v8586_v39, 16  ;;  %v497_v56 = vsel %vm8517_vm3, %v492_v46, %v496_v24  ;;  %v525_v58 = vrot.slane %v523_v48, 4  ;;  %v528_v59 = vrot.slane %v526_v49, 5  ;;  %v8627_v35 = vld [vmem:[%s8482_s29 + $0x5c] sm:$0x1] }
  0x67   : > { %v542_v60 = vshll.u32 %v8591_v44, 16  ;;  %v6507_v62 = vcombine.low %v487_v41, %v497_v56  ;;  %v511_v63 = vsel %vm8517_vm3, %v506_v51, %v510_v36  ;;  %v516_v1 = vrot.slane %v515_v52, 4  ;;  %v8630_v36 = vld [vmem:[%s8482_s29 + $0x60] sm:$0xf]  ;;  %v8639_v49 = vld [vmem:[%s8482_s29 + $0x64] sm:$0xf] }
  0x68   : > { %v534_v2 = vrot.slane %v532_v53, 5  ;;  %v529_v6 = vor.u32 %v528_v59, %v525_v58  ;;  %v538_v7 = vrot.slane %v536_v54, 4  ;;  %v547_v14 = vshrl.u32 %v8599_v55, 16 }
  0x69   : > { %v544_v9 = vrot.slane %v542_v60, 5  ;;  %7221 = vmatmul.mubr.msk.bf16.gmra.mrb[4].mxu0 %vm674_vm4, %v6507_v62  ;;  %v521_v15 = vsel %vm8517_vm3, %v516_v1, %v520_v47  ;;  %v550_v17 = vshll.u32 %v8599_v55, 16  ;;  %v556_v18 = vshll.u32 %v8605_v61, 16  ;;  %v8645_v62 = vld [vmem:[%s8482_s29 + $0x68] sm:$0x1] }
  0x6a   : > { %v560_v20 = vshrl.u32 %v8605_v61, 16  ;;  %v6508_v22 = vcombine.low %v511_v63, %v521_v15  ;;  %v530_v23 = vrot.slane %v529_v6, 4  ;;  %v539_v24 = vor.u32 %v538_v7, %v534_v2  ;;  %v8648_v63 = vld [vmem:[%s8482_s29 + $0x6c] sm:$0xf] }
  0x6b   : > { %v549_v25 = vrot.slane %v547_v14, 4  ;;  %v552_v29 = vrot.slane %v550_v17, 5  ;;  %v558_v30 = vrot.slane %v556_v18, 5  ;;  %v566_v34 = vshll.u32 %v8610_v11, 16 }
  0x6c   : > { %v562_v32 = vrot.slane %v560_v20, 4  ;;  %7224 = vmatprep.mubr.msk.bf16.mxu0 %vm674_vm4, %v6508_v22  ;;  %v535_v37 = vsel %vm8517_vm3, %v530_v23, %v534_v2  ;;  %v540_v40 = vrot.slane %v539_v24, 4  ;;  %v571_v41 = vshrl.u32 %v8620_v21, 16 }
  0x6d   : > { %v574_v42 = vshll.u32 %v8620_v21, 16  ;;  %v553_v43 = vor.u32 %v552_v29, %v549_v25  ;;  %v568_v47 = vrot.slane %v566_v34, 5  ;;  %v580_v48 = vshll.u32 %v8623_v28, 16 }
  0x6e   : > { %v563_v46 = vor.u32 %v562_v32, %v558_v30  ;;  %v545_v51 = vsel %vm8517_vm3, %v540_v40, %v544_v9  ;;  %v573_v52 = vrot.slane %v571_v41, 4  ;;  %v584_v54 = vshrl.u32 %v8623_v28, 16  ;;  %v8653_v9 = vld [vmem:[%s8482_s29 + $0x70] sm:$0xf] }
  0x6f   : > { %v576_v53 = vrot.slane %v574_v42, 5  ;;  %v6509_v56 = vcombine.low %v535_v37, %v545_v51  ;;  %v554_v58 = vrot.slane %v553_v43, 4  ;;  %v582_v60 = vrot.slane %v580_v48, 5  ;;  %v8664_v37 = vld [vmem:[%s8482_s29 + $0x74] sm:$0x1] }
  0x70   : > { %v564_v59 = vrot.slane %v563_v46, 4  ;;  %v586_v2 = vrot.slane %v584_v54, 4  ;;  %v590_v6 = vshll.u32 %v8627_v35, 16  ;;  %v595_v7 = vshrl.u32 %v8630_v36, 16 }
  0x71   : > { %v577_v1 = vor.u32 %v576_v53, %v573_v52  ;;  %7225 = vmatmul.mubr.msk.bf16.gmra.mrb[8].mxu0 %vm674_vm4, %v6509_v56  ;;  %v559_v14 = vsel %vm8517_vm3, %v554_v58, %v558_v30  ;;  %v598_v17 = vshll.u32 %v8630_v36, 16  ;;  %v604_v18 = vshll.u32 %v8639_v49, 16 }
  0x72   : > { %v569_v15 = vsel %vm8517_vm3, %v564_v59, %v568_v47  ;;  %v587_v23 = vor.u32 %v586_v2, %v582_v60  ;;  %v592_v24 = vrot.slane %v590_v6, 5  ;;  %v597_v25 = vrot.slane %v595_v7, 4  ;;  %v1018_v7 = vld [vmem:[%s8482_s29] sm:$0xe] }
  0x73   : > { %v6510_v20 = vcombine.low %v559_v14, %v569_v15  ;;  %v578_v22 = vrot.slane %v577_v1, 4  ;;  %v600_v29 = vrot.slane %v598_v17, 5  ;;  %v606_v32 = vrot.slane %v604_v18, 5 }
  0x74   : > { %v608_v34 = vshrl.u32 %v8639_v49, 16  ;;  %v588_v40 = vrot.slane %v587_v23, 4  ;;  %v614_v41 = vshll.u32 %v8645_v62, 16  ;;  %v619_v42 = vshrl.u32 %v8648_v63, 16 }
  0x75   : > { %7228 = vmatprep.mubr.msk.bf16.mxu0 %vm674_vm4, %v6510_v20  ;;  %v583_v30 = vsel %vm8517_vm3, %v578_v22, %v582_v60  ;;  %v601_v43 = vor.u32 %v600_v29, %v597_v25  ;;  %v622_v47 = vshll.u32 %v8648_v63, 16  ;;  %v628_v48 = vshll.u32 %v8653_v9, 16 }
  0x76   : > { %v610_v46 = vrot.slane %v608_v34, 4  ;;  %v593_v51 = vsel %vm8517_vm3, %v588_v40, %v592_v24  ;;  %v616_v52 = vrot.slane %v614_v41, 5  ;;  %v621_v53 = vrot.slane %v619_v42, 4  ;;  %v1019_v34 = vld [vmem:[%s8482_s29 + $0xc] sm:$0xe] }
  0x77   : > { %v632_v54 = vshrl.u32 %v8653_v9, 16  ;;  %v6511_v56 = vcombine.low %v583_v30, %v593_v51  ;;  %v602_v58 = vrot.slane %v601_v43, 4  ;;  %v624_v60 = vrot.slane %v622_v47, 5  ;;  %v1020_v30 = vld [vmem:[%s8482_s29 + $0x18] sm:$0xe] }
  0x78   : > { %v611_v59 = vor.u32 %v610_v46, %v606_v32  ;;  %v630_v1 = vrot.slane %v628_v48, 5  ;;  %v638_v6 = vshll.u32 %v8664_v37, 16  ;;  %v8683_v18 = vsel %vm705_vm0, %v8565_v16, 0  ;;  %v1021_v47 = vld [vmem:[%s8482_s29 + $0x24] sm:$0xe] }
  0x79   : > { %v634_v2 = vrot.slane %v632_v54, 4  ;;  %7229 = vmatmul.mubr.msk.bf16.gmra.mrb[12].mxu0 %vm674_vm4, %v6511_v56  ;;  %v607_v14 = vsel %vm8517_vm3, %v602_v58, %v606_v32  ;;  %v625_v17 = vor.u32 %v624_v60, %v621_v53  ;;  %v1060_v20 = vrot.slane %v8502_v12, 5 }
  0x7a   : > { %v612_v15 = vrot.slane %v611_v59, 4  ;;  %v640_v23 = vrot.slane %v638_v6, 5  ;;  %v1056_v24 = vrot.slane %v8491_v5, 5  ;;  %v6524_v32 = vcombine.low %v8485_v3, %v8488_v4  ;;  %v3405_v5 = vld [vmem:[#allocation2] sm:$0x1] }
  0x7b   : > { %v635_v22 = vor.u32 %v634_v2, %v630_v1  ;;  %v626_v29 = vrot.slane %v625_v17, 4  ;;  %v1063_v40 = vrot.slane %v8505_v13, 5  ;;  %v6525_v42 = vcombine.low %v8498_v10, %v8502_v12  ;;  %v1023_v2 = vld [vmem:[%s8482_s29 + $0x3c] sm:$0xe]  ;;  %v1024_v17 = vld [vmem:[%s8482_s29 + $0x48] sm:$0xe] }
  0x7c   : > { %v617_v25 = vsel %vm8517_vm3, %v612_v15, %v616_v52  ;;  %v6526_v3 = vcombine.low %v8513_v26, %v8522_v31  ;;  %v6544_v46 = vrot.slane %v1018_v7, 9  ;;  %v1053_v13 = vrot.slane %v8488_v4, 5  ;;  %v1022_v4 = vld [vmem:[%s8482_s29 + $0x30] sm:$0xe] }
  0x7d   : > { %v6512_v16 = vcombine.low %v607_v14, %v617_v25  ;;  %v636_v41 = vrot.slane %v635_v22, 4  ;;  %v631_v43 = vsel %vm8517_vm3, %v626_v29, %v630_v1  ;;  %v6545_v12 = vrot.slane %v1019_v34, 9 }
  0x7e   : > { %v1062_v48 = vrot.slane %v1060_v20, 4  ;;  %v6546_v51 = vrot.slane %v1020_v30, 9  ;;  %v8713_v53 = vsel %vm8698_vm7, %v6544_v46, %v1053_v13  ;;  %v1055_v54 = vrot.slane %v1053_v13, 4  ;;  %v1026_v13 = vld [vmem:[%s8482_s29 + $0x60] sm:$0xe] }
  0x7f   : > { %7232 = vmatprep.mubr.msk.bf16.mxu0 %vm674_vm4, %v6512_v16  ;;  %v641_v10 = vsel %vm8517_vm3, %v636_v41, %v640_v23  ;;  %v1067_v56 = vrot.slane %v8522_v31, 5  ;;  %v8719_v58 = vsel %vm8698_vm7, %v6545_v12, %v1060_v20  ;;  %v1070_v60 = vrot.slane %v8526_v38, 5  ;;  %v1025_v16 = vld [vmem:[%s8482_s29 + $0x54] sm:$0xe] }
  0x80   : > { %v6513_v52 = vcombine.low %v631_v43, %v641_v10  ;;  %v8723_v59 = vsel %vm8698_vm7, %v1062_v48, %v1063_v40  ;;  %v6547_v1 = vrot.slane %v1021_v47, 9  ;;  %v8730_v6 = vsel %vm8698_vm7, %v1055_v54, %v1056_v24 }
  0x81   : > { %v6556_v7 = vcombine.low %v8719_v58, %v8723_v59  ;;  %v8736_v14 = vsel %vm8698_vm7, %v6546_v51, %v1067_v56  ;;  %v1069_v15 = vrot.slane %v1067_v56, 4  ;;  %v6555_v38 = vcombine.low %v8713_v53, %v8730_v6  ;;  %v1027_v51 = vld [vmem:[%s8482_s29 + $0x6c] sm:$0xe]  ;;  %v7860_v53 = vld [vmem:[%s8482_s29 + $0x30] sm:$0xff]   ;;  %v7861_v58 = vld [vmem:[%s8482_s29 + $0x3c] sm:$0xff]  }
  0x82   : > { %7233 = vmatmul.mubr.msk.bf16.gmra.mrb[16].mxu0 %vm674_vm4, %v6513_v52  ;;  %v1074_v20 = vrot.slane %v8539_v50, 5  ;;  %v1077_v22 = vrot.slane %v8547_v57, 5  ;;  %v6548_v23 = vrot.slane %v1022_v4, 9  ;;  %v1081_v25 = vrot.slane %v8558_v8, 5  ;;  %v6597_v4 = vld [vmem:[%s10183_s3 + $0xc] sm:$0xf] }
  0x83   : > { %7238 = vmatprep.mubr.msk.bf16.mxu0 %vm674_vm4, %v6524_v32  ;;  %v8746_v24 = vsel %vm8698_vm7, %v1069_v15, %v1070_v60  ;;  %v1084_v29 = vrot.slane %v8571_v19, 5  ;;  %v6549_v34 = vrot.slane %v1023_v2, 9  ;;  %v1088_v57 = vrot.slane %v8586_v39, 5 }
  0x84   : > { %v6557_v32 = vcombine.low %v8736_v14, %v8746_v24  ;;  %v8754_v30 = vsel %vm8698_vm7, %v6547_v1, %v1074_v20  ;;  %v1076_v40 = vrot.slane %v1074_v20, 4  ;;  %v8760_v41 = vsel %vm8698_vm7, %v6548_v23, %v1081_v25  ;;  %v8885_v24 = vld [vmem:[%s8482_s29 + $0x1c] sm:$0xf] }
  0x85   : > { %v1083_v43 = vrot.slane %v1081_v25, 4  ;;  %v1091_v19 = vrot.slane %v8591_v44, 5  ;;  %v6550_v46 = vrot.slane %v1024_v17, 9  ;;  %v8770_v10 = vsel %vm8698_vm7, %v6549_v34, %v1088_v57 }
  0x86   : > { %v8766_v47 = vsel %vm8698_vm7, %v1076_v40, %v1077_v22  ;;  %v1090_v12 = vrot.slane %v1088_v57, 4  ;;  %v1095_v48 = vrot.slane %v8605_v61, 5  ;;  %v1098_v54 = vrot.slane %v8610_v11, 5 }
  0x87   : > { %v6558_v52 = vcombine.low %v8754_v30, %v8766_v47  ;;  %v1085_v44 = vsel %vm8698_vm7, %v1083_v43, %v1084_v29  ;;  %v6551_v56 = vrot.slane %v1025_v16, 9  ;;  %v1102_v11 = vrot.slane %v8623_v28, 5 }
  0x88   : > { %v6559_v60 = vcombine.low %v8760_v41, %v1085_v44  ;;  %v1092_v1 = vsel %vm8698_vm7, %v1090_v12, %v1091_v19  ;;  %v1096_v2 = vsel %vm8698_vm7, %v6550_v46, %v1095_v48  ;;  %v1097_v15 = vrot.slane %v1095_v48, 4 }
  0x89   : > { %v6560_v17 = vcombine.low %v8770_v10, %v1092_v1  ;;  %v1105_v20 = vrot.slane %v8627_v35, 5  ;;  %v6552_v22 = vrot.slane %v1026_v13, 9  ;;  %v1109_v25 = vrot.slane %v8639_v49, 5 }
  0x8a   : > { %7239 = vmatmul.mubr.msk.bf16.vlgmr.msra.gmra.mrb[0].mxu0 %vm674_vm4, %v6525_v42  ;;  %v1099_v23 = vsel %vm8698_vm7, %v1097_v15, %v1098_v54  ;;  %v1112_v42 = vrot.slane %v8645_v62, 5  ;;  %v6553_v29 = vrot.slane %v1027_v51, 9  ;;  %v1103_v35 = vsel %vm8698_vm7, %v6551_v56, %v1102_v11  ;;  %v6624_v51 = vld [vmem:[%s8482_s29 + $0x24] sm:$0xf] }
  0x8b   : > { %7259 = vmatpush3.bf16.msra.mxu0 %v8683_v18  ;;  %7242 = vmatprep.mubr.msk.bf16.mxu0 %vm674_vm4, %v6526_v3  ;;  %v6561_v34 = vcombine.low %v1096_v2, %v1099_v23  ;;  %v1104_v18 = vrot.slane %v1102_v11, 4  ;;  %v1116_v30 = vrot.slane %v8653_v9, 5  ;;  %v1110_v26 = vsel %vm8698_vm7, %v6552_v22, %v1109_v25  ;;  %v8900_v2 = vld [vmem:[%s8482_s29 + $0x28] sm:$0xf]  ;;  %v8904_v22 = vld [vmem:[%s8482_s29 + $0x20] sm:$0x1] }
  0x8c   : > { %7751 = vmatprep.subr.msk.bf16.mxu0 %vm705_vm0, %v6597_v4  ;;  %v1111_v31 = vrot.slane %v1109_v25, 4  ;;  %v1119_v3 = vrot.slane %v8664_v37, 5  ;;  %v6527_v40 = vcombine.low %v8536_v45, %v8539_v50  ;;  %v6528_v41 = vcombine.low %v8555_v0, %v8558_v8  ;;  %v6627_v23 = vld [vmem:[%s8482_s29 + $0x30] sm:$0xf] }
  0x8d   : > { %v1106_v62 = vsel %vm8698_vm7, %v1104_v18, %v1105_v20  ;;  %v1117_v57 = vsel %vm8698_vm7, %v6553_v29, %v1116_v30  ;;  %v1118_v16 = vrot.slane %v1116_v30, 4  ;;  %v6529_v45 = vcombine.low %v8578_v33, %v8586_v39 }
  0x8e   : > { %v6562_v43 = vcombine.low %v1103_v35, %v1106_v62  ;;  %v1113_v19 = vsel %vm8698_vm7, %v1111_v31, %v1112_v42  ;;  %v6530_v50 = vcombine.low %v8599_v55, %v8605_v61  ;;  %v6531_v0 = vcombine.low %v8620_v21, %v8623_v28  ;;  %v6648_v55 = vld [vmem:[%s10183_s3 + $0x10] sm:$0xf]  ;;  %v7858_v21 = vld [vmem:[%s8482_s29 + $0x18] sm:$0xff]   ;;  %v7859_v28 = vld [vmem:[%s8482_s29 + $0x24] sm:$0xff]  }
  0x8f   : > { %v6563_v46 = vcombine.low %v1110_v26, %v1113_v19  ;;  %v1120_v37 = vsel %vm8698_vm7, %v1118_v16, %v1119_v3  ;;  %v6532_v8 = vcombine.low %v8630_v36, %v8639_v49  ;;  %v6533_v33 = vcombine.low %v8648_v63, %v8653_v9  ;;  %v7857_v61 = vld [vmem:[%s8482_s29 + $0xc] sm:$0xff]   ;;  %v8868_v49 = vld [vmem:[%s10183_s3 + $0x14] sm:$0xf] }
  0x90   : > { %v6564_v13 = vcombine.low %v1117_v57, %v1120_v37  ;;  %v1426_v39 = vsel %vm705_vm0, %v6597_v4, 0  ;;  %v1894_v36 = vsel %vm705_vm0, %v6648_v55, 0  ;;  %v6618_v63 = vld [vmem:[%s8482_s29 + $0xc] sm:$0xf]  ;;  %v8876_v9 = vld [vmem:[%s8482_s29 + $0x10] sm:$0xf] }
  0x91   : > { %v1592_v59 = vshrl.u32 %v6618_v63, 16  ;;  %v1595_v6 = vshll.u32 %v6618_v63, 16  ;;  %v1605_v14 = vshrl.u32 %v8876_v9, 16  ;;  %v1625_v54 = vshll.u32 %v8885_v24, 16  ;;  %v7862_v4 = vld [vmem:[%s8482_s29 + $0x48] sm:$0xff]  }
  0x92   : > { %7243 = vmatmul.mubr.msk.bf16.gmra.mrb[4].mxu0 %vm674_vm4, %v6527_v40  ;;  %v1629_v56 = vshrl.u32 %v8885_v24, 16  ;;  %v1640_v15 = vshrl.u32 %v6624_v51, 16  ;;  %v8910_v35 = vld [vmem:[%s8482_s29 + $0x34] sm:$0xf]  ;;  %v1649_v18 = vshll.u32 %v8900_v2, 16  ;;  %v1653_v30 = vshrl.u32 %v8900_v2, 16 }
  0x93   : > { %7246 = vmatprep.mubr.msk.bf16.mxu0 %vm674_vm4, %v6528_v41  ;;  %v1594_v47 = vrot.slane %v1592_v59, 4  ;;  %v1597_v10 = vrot.slane %v1595_v6, 5  ;;  %v1607_v48 = vrot.slane %v1605_v14, 4  ;;  %v8907_v29 = vrot.slane %v1625_v54, 5  ;;  %v8931_v63 = vld [vmem:[%s8482_s29 + $0x40] sm:$0xf] }
  0x94   : > { %v1635_v31 = vshll.u32 %v8904_v22, 16  ;;  %v1642_v3 = vrot.slane %v1640_v15, 4  ;;  %v1664_v62 = vshrl.u32 %v6627_v23, 16  ;;  %v1667_v57 = vshll.u32 %v6627_v23, 16 }
  0x95   : > { %v1598_v11 = vor.u32 %v1597_v10, %v1594_v47  ;;  %v1673_v16 = vshll.u32 %v8910_v35, 16  ;;  %v1677_v41 = vshrl.u32 %v8910_v35, 16 }
  0x9a   : > { %7247 = vmatmul.mubr.msk.bf16.gmra.mrb[8].mxu0 %vm674_vm4, %v6529_v45  ;;  %v8921_v45 = vrot.slane %v1649_v18, 5 }
  0x9b   : > { %7250 = vmatprep.mubr.msk.bf16.mxu0 %vm674_vm4, %v6530_v50  ;;  %v1655_v50 = vrot.slane %v1653_v30, 4 }
  0x9d   : > { %v1656_v14 = vor.u32 %v1655_v50, %v8921_v45 }
  0xa2   : > { %7251 = vmatmul.mubr.msk.bf16.gmra.mrb[12].mxu0 %vm674_vm4, %v6531_v0  ;;  %v7865_v0 = vld [vmem:[%s8482_s29 + $0x6c] sm:$0xff]  }
  0xa3   : > { %7254 = vmatprep.mubr.msk.bf16.mxu0 %vm674_vm4, %v6532_v8  ;;  %v1637_v8 = vrot.slane %v1635_v31, 5  ;;  %v8963_v31 = vld [vmem:[%s8482_s29 + $0x58] sm:$0xf] }
  0xaa   : > { %7255 = vmatmul.mubr.msk.bf16.gmra.mrb[16].mxu0 %vm674_vm4, %v6533_v33  ;;  %v8925_v33 = vld [vmem:[%s8482_s29 + $0x2c] sm:$0x1] }
  0xab   : > { %7260 = vmatprep.mubr.msk.bf16.mxu0 %vm674_vm4, %v6555_v38  ;;  %v6621_v38 = vld [vmem:[%s8482_s29 + $0x18] sm:$0xf] }
  0xac   : > { %v1619_v44 = vshll.u32 %v6621_v38, 16 }
  0xae   : > { %v1621_v42 = vrot.slane %v1619_v44, 5 }
  0xb2   : > { %7261 = vmatmul.mubr.msk.bf16.vlgmr.msra.gmra.mrb[0].mxu0 %vm674_vm4, %v6556_v7  ;;  %v1601_v7 = vshll.u32 %v8876_v9, 16 }
  0xb3   : > { %7281 = vmatpush3.bf16.msra.mxu0 %v1426_v39  ;;  %7264 = vmatprep.mubr.msk.bf16.mxu0 %vm674_vm4, %v6557_v32  ;;  %v8889_v32 = vld [vmem:[%s8482_s29 + $0x14] sm:$0x1] }
  0xb4   : > { %7752 = vmatprep.subr.msk.bf16.mxu0 %vm705_vm0, %v6648_v55  ;;  %v8891_v12 = vrot.slane %v1601_v7, 5  ;;  %v1611_v1 = vshll.u32 %v8889_v32, 16  ;;  %v6630_v55 = vld [vmem:[%s8482_s29 + $0x3c] sm:$0xf]  ;;  %v8939_v7 = vld [vmem:[%s8482_s29 + $0x38] sm:$0x1] }
  0xb5   : > { %v1688_v47 = vshrl.u32 %v6630_v55, 16  ;;  %v1691_v10 = vshll.u32 %v6630_v55, 16  ;;  %v1683_v54 = vshll.u32 %v8939_v7, 16 }
  0xb6   : > { %v1608_v20 = vor.u32 %v1607_v48, %v8891_v12  ;;  %v1613_v26 = vrot.slane %v1611_v1, 5  ;;  %v1701_v48 = vshrl.u32 %v8931_v63, 16 }
  0xb7   : > { %v1690_v23 = vrot.slane %v1688_v47, 4 }
  0xb8   : > { %v1609_v19 = vrot.slane %v1608_v20, 4  ;;  %v1703_v18 = vrot.slane %v1701_v48, 4 }
  0xba   : > { %7265 = vmatmul.mubr.msk.bf16.gmra.mrb[4].mxu0 %vm674_vm4, %v6558_v52  ;;  %v1616_v52 = vshrl.u32 %v6621_v38, 16  ;;  %v1659_v38 = vshll.u32 %v8925_v33, 16 }
  0xbb   : > { %7268 = vmatprep.mubr.msk.bf16.mxu0 %vm674_vm4, %v6559_v60  ;;  %v7863_v60 = vld [vmem:[%s8482_s29 + $0x54] sm:$0xff]  }
  0xbc   : > { %v1618_v25 = vrot.slane %v1616_v52, 4  ;;  %v1661_v20 = vrot.slane %v1659_v38, 5 }
  0xc2   : > { %7269 = vmatmul.mubr.msk.bf16.gmra.mrb[8].mxu0 %vm674_vm4, %v6560_v17  ;;  %v1643_v17 = vshll.u32 %v6624_v51, 16 }
  0xc3   : > { %7272 = vmatprep.mubr.msk.bf16.mxu0 %vm674_vm4, %v6561_v34  ;;  %v1631_v34 = vrot.slane %v1629_v56, 4  ;;  %v6633_v56 = vld [vmem:[%s8482_s29 + $0x48] sm:$0xf] }
  0xc4   : > { %v1645_v40 = vrot.slane %v1643_v17, 5  ;;  %v8957_v17 = vld [vmem:[%s8482_s29 + $0x4c] sm:$0xf]  ;;  %v1712_v30 = vshrl.u32 %v6633_v56, 16 }
  0xc5   : > { %v1632_v37 = vor.u32 %v1631_v34, %v8907_v29 }
  0xc6   : > { %v1646_v39 = vor.u32 %v1645_v40, %v1642_v3 }
  0xc7   : > { %v1633_v6 = vrot.slane %v1632_v37, 4 }
  0xc8   : > { %v1647_v51 = vrot.slane %v1646_v39, 4 }
  0xc9   : > { %v1638_v15 = vsel %vm8517_vm3, %v1633_v6, %v1637_v8  ;;  %v1714_v8 = vrot.slane %v1712_v30, 4 }
  0xca   : > { %7273 = vmatmul.mubr.msk.bf16.gmra.mrb[12].mxu0 %vm674_vm4, %v6562_v43  ;;  %v1599_v43 = vrot.slane %v1598_v11, 4  ;;  %v1657_v11 = vrot.slane %v1656_v14, 4  ;;  %v6639_v14 = vld [vmem:[%s8482_s29 + $0x60] sm:$0xf] }
  0xcb   : > { %7276 = vmatprep.mubr.msk.bf16.mxu0 %vm674_vm4, %v6563_v46  ;;  %v1622_v46 = vor.u32 %v1621_v42, %v1618_v25  ;;  %v1693_v25 = vrot.slane %v1691_v10, 5  ;;  %v6636_v42 = vld [vmem:[%s8482_s29 + $0x54] sm:$0xf]  ;;  %v8993_v10 = vld [vmem:[%s8482_s29 + $0x5c] sm:$0x1] }
  0xcd   : > { %v1623_v59 = vrot.slane %v1622_v46, 4  ;;  %v1662_v46 = vsel %vm8517_vm3, %v1657_v11, %v1661_v20  ;;  %v1694_v37 = vor.u32 %v1693_v25, %v1690_v23  ;;  %v1755_v11 = vshll.u32 %v8993_v10, 16  ;;  %v9007_v23 = vld [vmem:[%s8482_s29 + $0x70] sm:$0xf]  ;;  %v9012_v25 = vld [vmem:[%s10183_s3 + $0x18] sm:$0xf] }
  0xce   : > { %v1760_v20 = vshrl.u32 %v6639_v14, 16 }
  0xcf   : > { %v1628_v1 = vsel %vm8517_vm3, %v1623_v59, %v8907_v29  ;;  %v1652_v29 = vsel %vm8517_vm3, %v1647_v51, %v8921_v45  ;;  %v1749_v45 = vshrl.u32 %v8963_v31, 16  ;;  %v1695_v47 = vrot.slane %v1694_v37, 4 }
  0xd0   : > { %v6650_v55 = vcombine.low %v1628_v1, %v1638_v15  ;;  %v6651_v38 = vcombine.low %v1652_v29, %v1662_v46  ;;  %v1762_v37 = vrot.slane %v1760_v20, 4 }
  0xd2   : > { %7277 = vmatmul.mubr.msk.bf16.gmra.mrb[16].mxu0 %vm674_vm4, %v6564_v13  ;;  %v7864_v13 = vld [vmem:[%s8482_s29 + $0x60] sm:$0xff]  }
  0xd3   : > { %7282 = vmatprep.mubr.msk.bf16.mxu0 %vm674_vm4, %v7857_v61  ;;  %v1666_v61 = vrot.slane %v1664_v62, 4  ;;  %v1685_v62 = vrot.slane %v1683_v54, 5  ;;  %v8999_v54 = vld [vmem:[%s8482_s29 + $0x64] sm:$0xf] }
  0xd4   : > { %v1773_v30 = vshrl.u32 %v8999_v54, 16 }
  0xda   : > { %7283 = vmatmul.mubr.msk.bf16.vlgmr.msra.gmra.mrb[0].mxu0 %vm674_vm4, %v7858_v21  ;;  %v1669_v21 = vrot.slane %v1667_v57, 5  ;;  %v8969_v57 = vld [vmem:[%s8482_s29 + $0x44] sm:$0x1] }
  0xdb   : > { %7303 = vmatpush3.bf16.msra.mxu0 %v1894_v36  ;;  %7286 = vmatprep.mubr.msk.bf16.mxu0 %vm674_vm4, %v7859_v28  ;;  %v8928_v28 = vrot.slane %v1673_v16, 5  ;;  %v1679_v36 = vrot.slane %v1677_v41, 4  ;;  %v1721_v16 = vshll.u32 %v8957_v17, 16  ;;  %v1725_v41 = vshrl.u32 %v8957_v17, 16 }
  0xdc   : > { %7753 = vmatprep.subr.msk.bf16.mxu0 %vm705_vm0, %v8868_v49  ;;  %v1670_v52 = vor.u32 %v1669_v21, %v1666_v61 }
  0xdd   : > { %v1680_v44 = vor.u32 %v1679_v36, %v8928_v28  ;;  %v8987_v36 = vld [vmem:[%s8482_s29 + $0x50] sm:$0x1] }
  0xde   : > { %v1671_v3 = vrot.slane %v1670_v52, 4 }
  0xdf   : > { %v1681_v40 = vrot.slane %v1680_v44, 4  ;;  %v1731_v44 = vshll.u32 %v8987_v36, 16 }
  0xe0   : > { %v1676_v61 = vsel %vm8517_vm3, %v1671_v3, %v8928_v28  ;;  %v1751_v28 = vrot.slane %v1749_v45, 4 }
  0xe1   : > { %v1686_v21 = vsel %vm8517_vm3, %v1681_v40, %v1685_v62  ;;  %v1733_v40 = vrot.slane %v1731_v44, 5 }
  0xe2   : > { %7287 = vmatmul.mubr.msk.bf16.gmra.mrb[4].mxu0 %vm674_vm4, %v7860_v53  ;;  %v1604_v53 = vsel %vm8517_vm3, %v1599_v43, %v8891_v12  ;;  %v1697_v12 = vshll.u32 %v8931_v63, 16  ;;  %v1736_v43 = vshrl.u32 %v6636_v42, 16 }
  0xe3   : > { %7290 = vmatprep.mubr.msk.bf16.mxu0 %vm674_vm4, %v7861_v58  ;;  %v1614_v58 = vsel %vm8517_vm3, %v1609_v19, %v1613_v26  ;;  %v1715_v26 = vshll.u32 %v6633_v56, 16  ;;  %v1739_v19 = vshll.u32 %v6636_v42, 16  ;;  %v2202_v56 = vsel %vm705_vm0, %v8868_v49, 0 }
  0xe4   : > { %v8960_v34 = vrot.slane %v1697_v12, 5  ;;  %v1738_v59 = vrot.slane %v1736_v43, 4  ;;  %v1763_v49 = vshll.u32 %v6639_v14, 16  ;;  %v1797_v43 = vshrl.u32 %v9007_v23, 16 }
  0xe5   : > { %v1717_v39 = vrot.slane %v1715_v26, 5  ;;  %v1741_v6 = vrot.slane %v1739_v19, 5 }
  0xe6   : > { %v1704_v50 = vor.u32 %v1703_v18, %v8960_v34  ;;  %v1769_v18 = vshll.u32 %v8999_v54, 16  ;;  %v1700_v26 = vsel %vm8517_vm3, %v1695_v47, %v8960_v34  ;;  %v1757_v34 = vrot.slane %v1755_v11, 5 }
  0xe7   : > { %v1718_v52 = vor.u32 %v1717_v39, %v1714_v8  ;;  %v1742_v15 = vor.u32 %v1741_v6, %v1738_v59  ;;  %v1765_v45 = vrot.slane %v1763_v49, 5  ;;  %v9029_v39 = vld [vmem:[%s8482_s29 + $0x68] sm:$0x1]  ;;  %v1799_v59 = vrot.slane %v1797_v43, 4  ;;  %v9033_v6 = vld [vmem:[%s8482_s29 + $0x7c] sm:$0xf] }
  0xe8   : > { %v1705_v48 = vrot.slane %v1704_v50, 4  ;;  %v1771_v50 = vrot.slane %v1769_v18, 5  ;;  %v1779_v44 = vshll.u32 %v9029_v39, 16 }
  0xe9   : > { %v1719_v3 = vrot.slane %v1718_v52, 4  ;;  %v1743_v46 = vrot.slane %v1742_v15, 4 }
  0xea   : > { %7291 = vmatmul.mubr.msk.bf16.gmra.mrb[8].mxu0 %vm674_vm4, %v7862_v4  ;;  %v7866_v4 = vld [vmem:[%s8482_s29 + $0x78] sm:$0xff]   ;;  %v1781_v18 = vrot.slane %v1779_v44, 5 }
  0xeb   : > { %7294 = vmatprep.mubr.msk.bf16.mxu0 %vm674_vm4, %v7863_v60  ;;  %v6649_v60 = vcombine.low %v1604_v53, %v1614_v58  ;;  %v8989_v53 = vrot.slane %v1721_v16, 5  ;;  %v1727_v58 = vrot.slane %v1725_v41, 4  ;;  %v1793_v41 = vshll.u32 %v9007_v23, 16  ;;  %v6670_v44 = vld [vmem:[%s8482_s29 + $0x18] sm:$0xe] }
  0xed   : > { %v1728_v1 = vor.u32 %v1727_v58, %v8989_v53  ;;  %v1795_v58 = vrot.slane %v1793_v41, 5  ;;  %v1724_v14 = vsel %vm8517_vm3, %v1719_v3, %v8989_v53  ;;  %v9055_v41 = vld [vmem:[%s8482_s29 + $0x80] sm:$0x1] }
  0xef   : > { %v1729_v19 = vrot.slane %v1728_v1, 4  ;;  %v1821_v1 = vshrl.u32 %v9033_v6, 16  ;;  %v1800_v15 = vor.u32 %v1799_v59, %v1795_v58 }
  0xf1   : > { %v1823_v3 = vrot.slane %v1821_v1, 4  ;;  %v6680_v1 = vrot.slane %v6670_v44, 9 }
  0xf2   : > { %7295 = vmatmul.mubr.msk.bf16.gmra.mrb[12].mxu0 %vm674_vm4, %v7864_v13  ;;  %v1745_v13 = vshll.u32 %v8963_v31, 16 }
  0xf3   : > { %7298 = vmatprep.mubr.msk.bf16.mxu0 %vm674_vm4, %v7865_v0  ;;  %v1707_v0 = vshll.u32 %v8969_v57, 16 }
  0xf4   : > { %v8995_v12 = vrot.slane %v1745_v13, 5 }
  0xf5   : > { %v1709_v51 = vrot.slane %v1707_v0, 5  ;;  %v1775_v0 = vrot.slane %v1773_v30, 4 }
  0xf6   : > { %v1752_v42 = vor.u32 %v1751_v28, %v8995_v12  ;;  %v1748_v47 = vsel %vm8517_vm3, %v1743_v46, %v8995_v12  ;;  %v9044_v28 = vld [vmem:[%s8482_s29 + $0x74] sm:$0x1] }
  0xf7   : > { %v1710_v29 = vsel %vm8517_vm3, %v1705_v48, %v1709_v51  ;;  %v1766_v51 = vor.u32 %v1765_v45, %v1762_v37  ;;  %v1776_v52 = vor.u32 %v1775_v0, %v1771_v50  ;;  %v1827_v37 = vshll.u32 %v9055_v41, 16 }
  0xf8   : > { %v1753_v13 = vrot.slane %v1752_v42, 4  ;;  %v6653_v8 = vcombine.low %v1700_v26, %v1710_v29  ;;  %v2071_v0 = vrot.slane %v8876_v9, 5 }
  0xf9   : > { %v1767_v42 = vrot.slane %v1766_v51, 4  ;;  %v1777_v49 = vrot.slane %v1776_v52, 4  ;;  %v1829_v59 = vrot.slane %v1827_v37, 5  ;;  %v6674_v37 = vld [vmem:[%s8482_s29 + $0x48] sm:$0xe] }
  0xfa   : > { %7299 = vmatmul.mubr.msk.bf16.gmra.mrb[16].mxu0 %vm674_vm4, %v7866_v4  ;;  %v6652_v4 = vcombine.low %v1676_v61, %v1686_v21  ;;  %v1758_v48 = vsel %vm8517_vm3, %v1753_v13, %v1757_v34 }
  0xfb   : > { %7304 = vmatprep.mubr.msk.bf16.mxu0 %vm674_vm4, %v6649_v60  ;;  %v6642_v60 = vld [vmem:[%s8482_s29 + $0x6c] sm:$0xf]  ;;  %v6655_v20 = vcombine.low %v1748_v47, %v1758_v48  ;;  %v1772_v43 = vsel %vm8517_vm3, %v1767_v42, %v1771_v50  ;;  %v2074_v47 = vrot.slane %v8889_v32, 5  ;;  %v2078_v48 = vrot.slane %v8885_v24, 5 }
  0xfc   : > { %v1784_v62 = vshrl.u32 %v6642_v60, 16  ;;  %v1787_v16 = vshll.u32 %v6642_v60, 16  ;;  %v1817_v60 = vshll.u32 %v9033_v6, 16  ;;  %v2085_v32 = vrot.slane %v8900_v2, 5 }
  0xfd   : > { %v2079_v2 = vsel %vm8698_vm7, %v6680_v1, %v2078_v48  ;;  %v2092_v42 = vrot.slane %v8910_v35, 5  ;;  %v2444_v35 = vsel %vm705_vm0, %v9012_v25, 0  ;;  %v2134_v1 = vrot.slane %v9033_v6, 5 }
  0xfe   : > { %v1786_v61 = vrot.slane %v1784_v62, 4  ;;  %v1789_v21 = vrot.slane %v1787_v16, 5  ;;  %v1819_v29 = vrot.slane %v1817_v60, 5  ;;  %v1801_v62 = vrot.slane %v1800_v15, 4 }
  0xff   : > { %v2081_v15 = vrot.slane %v8904_v22, 5  ;;  %v2087_v24 = vrot.slane %v2085_v32, 4 }
 0x100   : > { %v1790_v12 = vor.u32 %v1789_v21, %v1786_v61  ;;  %v1824_v34 = vor.u32 %v1823_v3, %v1819_v29 }
 0x102   : > { %7305 = vmatmul.mubr.msk.bf16.vlgmr.msra.gmra.mrb[0].mxu0 %vm674_vm4, %v6650_v55  ;;  %v6645_v55 = vld [vmem:[%s8482_s29 + $0x78] sm:$0xf]  ;;  %v1825_v21 = vrot.slane %v1824_v34, 4 }
 0x103   : > { %7325 = vmatpush3.bf16.msra.mxu0 %v2202_v56  ;;  %7308 = vmatprep.mubr.msk.bf16.mxu0 %vm674_vm4, %v6651_v38  ;;  %v1734_v38 = vsel %vm8517_vm3, %v1729_v19, %v1733_v40  ;;  %v1808_v53 = vshrl.u32 %v6645_v55, 16  ;;  %v1811_v56 = vshll.u32 %v6645_v55, 16  ;;  %v1791_v40 = vrot.slane %v1790_v12, 4 }
 0x104   : > { %7754 = vmatprep.subr.msk.bf16.mxu0 %vm705_vm0, %v9012_v25  ;;  %v6654_v11 = vcombine.low %v1724_v14, %v1734_v38  ;;  %v1782_v19 = vsel %vm8517_vm3, %v1777_v49, %v1781_v18  ;;  %v2073_v38 = vrot.slane %v2071_v0, 4  ;;  %v1830_v9 = vsel %vm8517_vm3, %v1825_v21, %v1829_v59  ;;  %v6672_v18 = vld [vmem:[%s8482_s29 + $0x30] sm:$0xe] }
 0x105   : > { %v1810_v30 = vrot.slane %v1808_v53, 4  ;;  %v1813_v26 = vrot.slane %v1811_v56, 5  ;;  %v1796_v13 = vsel %vm8517_vm3, %v1791_v40, %v1795_v58  ;;  %v6656_v50 = vcombine.low %v1772_v43, %v1782_v19  ;;  %v6671_v53 = vld [vmem:[%s8482_s29 + $0x24] sm:$0xe] }
 0x106   : > { %v2075_v52 = vsel %vm8698_vm7, %v2073_v38, %v2074_v47  ;;  %v2080_v12 = vrot.slane %v2078_v48, 4  ;;  %v6682_v3 = vrot.slane %v6672_v18, 9  ;;  %v2094_v40 = vrot.slane %v2092_v42, 4 }
 0x107   : > { %v1814_v46 = vor.u32 %v1813_v26, %v1810_v30  ;;  %v6673_v30 = vld [vmem:[%s8482_s29 + $0x3c] sm:$0xe]  ;;  %v2102_v19 = vrot.slane %v8969_v57, 5  ;;  %v2116_v59 = vrot.slane %v8993_v10, 5  ;;  %v2120_v38 = vrot.slane %v8999_v54, 5 }
 0x108   : > { %v2127_v10 = vrot.slane %v9007_v23, 5  ;;  %v2130_v54 = vrot.slane %v9044_v28, 5 }
 0x109   : > { %v1815_v61 = vrot.slane %v1814_v46, 4  ;;  %v2106_v46 = vrot.slane %v8957_v17, 5  ;;  %v2109_v17 = vrot.slane %v8987_v36, 5  ;;  %v2122_v44 = vrot.slane %v2120_v38, 4 }
 0x10a   : > { %7309 = vmatmul.mubr.msk.bf16.gmra.mrb[4].mxu0 %vm674_vm4, %v6652_v4  ;;  %v1803_v4 = vshll.u32 %v9044_v28, 16 }
 0x10b   : > { %7312 = vmatprep.mubr.msk.bf16.mxu0 %vm674_vm4, %v6653_v8  ;;  %v6669_v8 = vld [vmem:[%s8482_s29 + $0xc] sm:$0xe]  ;;  %v1820_v58 = vsel %vm8517_vm3, %v1815_v61, %v1819_v29 }
 0x10c   : > { %v1805_v16 = vrot.slane %v1803_v4, 5  ;;  %v6679_v14 = vrot.slane %v6669_v8, 9  ;;  %v6658_v56 = vcombine.low %v1820_v58, %v1830_v9  ;;  %v6681_v4 = vrot.slane %v6671_v53, 9  ;;  %v6676_v58 = vld [vmem:[%s8482_s29 + $0x60] sm:$0xe] }
 0x10d   : > { %v6677_v9 = vld [vmem:[%s8482_s29 + $0x6c] sm:$0xe] }
 0x10e   : > { %v1806_v45 = vsel %vm8517_vm3, %v1801_v62, %v1805_v16  ;;  %v2072_v51 = vsel %vm8698_vm7, %v6679_v14, %v2071_v0  ;;  %v2086_v49 = vsel %vm8698_vm7, %v6681_v4, %v2085_v32  ;;  %v2095_v62 = vrot.slane %v8939_v7, 5 }
 0x10f   : > { %v6657_v55 = vcombine.low %v1796_v13, %v1806_v45  ;;  %v6690_v60 = vcombine.low %v2072_v51, %v2075_v52  ;;  %v6683_v16 = vrot.slane %v6673_v30, 9  ;;  %v2093_v7 = vsel %vm8698_vm7, %v6682_v3, %v2092_v42  ;;  %v6675_v45 = vld [vmem:[%s8482_s29 + $0x54] sm:$0xe]  ;;  %v7870_v30 = vld [vmem:[%s8482_s29 + $0x3c] sm:$0xff]  }
 0x110   : > { %v2096_v25 = vsel %vm8698_vm7, %v2094_v40, %v2095_v62  ;;  %v2113_v13 = vrot.slane %v8963_v31, 5  ;;  %v6685_v61 = vrot.slane %v6675_v45, 9  ;;  %v6686_v52 = vrot.slane %v6676_v58, 9  ;;  %v9179_v3 = vld [vmem:[%s8482_s29 + $0x1c] sm:$0xf] }
 0x111   : > { %v6693_v0 = vcombine.low %v2093_v7, %v2096_v25  ;;  %v2123_v32 = vrot.slane %v9029_v39, 5  ;;  %v6687_v53 = vrot.slane %v6677_v9, 9  ;;  %v6756_v40 = vld [vmem:[%s8482_s29 + $0x24] sm:$0xf]  ;;  %v7872_v25 = vld [vmem:[%s8482_s29 + $0x54] sm:$0xff]  }
 0x112   : > { %7313 = vmatmul.mubr.msk.bf16.gmra.mrb[8].mxu0 %vm674_vm4, %v6654_v11  ;;  %v2088_v11 = vrot.slane %v8925_v33, 5  ;;  %v2099_v33 = vrot.slane %v8931_v63, 5  ;;  %v6783_v63 = vld [vmem:[%s10183_s3 + $0x1c] sm:$0xf]  ;;  %v2115_v21 = vrot.slane %v2113_v13, 4  ;;  %v2114_v47 = vsel %vm8698_vm7, %v6685_v61, %v2113_v13 }
 0x113   : > { %7316 = vmatprep.mubr.msk.bf16.mxu0 %vm674_vm4, %v6655_v20  ;;  %v2082_v20 = vsel %vm8698_vm7, %v2080_v12, %v2081_v15  ;;  %v2124_v23 = vsel %vm8698_vm7, %v2122_v44, %v2123_v32  ;;  %v2128_v39 = vsel %vm8698_vm7, %v6687_v53, %v2127_v10  ;;  %v6678_v12 = vld [vmem:[%s8482_s29 + $0x78] sm:$0xe]  ;;  %v2912_v18 = vsel %vm705_vm0, %v6783_v63, 0  ;;  %v9209_v58 = vld [vmem:[%s8482_s29 + $0x40] sm:$0xf] }
 0x114   : > { %v2089_v22 = vsel %vm8698_vm7, %v2087_v24, %v2088_v11  ;;  %v6691_v26 = vcombine.low %v2079_v2, %v2082_v20  ;;  %v2101_v43 = vrot.slane %v2099_v33, 4  ;;  %v2100_v57 = vsel %vm8698_vm7, %v6683_v16, %v2099_v33  ;;  %v9169_v33 = vld [vmem:[%s10183_s3 + $0x20] sm:$0xf] }
 0x115   : > { %v6692_v29 = vcombine.low %v2086_v49, %v2089_v22  ;;  %v2117_v36 = vsel %vm8698_vm7, %v2115_v21, %v2116_v59  ;;  %v6688_v24 = vrot.slane %v6678_v12, 9  ;;  %v2136_v11 = vrot.slane %v2134_v1, 4  ;;  %v7867_v49 = vld [vmem:[%s8482_s29 + $0x18] sm:$0xff]   ;;  %v7869_v22 = vld [vmem:[%s8482_s29 + $0x30] sm:$0xff]   ;;  %v9203_v21 = vld [vmem:[%s8482_s29 + $0x2c] sm:$0x1] }
 0x116   : > { %v2103_v34 = vsel %vm8698_vm7, %v2101_v43, %v2102_v19  ;;  %v6696_v51 = vcombine.low %v2114_v47, %v2117_v36  ;;  %v2137_v2 = vrot.slane %v9055_v41, 5  ;;  %v7868_v41 = vld [vmem:[%s8482_s29 + $0x24] sm:$0xff]   ;;  %v2619_v16 = vshll.u32 %v9179_v3, 16  ;;  %v6762_v36 = vld [vmem:[%s8482_s29 + $0x3c] sm:$0xf] }
 0x117   : > { %v6694_v8 = vcombine.low %v2100_v57, %v2103_v34  ;;  %v2135_v6 = vsel %vm8698_vm7, %v6688_v24, %v2134_v1  ;;  %v2623_v43 = vshrl.u32 %v9179_v3, 16  ;;  %v9187_v19 = vld [vmem:[%s8482_s29 + $0x28] sm:$0xf]  ;;  %v2637_v7 = vshll.u32 %v6756_v40, 16  ;;  %v6759_v34 = vld [vmem:[%s8482_s29 + $0x30] sm:$0xf] }
 0x118   : > { %v2138_v20 = vsel %vm8698_vm7, %v2136_v11, %v2137_v2  ;;  %v2643_v45 = vshll.u32 %v9187_v19, 16  ;;  %v2658_v59 = vshrl.u32 %v6759_v34, 16  ;;  %v2653_v44 = vshll.u32 %v9203_v21, 16  ;;  %v9225_v11 = vld [vmem:[%s8482_s29 + $0x38] sm:$0x1] }
 0x119   : > { %v6699_v42 = vcombine.low %v2135_v6, %v2138_v20  ;;  %v2625_v13 = vrot.slane %v2623_v43, 4  ;;  %v2639_v61 = vrot.slane %v2637_v7, 5  ;;  %v2682_v32 = vshrl.u32 %v6762_v36, 16  ;;  %v7875_v2 = vld [vmem:[%s8482_s29 + $0x78] sm:$0xff]   ;;  %v6765_v20 = vld [vmem:[%s8482_s29 + $0x48] sm:$0xf] }
 0x11a   : > { %7317 = vmatmul.mubr.msk.bf16.gmra.mrb[12].mxu0 %vm674_vm4, %v6656_v50  ;;  %v6684_v50 = vrot.slane %v6674_v37, 9  ;;  %v9191_v37 = vrot.slane %v2619_v16, 5  ;;  %v2685_v53 = vshll.u32 %v6762_v36, 16  ;;  %v2709_v7 = vshll.u32 %v6765_v20, 16 }
 0x11b   : > { %7320 = vmatprep.mubr.msk.bf16.mxu0 %vm674_vm4, %v6657_v55  ;;  %v2108_v55 = vrot.slane %v2106_v46, 4  ;;  %v3099_v27 = vrot.slane %v9203_v21, 5 }
 0x11c   : > { %v2107_v31 = vsel %vm8698_vm7, %v6684_v50, %v2106_v46  ;;  %v7873_v50 = vld [vmem:[%s8482_s29 + $0x60] sm:$0xff]  }
 0x11d   : > { %v2110_v14 = vsel %vm8698_vm7, %v2108_v55, %v2109_v17  ;;  %v9200_v55 = vld [vmem:[%s8482_s29 + $0x20] sm:$0x1] }
 0x11e   : > { %v6695_v48 = vcombine.low %v2107_v31, %v2110_v14  ;;  %v2661_v31 = vshll.u32 %v6759_v34, 16  ;;  %v2629_v9 = vshll.u32 %v9200_v55, 16 }
 0x122   : > { %7321 = vmatmul.mubr.msk.bf16.gmra.mrb[16].mxu0 %vm674_vm4, %v6658_v56  ;;  %v2129_v56 = vrot.slane %v2127_v10, 4  ;;  %v2626_v10 = vor.u32 %v2625_v13, %v9191_v37 }
 0x123   : > { %7326 = vmatprep.mubr.msk.bf16.mxu0 %vm674_vm4, %v6690_v60  ;;  %v2121_v60 = vsel %vm8698_vm7, %v6686_v52, %v2120_v38 }
 0x124   : > { %v2131_v28 = vsel %vm8698_vm7, %v2129_v56, %v2130_v54  ;;  %v6697_v15 = vcombine.low %v2121_v60, %v2124_v23  ;;  %v2691_v56 = vshll.u32 %v9209_v58, 16  ;;  %v2695_v54 = vshrl.u32 %v9209_v58, 16 }
 0x125   : > { %v6698_v4 = vcombine.low %v2128_v39, %v2131_v28  ;;  %v2660_v60 = vrot.slane %v2658_v59, 4  ;;  %v2663_v23 = vrot.slane %v2661_v31, 5  ;;  %v7874_v28 = vld [vmem:[%s8482_s29 + $0x6c] sm:$0xff]  }
 0x126   : > { %v9255_v59 = vld [vmem:[%s8482_s29 + $0x50] sm:$0x1] }
 0x12a   : > { %7327 = vmatmul.mubr.msk.bf16.vlgmr.msra.gmra.mrb[0].mxu0 %vm674_vm4, %v6691_v26  ;;  %v6753_v26 = vld [vmem:[%s8482_s29 + $0x18] sm:$0xf] }
 0x12b   : > { %7347 = vmatpush3.bf16.msra.mxu0 %v2444_v35  ;;  %7330 = vmatprep.mubr.msk.bf16.mxu0 %vm674_vm4, %v6692_v29  ;;  %v7871_v29 = vld [vmem:[%s8482_s29 + $0x48] sm:$0xff]   ;;  %v2610_v62 = vshrl.u32 %v6753_v26, 16  ;;  %v2613_v35 = vshll.u32 %v6753_v26, 16  ;;  %v2664_v26 = vor.u32 %v2663_v23, %v2660_v60 }
 0x12c   : > { %7755 = vmatprep.subr.msk.bf16.mxu0 %vm705_vm0, %v6783_v63  ;;  %v2634_v63 = vshrl.u32 %v6756_v40, 16  ;;  %v2677_v40 = vshll.u32 %v9225_v11, 16 }
 0x12d   : > { %v2612_v46 = vrot.slane %v2610_v62, 4  ;;  %v2615_v57 = vrot.slane %v2613_v35, 5  ;;  %v9239_v62 = vld [vmem:[%s8482_s29 + $0x44] sm:$0x1] }
 0x12e   : > { %v2636_v17 = vrot.slane %v2634_v63, 4  ;;  %v2706_v63 = vshrl.u32 %v6765_v20, 16 }
 0x12f   : > { %v2616_v14 = vor.u32 %v2615_v57, %v2612_v46  ;;  %v6768_v57 = vld [vmem:[%s8482_s29 + $0x54] sm:$0xf] }
 0x130   : > { %v2640_v52 = vor.u32 %v2639_v61, %v2636_v17  ;;  %v2679_v61 = vrot.slane %v2677_v40, 5  ;;  %v2730_v36 = vshrl.u32 %v6768_v57, 16 }
 0x131   : > { %v2617_v12 = vrot.slane %v2616_v14, 4 }
 0x132   : > { %7331 = vmatmul.mubr.msk.bf16.gmra.mrb[4].mxu0 %vm674_vm4, %v6693_v0  ;;  %v2647_v0 = vshrl.u32 %v9187_v19, 16  ;;  %v9228_v6 = vrot.slane %v2640_v52, 4  ;;  %v2732_v20 = vrot.slane %v2730_v36, 4 }
 0x133   : > { %7334 = vmatprep.mubr.msk.bf16.mxu0 %vm674_vm4, %v6694_v8  ;;  %v9196_v8 = vld [vmem:[%s8482_s29 + $0x34] sm:$0xf]  ;;  %v2622_v35 = vsel %vm8517_vm3, %v2617_v12, %v9191_v37  ;;  %v2701_v37 = vshll.u32 %v9239_v62, 16 }
 0x134   : > { %v2667_v38 = vshll.u32 %v9196_v8, 16  ;;  %v2671_v47 = vshrl.u32 %v9196_v8, 16 }
 0x136   : > { %v9220_v1 = vrot.slane %v2667_v38, 5  ;;  %v2673_v39 = vrot.slane %v2671_v47, 4  ;;  %v2708_v38 = vrot.slane %v2706_v63, 4  ;;  %v9264_v47 = vld [vmem:[%s8482_s29 + $0x58] sm:$0xf] }
 0x137   : > { %v2739_v60 = vshll.u32 %v9264_v47, 16  ;;  %v2743_v23 = vshrl.u32 %v9264_v47, 16  ;;  %v9296_v63 = vld [vmem:[%s8482_s29 + $0x68] sm:$0x1] }
 0x13a   : > { %7335 = vmatmul.mubr.msk.bf16.gmra.mrb[8].mxu0 %vm674_vm4, %v6695_v48  ;;  %v9214_v48 = vrot.slane %v2643_v45, 5  ;;  %v7876_v45 = vld [vmem:[%s8482_s29 + $0x84] sm:$0xff]  }
 0x13b   : > { %7338 = vmatprep.mubr.msk.bf16.mxu0 %vm674_vm4, %v6696_v51  ;;  %v2649_v51 = vrot.slane %v2647_v0, 4 }
 0x13c   : > { %v2646_v31 = vsel %vm8517_vm3, %v9228_v6, %v9214_v48 }
 0x13d   : > { %v2650_v24 = vor.u32 %v2649_v51, %v9214_v48  ;;  %v2725_v48 = vshll.u32 %v9255_v59, 16 }
 0x13f   : > { %v2651_v43 = vrot.slane %v2650_v24, 4 }
 0x142   : > { %7339 = vmatmul.mubr.msk.bf16.gmra.mrb[12].mxu0 %vm674_vm4, %v6697_v15  ;;  %v2627_v15 = vrot.slane %v2626_v10, 4  ;;  %v6771_v10 = vld [vmem:[%s8482_s29 + $0x60] sm:$0xf] }
 0x143   : > { %7342 = vmatprep.mubr.msk.bf16.mxu0 %vm674_vm4, %v6698_v4  ;;  %v2631_v4 = vrot.slane %v2629_v9, 5  ;;  %v2711_v9 = vrot.slane %v2709_v7, 5 }
 0x145   : > { %v2632_v16 = vsel %vm8517_vm3, %v2627_v15, %v2631_v4 }
 0x146   : > { %v6784_v0 = vcombine.low %v2622_v35, %v2632_v16 }
 0x14a   : > { %7343 = vmatmul.mubr.msk.bf16.gmra.mrb[16].mxu0 %vm674_vm4, %v6699_v42  ;;  %v2684_v42 = vrot.slane %v2682_v32, 4  ;;  %v9270_v32 = vld [vmem:[%s8482_s29 + $0x64] sm:$0xf] }
 0x14b   : > { %7348 = vmatprep.mubr.msk.bf16.mxu0 %vm674_vm4, %v7867_v49  ;;  %v2687_v49 = vrot.slane %v2685_v53, 5  ;;  %v2763_v4 = vshll.u32 %v9270_v32, 16  ;;  %v2767_v24 = vshrl.u32 %v9270_v32, 16 }
 0x14d   : > { %v2688_v34 = vor.u32 %v2687_v49, %v2684_v42  ;;  %v9298_v7 = vrot.slane %v2763_v4, 5 }
 0x14f   : > { %v2689_v53 = vrot.slane %v2688_v34, 4 }
 0x152   : > { %7349 = vmatmul.mubr.msk.bf16.vlgmr.msra.gmra.mrb[0].mxu0 %vm674_vm4, %v7868_v41  ;;  %v9231_v41 = vrot.slane %v2691_v56, 5 }
 0x153   : > { %7369 = vmatpush3.bf16.msra.mxu0 %v2912_v18  ;;  %7352 = vmatprep.mubr.msk.bf16.mxu0 %vm674_vm4, %v7869_v22  ;;  %v2697_v22 = vrot.slane %v2695_v54, 4  ;;  %v9234_v18 = vld [vmem:[%s8482_s29 + $0x4c] sm:$0xf]  ;;  %v2703_v54 = vrot.slane %v2701_v37, 5  ;;  %v9303_v37 = vld [vmem:[%s8482_s29 + $0x70] sm:$0xf] }
 0x154   : > { %7756 = vmatprep.subr.msk.bf16.mxu0 %vm705_vm0, %v9169_v33  ;;  %v2719_v46 = vshrl.u32 %v9234_v18, 16 }
 0x155   : > { %v2698_v13 = vor.u32 %v2697_v22, %v9231_v41  ;;  %v2727_v22 = vrot.slane %v2725_v48, 5 }
 0x156   : > { %v2721_v52 = vrot.slane %v2719_v46, 4 }
 0x157   : > { %v2699_v56 = vrot.slane %v2698_v13, 4 }
 0x159   : > { %v2704_v49 = vsel %vm8517_vm3, %v2699_v56, %v2703_v54 }
 0x15a   : > { %7353 = vmatmul.mubr.msk.bf16.gmra.mrb[4].mxu0 %vm674_vm4, %v7870_v30  ;;  %v2655_v30 = vrot.slane %v2653_v44, 5  ;;  %v2733_v44 = vshll.u32 %v6768_v57, 16 }
 0x15b   : > { %7356 = vmatprep.mubr.msk.bf16.mxu0 %vm674_vm4, %v7871_v29  ;;  %v2674_v29 = vor.u32 %v2673_v39, %v9220_v1  ;;  %v2754_v39 = vshrl.u32 %v6771_v10, 16 }
 0x15c   : > { %v2656_v14 = vsel %vm8517_vm3, %v2651_v43, %v2655_v30  ;;  %v2735_v42 = vrot.slane %v2733_v44, 5  ;;  %v9291_v30 = vld [vmem:[%s8482_s29 + $0x5c] sm:$0x1] }
 0x15d   : > { %v2675_v17 = vrot.slane %v2674_v29, 4  ;;  %v2745_v29 = vrot.slane %v2743_v23, 4  ;;  %v2756_v40 = vrot.slane %v2754_v39, 4  ;;  %v6785_v16 = vcombine.low %v2646_v31, %v2656_v14  ;;  %v6777_v14 = vld [vmem:[%s8482_s29 + $0x78] sm:$0xf] }
 0x15e   : > { %v2736_v34 = vor.u32 %v2735_v42, %v2732_v20  ;;  %v2749_v13 = vshll.u32 %v9291_v30, 16  ;;  %v2802_v54 = vshrl.u32 %v6777_v14, 16  ;;  %v2805_v48 = vshll.u32 %v6777_v14, 16  ;;  %v6780_v42 = vld [vmem:[%s8482_s29 + $0x84] sm:$0xf] }
 0x15f   : > { %v2680_v15 = vsel %vm8517_vm3, %v2675_v17, %v2679_v61  ;;  %v2773_v61 = vshll.u32 %v9296_v63, 16 }
 0x160   : > { %v2751_v56 = vrot.slane %v2749_v13, 5  ;;  %v2829_v13 = vshll.u32 %v6780_v42, 16 }
 0x162   : > { %7357 = vmatmul.mubr.msk.bf16.gmra.mrb[8].mxu0 %vm674_vm4, %v7872_v25  ;;  %v2715_v25 = vshll.u32 %v9234_v18, 16 }
 0x163   : > { %7360 = vmatprep.mubr.msk.bf16.mxu0 %vm674_vm4, %v7873_v50  ;;  %v2665_v50 = vrot.slane %v2664_v26, 4  ;;  %v9293_v26 = vrot.slane %v2739_v60, 5 }
 0x164   : > { %v9267_v51 = vrot.slane %v2715_v25, 5  ;;  %v6774_v25 = vld [vmem:[%s8482_s29 + $0x6c] sm:$0xf] }
 0x165   : > { %v2670_v12 = vsel %vm8517_vm3, %v2665_v50, %v9220_v1  ;;  %v2694_v1 = vsel %vm8517_vm3, %v2689_v53, %v9231_v41  ;;  %v2769_v41 = vrot.slane %v2767_v24, 4  ;;  %v2746_v50 = vor.u32 %v2745_v29, %v9293_v26 }
 0x166   : > { %v2722_v6 = vor.u32 %v2721_v52, %v9267_v51  ;;  %v6786_v43 = vcombine.low %v2670_v12, %v2680_v15  ;;  %v2778_v31 = vshrl.u32 %v6774_v25, 16  ;;  %v2791_v52 = vshrl.u32 %v9303_v37, 16 }
 0x167   : > { %v2770_v36 = vor.u32 %v2769_v41, %v9298_v7  ;;  %v2737_v53 = vrot.slane %v2736_v34, 4  ;;  %v2747_v39 = vrot.slane %v2746_v50, 4  ;;  %v2775_v12 = vrot.slane %v2773_v61, 5  ;;  %v9339_v41 = vld [vmem:[%s8482_s29 + $0x80] sm:$0x1] }
 0x168   : > { %v2723_v57 = vrot.slane %v2722_v6, 4  ;;  %v2780_v15 = vrot.slane %v2778_v31, 4  ;;  %v2793_v6 = vrot.slane %v2791_v52, 4  ;;  %v2821_v61 = vshll.u32 %v9339_v41, 16 }
 0x169   : > { %v2771_v4 = vrot.slane %v2770_v36, 4  ;;  %v2831_v52 = vrot.slane %v2829_v13, 5 }
 0x16a   : > { %7361 = vmatmul.mubr.msk.bf16.gmra.mrb[12].mxu0 %vm674_vm4, %v7874_v28  ;;  %v2757_v28 = vshll.u32 %v6771_v10, 16  ;;  %v2781_v10 = vshll.u32 %v6774_v25, 16  ;;  %v2728_v44 = vsel %vm8517_vm3, %v2723_v57, %v2727_v22 }
 0x16b   : > { %7364 = vmatprep.mubr.msk.bf16.mxu0 %vm674_vm4, %v7875_v2  ;;  %v2712_v2 = vor.u32 %v2711_v9, %v2708_v38  ;;  %v9311_v38 = vld [vmem:[%s8482_s29 + $0x7c] sm:$0xf]  ;;  %v2787_v9 = vshll.u32 %v9303_v37, 16 }
 0x16c   : > { %v2759_v35 = vrot.slane %v2757_v28, 5  ;;  %v2811_v60 = vshll.u32 %v9311_v38, 16  ;;  %v2815_v23 = vshrl.u32 %v9311_v38, 16  ;;  %v2783_v24 = vrot.slane %v2781_v10, 5 }
 0x16d   : > { %v2713_v46 = vrot.slane %v2712_v2, 4  ;;  %v2789_v2 = vrot.slane %v2787_v9, 5 }
 0x16e   : > { %v2760_v17 = vor.u32 %v2759_v35, %v2756_v40  ;;  %v2813_v22 = vrot.slane %v2811_v60, 5  ;;  %v2817_v29 = vrot.slane %v2815_v23, 4  ;;  %v9330_v40 = vld [vmem:[%s8482_s29 + $0x88] sm:$0xf]  ;;  %v2742_v35 = vsel %vm8517_vm3, %v2737_v53, %v9293_v26 }
 0x16f   : > { %v2784_v57 = vor.u32 %v2783_v24, %v2780_v15  ;;  %v2794_v34 = vor.u32 %v2793_v6, %v2789_v2  ;;  %v2826_v26 = vshrl.u32 %v6780_v42, 16  ;;  %v2839_v50 = vshrl.u32 %v9330_v40, 16  ;;  %v6804_v6 = vld [vmem:[%s8482_s29 + $0x18] sm:$0xe] }
 0x170   : > { %v2761_v28 = vrot.slane %v2760_v17, 4  ;;  %v3089_v24 = vrot.slane %v9179_v3, 5 }
 0x171   : > { %v2785_v14 = vrot.slane %v2784_v57, 4  ;;  %v2795_v36 = vrot.slane %v2794_v34, 4  ;;  %v2828_v9 = vrot.slane %v2826_v26, 4  ;;  %v6805_v57 = vld [vmem:[%s8482_s29 + $0x24] sm:$0xe] }
 0x172   : > { %7365 = vmatmul.mubr.msk.bf16.gmra.mrb[16].mxu0 %vm674_vm4, %v7876_v45  ;;  %v3220_v45 = vsel %vm705_vm0, %v9169_v33, 0  ;;  %v2718_v33 = vsel %vm8517_vm3, %v2713_v46, %v9267_v51  ;;  %v9326_v51 = vld [vmem:[%s8482_s29 + $0x74] sm:$0x1]  ;;  %v2766_v25 = vsel %vm8517_vm3, %v2761_v28, %v9298_v7  ;;  %v2776_v46 = vsel %vm8517_vm3, %v2771_v4, %v2775_v12  ;;  %v6806_v34 = vld [vmem:[%s8482_s29 + $0x30] sm:$0xe] }
 0x173   : > { %7370 = vmatprep.mubr.msk.bf16.mxu0 %vm674_vm4, %v6784_v0  ;;  %v6787_v0 = vcombine.low %v2694_v1, %v2704_v49  ;;  %v6788_v20 = vcombine.low %v2718_v33, %v2728_v44  ;;  %v2804_v1 = vrot.slane %v2802_v54, 4  ;;  %v2807_v49 = vrot.slane %v2805_v48, 5  ;;  %v9352_v48 = vld [vmem:[%s8482_s29 + $0x8c] sm:$0x1] }
 0x174   : > { %v6790_v7 = vcombine.low %v2766_v25, %v2776_v46  ;;  %v2841_v44 = vrot.slane %v2839_v50, 4  ;;  %v2823_v54 = vrot.slane %v2821_v61, 5  ;;  %v2790_v60 = vsel %vm8517_vm3, %v2785_v14, %v2789_v2  ;;  %v6807_v14 = vld [vmem:[%s8482_s29 + $0x3c] sm:$0xe] }
 0x175   : > { %v2808_v17 = vor.u32 %v2807_v49, %v2804_v1  ;;  %v2845_v12 = vshll.u32 %v9352_v48, 16 }
 0x177   : > { %v2809_v53 = vrot.slane %v2808_v17, 4  ;;  %v2847_v49 = vrot.slane %v2845_v12, 5  ;;  %v6816_v17 = vrot.slane %v6806_v34, 9  ;;  %v3152_v34 = vrot.slane %v9330_v40, 5 }
 0x179   : > { %v2814_v15 = vsel %vm8517_vm3, %v2809_v53, %v2813_v22 }
 0x17a   : > { %7371 = vmatmul.mubr.msk.bf16.vlgmr.msra.gmra.mrb[0].mxu0 %vm674_vm4, %v6785_v16  ;;  %v2752_v16 = vsel %vm8517_vm3, %v2747_v39, %v2751_v56  ;;  %v2832_v39 = vor.u32 %v2831_v52, %v2828_v9  ;;  %v6817_v52 = vrot.slane %v6807_v14, 9 }
 0x17b   : > { %7391 = vmatpush3.bf16.msra.mxu0 %v3220_v45  ;;  %7374 = vmatprep.mubr.msk.bf16.mxu0 %vm674_vm4, %v6786_v43  ;;  %v2797_v43 = vshll.u32 %v9326_v51, 16  ;;  %v2835_v45 = vshll.u32 %v9330_v40, 16  ;;  %v6789_v31 = vcombine.low %v2742_v35, %v2752_v16  ;;  %v3091_v35 = vrot.slane %v3089_v24, 4 }
 0x17c   : > { %v2833_v42 = vrot.slane %v2832_v39, 4  ;;  %v3092_v16 = vrot.slane %v9200_v55, 5  ;;  %v3103_v55 = vrot.slane %v9196_v8, 5  ;;  %v6809_v39 = vld [vmem:[%s8482_s29 + $0x54] sm:$0xe] }
 0x17d   : > { %v2799_v10 = vrot.slane %v2797_v43, 5  ;;  %v2837_v33 = vrot.slane %v2835_v45, 5  ;;  %v3096_v43 = vrot.slane %v9187_v19, 5  ;;  %v6815_v45 = vrot.slane %v6805_v57, 9 }
 0x17e   : > { %v3093_v46 = vsel %vm8698_vm7, %v3091_v35, %v3092_v16  ;;  %v3105_v19 = vrot.slane %v3103_v55, 4  ;;  %v6812_v35 = vld [vmem:[%s8482_s29 + $0x78] sm:$0xe] }
 0x17f   : > { %v2800_v23 = vsel %vm8517_vm3, %v2795_v36, %v2799_v10  ;;  %v2842_v28 = vor.u32 %v2841_v44, %v2837_v33  ;;  %v3098_v50 = vrot.slane %v3096_v43, 4  ;;  %v3097_v8 = vsel %vm8698_vm7, %v6815_v45, %v3096_v43  ;;  %v6808_v36 = vld [vmem:[%s8482_s29 + $0x48] sm:$0xe] }
 0x180   : > { %v6791_v2 = vcombine.low %v2790_v60, %v2800_v23  ;;  %v3113_v44 = vrot.slane %v9239_v62, 5  ;;  %v6818_v53 = vrot.slane %v6808_v36, 9  ;;  %v3124_v60 = vrot.slane %v9264_v47, 5 }
 0x181   : > { %v2843_v1 = vrot.slane %v2842_v28, 4  ;;  %v3100_v61 = vsel %vm8698_vm7, %v3098_v50, %v3099_v27  ;;  %v6810_v28 = vld [vmem:[%s8482_s29 + $0x60] sm:$0xe]  ;;  %v3154_v27 = vrot.slane %v3152_v34, 4 }
 0x182   : > { %7375 = vmatmul.mubr.msk.bf16.gmra.mrb[4].mxu0 %vm674_vm4, %v6787_v0  ;;  %v2818_v0 = vor.u32 %v2817_v29, %v2813_v22  ;;  %v6814_v29 = vrot.slane %v6804_v6, 9  ;;  %v2838_v22 = vsel %vm8517_vm3, %v2833_v42, %v2837_v33  ;;  %v6826_v10 = vcombine.low %v3097_v8, %v3100_v61 }
 0x183   : > { %7378 = vmatprep.mubr.msk.bf16.mxu0 %vm674_vm4, %v6788_v20  ;;  %v2848_v3 = vsel %vm8517_vm3, %v2843_v1, %v2847_v49  ;;  %v3127_v6 = vrot.slane %v9291_v30, 5  ;;  %v3138_v1 = vrot.slane %v9303_v37, 5  ;;  %v3148_v37 = vrot.slane %v9339_v41, 5 }
 0x184   : > { %v2819_v56 = vrot.slane %v2818_v0, 4  ;;  %v3090_v25 = vsel %vm8698_vm7, %v6814_v29, %v3089_v24  ;;  %v6793_v26 = vcombine.low %v2838_v22, %v2848_v3  ;;  %v3106_v0 = vrot.slane %v9225_v11, 5  ;;  %v6811_v29 = vld [vmem:[%s8482_s29 + $0x6c] sm:$0xe] }
 0x185   : > { %v6825_v13 = vcombine.low %v3090_v25, %v3093_v46  ;;  %v3117_v11 = vrot.slane %v9234_v18, 5  ;;  %v3126_v24 = vrot.slane %v3124_v60, 4  ;;  %v6821_v3 = vrot.slane %v6811_v29, 9 }
 0x186   : > { %v2824_v4 = vsel %vm8517_vm3, %v2819_v56, %v2823_v54  ;;  %v3107_v21 = vsel %vm8698_vm7, %v3105_v19, %v3106_v0  ;;  %v3120_v56 = vrot.slane %v9255_v59, 5  ;;  %v3131_v59 = vrot.slane %v9270_v32, 5 }
 0x187   : > { %v6792_v20 = vcombine.low %v2814_v15, %v2824_v4  ;;  %v3118_v23 = vsel %vm8698_vm7, %v6818_v53, %v3117_v11  ;;  %v6819_v4 = vrot.slane %v6809_v39, 9  ;;  %v3128_v42 = vsel %vm8698_vm7, %v3126_v24, %v3127_v6  ;;  %v3458_v6 = vld [vmem:[#allocation2 + $0x5c] sm:$0x1] }
 0x188   : > { %v3133_v47 = vrot.slane %v3131_v59, 4  ;;  %v3140_v43 = vrot.slane %v3138_v1, 4  ;;  %v3141_v25 = vrot.slane %v9326_v51, 5  ;;  %v6822_v46 = vrot.slane %v6812_v35, 9 }
 0x189   : > { %v3125_v32 = vsel %vm8698_vm7, %v6819_v4, %v3124_v60  ;;  %v3417_v60 = vld [vmem:[#allocation2 + $0x30] sm:$0x1]  ;;  %v3423_v4 = vld [vmem:[#allocation2 + $0x48] sm:$0x1] }
 0x18a   : > { %7379 = vmatmul.mubr.msk.bf16.gmra.mrb[8].mxu0 %vm674_vm4, %v6789_v31  ;;  %v3110_v31 = vrot.slane %v9209_v58, 5  ;;  %v3119_v58 = vrot.slane %v3117_v11, 4  ;;  %v6830_v16 = vcombine.low %v3125_v32, %v3128_v42  ;;  %v3437_v11 = vld [vmem:[#allocation2 + $0x8] sm:$0x1]  ;;  %v3424_v24 = vsel %vm9453_vm10, 0, %v3423_v4 }
 0x18b   : > { %7382 = vmatprep.mubr.msk.bf16.mxu0 %vm674_vm4, %v6790_v7  ;;  %v3104_v7 = vsel %vm8698_vm7, %v6816_v17, %v3103_v55  ;;  %v3139_v55 = vsel %vm8698_vm7, %v6821_v3, %v3138_v1  ;;  %v3155_v17 = vrot.slane %v9352_v48, 5  ;;  %v3408_v48 = vld [vmem:[#allocation2 + $0xc] sm:$0x1]  ;;  %v3438_v36 = vsel %vm9460_vm12, 0, %v3437_v11  ;;  %3425 = vst [vmem:[#allocation2 + $0x48] sm:$0x1] %v3424_v24 }
 0x18c   : > { %v6827_v9 = vcombine.low %v3104_v7, %v3107_v21  ;;  %v3112_v33 = vrot.slane %v3110_v31, 4  ;;  %v3111_v18 = vsel %vm8698_vm7, %v6817_v52, %v3110_v31  ;;  %v3121_v62 = vsel %vm8698_vm7, %v3119_v58, %v3120_v56  ;;  %v3440_v21 = vld [vmem:[#allocation2 + $0x14] sm:$0x1]  ;;  %3439 = vst [vmem:[#allocation2 + $0x8] sm:$0x1] %v3438_v36 }
 0x18d   : > { %v6829_v15 = vcombine.low %v3118_v23, %v3121_v62  ;;  %v3156_v19 = vsel %vm8698_vm7, %v3154_v27, %v3155_v17  ;;  %v3409_v61 = vsel %vm9453_vm10, 0, %v3408_v48  ;;  %v3406_v7 = vsel %vm9453_vm10, 0, %v3405_v5  ;;  %v3411_v52 = vld [vmem:[#allocation2 + $0x18] sm:$0x1]  ;;  %v3443_v58 = vld [vmem:[#allocation2 + $0x20] sm:$0x1] }
 0x18e   : > { %v3114_v54 = vsel %vm8698_vm7, %v3112_v33, %v3113_v44  ;;  %3410 = vst [vmem:[#allocation2 + $0xc] sm:$0x1] %v3409_v61  ;;  %3407 = vst [vmem:[#allocation2] sm:$0x1] %v3406_v7  ;;  %v3441_v14 = vsel %vm9460_vm12, 0, %v3440_v21  ;;  %v3412_v33 = vsel %vm9453_vm10, 0, %v3411_v52 }
 0x18f   : > { %v6828_v12 = vcombine.low %v3111_v18, %v3114_v54  ;;  %3442 = vst [vmem:[#allocation2 + $0x14] sm:$0x1] %v3441_v14  ;;  %3413 = vst [vmem:[#allocation2 + $0x18] sm:$0x1] %v3412_v33  ;;  %v3446_v44 = vld [vmem:[#allocation2 + $0x2c] sm:$0x1] }
 0x190   : > { %v3447_v53 = vsel %vm9460_vm12, 0, %v3446_v44  ;;  %v3444_v56 = vsel %vm9460_vm12, 0, %v3443_v58  ;;  %v3420_v18 = vld [vmem:[#allocation2 + $0x3c] sm:$0x1]  ;;  %v3418_v23 = vsel %vm9453_vm10, 0, %v3417_v60 }
 0x191   : > { %3448 = vst [vmem:[#allocation2 + $0x2c] sm:$0x1] %v3447_v53  ;;  %3445 = vst [vmem:[#allocation2 + $0x20] sm:$0x1] %v3444_v56  ;;  %v3421_v54 = vsel %vm9453_vm10, 0, %v3420_v18 }
 0x192   : > { %7383 = vmatmul.mubr.msk.bf16.gmra.mrb[12].mxu0 %vm674_vm4, %v6791_v2  ;;  %v6820_v2 = vrot.slane %v6810_v28, 9  ;;  %3422 = vst [vmem:[#allocation2 + $0x3c] sm:$0x1] %v3421_v54  ;;  %v3452_v62 = vld [vmem:[#allocation2 + $0x44] sm:$0x1] }
 0x193   : > { %7386 = vmatprep.mubr.msk.bf16.mxu0 %vm674_vm4, %v6792_v20  ;;  %v3134_v20 = vrot.slane %v9296_v63, 5  ;;  %v3145_v63 = vrot.slane %v9311_v38, 5  ;;  %v3142_v38 = vsel %vm8698_vm7, %v3140_v43, %v3141_v25  ;;  %3419 = vst [vmem:[#allocation2 + $0x30] sm:$0x1] %v3418_v23  ;;  %v3453_v39 = vsel %vm9460_vm12, 0, %v3452_v62 }
 0x194   : > { %v3132_v49 = vsel %vm8698_vm7, %v6820_v2, %v3131_v59  ;;  %v6832_v41 = vcombine.low %v3139_v55, %v3142_v38  ;;  %3454 = vst [vmem:[#allocation2 + $0x44] sm:$0x1] %v3453_v39  ;;  %v3449_v59 = vld [vmem:[#allocation2 + $0x38] sm:$0x1]  ;;  %v3459_v2 = vsel %vm9460_vm12, 0, %v3458_v6 }
 0x195   : > { %v3135_v30 = vsel %vm8698_vm7, %v3133_v47, %v3134_v20  ;;  %v3147_v57 = vrot.slane %v3145_v63, 4  ;;  %v3450_v28 = vsel %vm9460_vm12, 0, %v3449_v59  ;;  %v3455_v47 = vld [vmem:[#allocation2 + $0x50] sm:$0x1]  ;;  %3460 = vst [vmem:[#allocation2 + $0x5c] sm:$0x1] %v3459_v2 }
 0x196   : > { %v6831_v22 = vcombine.low %v3132_v49, %v3135_v30  ;;  %3451 = vst [vmem:[#allocation2 + $0x38] sm:$0x1] %v3450_v28  ;;  %v3456_v20 = vsel %vm9460_vm12, 0, %v3455_v47  ;;  %v3432_v32 = vld [vmem:[#allocation2 + $0x6c] sm:$0x1] }
 0x197   : > { %v3149_v51 = vsel %vm8698_vm7, %v3147_v57, %v3148_v37  ;;  %3457 = vst [vmem:[#allocation2 + $0x50] sm:$0x1] %v3456_v20  ;;  %v3433_v42 = vsel %vm9453_vm10, 0, %v3432_v32  ;;  %v3429_v1 = vld [vmem:[#allocation2 + $0x60] sm:$0x1] }
 0x198   : > { %3434 = vst [vmem:[#allocation2 + $0x6c] sm:$0x1] %v3433_v42  ;;  %v3430_v49 = vsel %vm9453_vm10, 0, %v3429_v1  ;;  %v3464_v30 = vld [vmem:[#allocation2 + $0x74] sm:$0x1] }
 0x199   : > { %3431 = vst [vmem:[#allocation2 + $0x60] sm:$0x1] %v3430_v49  ;;  %v3465_v29 = vsel %vm9460_vm12, 0, %v3464_v30  ;;  %v3738_v14 = vld [vmem:[#allocation2 + $0xc] sm:$0xf] }
 0x19a   : > { %7387 = vmatmul.mubr.msk.bf16.gmra.mrb[16].mxu0 %vm674_vm4, %v6793_v26  ;;  %v3146_v26 = vsel %vm8698_vm7, %v6822_v46, %v3145_v63  ;;  %3466 = vst [vmem:[#allocation2 + $0x74] sm:$0x1] %v3465_v29  ;;  %v3461_v63 = vld [vmem:[#allocation2 + $0x68] sm:$0x1]  ;;  %v3731_v53 = vld [vmem:[#allocation2] sm:$0xf] }
 0x19b   : > { %7392 = vmatprep.mubr.msk.bf16.mxu0 %vm674_vm4, %v6825_v13  ;;  %v6813_v13 = vld [vmem:[%s8482_s29 + $0x84] sm:$0xe]  ;;  %v6833_v45 = vcombine.low %v3146_v26, %v3149_v51  ;;  %v3462_v35 = vsel %vm9460_vm12, 0, %v3461_v63  ;;  %v3742_v62 = vld [vmem:[#allocation2 + $0x14] sm:$0x1] }
 0x19c   : > { %v6823_v50 = vrot.slane %v6813_v13, 9  ;;  %3463 = vst [vmem:[#allocation2 + $0x68] sm:$0x1] %v3462_v35  ;;  %v3735_v4 = vld [vmem:[#allocation2 + $0x8] sm:$0x1] }
 0x19e   : > { %v3153_v40 = vsel %vm8698_vm7, %v6823_v50, %v3152_v34 }
 0x19f   : > { %v6834_v0 = vcombine.low %v3153_v40, %v3156_v19 }
 0x1a2   : > { %7393 = vmatmul.mubr.msk.bf16.vlgmr.msra.gmra.mrb[0].mxu0 %vm674_vm4, %v6826_v10  ;;  %v3414_v10 = vld [vmem:[#allocation2 + $0x24] sm:$0x1] }
 0x1a3   : > { %7396 = vmatprep.mubr.msk.bf16.mxu0 %vm674_vm4, %v6827_v9  ;;  %v3415_v9 = vsel %vm9453_vm10, 0, %v3414_v10 }
 0x1a4   : > { %3416 = vst [vmem:[#allocation2 + $0x24] sm:$0x1] %v3415_v9 }
 0x1aa   : > { %7397 = vmatmul.mubr.msk.bf16.gmra.mrb[4].mxu0 %vm674_vm4, %v6828_v12  ;;  %v3426_v12 = vld [vmem:[#allocation2 + $0x54] sm:$0x1] }
 0x1ab   : > { %7400 = vmatprep.mubr.msk.bf16.mxu0 %vm674_vm4, %v6829_v15  ;;  %v3427_v15 = vsel %vm9453_vm10, 0, %v3426_v12 }
 0x1ac   : > { %3428 = vst [vmem:[#allocation2 + $0x54] sm:$0x1] %v3427_v15 }
 0x1b2   : > { %7401 = vmatmul.mubr.msk.bf16.gmra.mrb[8].mxu0 %vm674_vm4, %v6830_v16  ;;  %v9505_v16 = vld [vmem:[%s10184_s4] ss:$0 sm:$0xff] }
 0x1b3   : > { %7404 = vmatprep.mubr.msk.bf16.mxu0 %vm674_vm4, %v6831_v22 }
 0x1ba   : > { %7405 = vmatmul.mubr.msk.bf16.gmra.mrb[12].mxu0 %vm674_vm4, %v6832_v41 }
 0x1bb   : > { %7408 = vmatprep.mubr.msk.bf16.mxu0 %vm674_vm4, %v6833_v45 }
 0x1c2   : > { %7409 = vmatmul.mubr.msk.bf16.gmra.mrb[16].mxu0 %vm674_vm4, %v6834_v0 }
 0x275   : > { %v7394_v22 = vpop.f32.mrb[0].mxu0 }
 0x276   : > { %v3364_v3 = vadd.f32 %v7394_v22, %v9505_v16  ;;  %v3256_v43 = vpop.f32.mrb[1].mxu0 }
 0x277   : > { %v3362_v25 = vadd.f32 %v9505_v16, %v3256_v43  ;;  %v7395_v46 = vpop.f32.mrb[2].mxu0 }
 0x278   : > { %v3384_v57 = vmax.f32 %v3364_v3, 0.0  ;;  %v3365_v37 = vadd.f32 %v7395_v46, %v9505_v16  ;;  %v3259_v55 = vpop.f32.mrb[3].mxu0 }
 0x279   : > { %v3382_v38 = vmax.f32 %v3362_v25, 0.0  ;;  %v3363_v34 = vadd.f32 %v9505_v16, %v3259_v55 }
 0x27a   : > { %v7096_v26 = vpack.c.bf16 %v3384_v57, %v3384_v57  ;;  %v3385_v51 = vmax.f32 %v3365_v37, 0.0  ;;  %v3752_v57 = vld [vmem:[#allocation2 + $0x24] sm:$0xf] }
 0x27b   : > { %v7094_v13 = vpack.c.bf16 %v3382_v38, %v3382_v38  ;;  %v3383_v41 = vmax.f32 %v3363_v34, 0.0 }
 0x27c   : > { %v3547_v45 = vshrl.u32 %v7096_v26, 16  ;;  %v7097_v50 = vpack.c.bf16 %v3385_v51, %v3385_v51  ;;  %v3550_v27 = vshll.u32 %v7096_v26, 16 }
 0x27d   : > { %v3530_v17 = vshrl.u32 %v7094_v13, 16  ;;  %v3533_v40 = vshll.u32 %v7094_v13, 16  ;;  %v7095_v19 = vpack.c.bf16 %v3383_v41, %v3383_v41  ;;  %v7398_v0 = vpop.f32.mrb[4].mxu0  ;;  %v3745_v13 = vld [vmem:[#allocation2 + $0x18] sm:$0xf] }
 0x27e   : > { %v3549_v48 = vrot.slane %v3547_v45, 7  ;;  %v3555_v61 = vshrl.u32 %v7097_v50, 16  ;;  %v3558_v31 = vshll.u32 %v7097_v50, 16  ;;  %v3368_v5 = vadd.f32 %v7398_v0, %v9505_v16  ;;  %v3272_v7 = vpop.f32.mrb[5].mxu0 }
 0x27f   : > { %v3532_v11 = vrot.slane %v3530_v17, 7  ;;  %v3538_v36 = vshrl.u32 %v7095_v19, 16  ;;  %v3541_v10 = vshll.u32 %v7095_v19, 16  ;;  %v3366_v9 = vadd.f32 %v9505_v16, %v3272_v7  ;;  %v7399_v52 = vpop.f32.mrb[6].mxu0 }
 0x280   : > { %v3552_v33 = vor.u32 %v3550_v27, %v3549_v48  ;;  %v3553_v44 = vrot.slane %v3549_v48, 4  ;;  %v3557_v58 = vrot.slane %v3555_v61, 7  ;;  %v3388_v56 = vmax.f32 %v3368_v5, 0.0  ;;  %v3275_v18 = vpop.f32.mrb[7].mxu0 }
 0x281   : > { %v3535_v54 = vor.u32 %v3533_v40, %v3532_v11  ;;  %v3536_v60 = vrot.slane %v3532_v11, 4  ;;  %v3540_v39 = vrot.slane %v3538_v36, 7  ;;  %v3386_v59 = vmax.f32 %v3366_v9, 0.0 }
 0x282   : > { %v3739_v28 = vsel %vm9514_vm14, %v3552_v33, %v3738_v14  ;;  %v3560_v12 = vor.u32 %v3558_v31, %v3557_v58  ;;  %v3562_v15 = vrot.slane %v3557_v58, 4  ;;  %v7100_v24 = vpack.c.bf16 %v3388_v56, %v3388_v56  ;;  %v3756_v33 = vld [vmem:[#allocation2 + $0x2c] sm:$0x1] }
 0x283   : > { %3740 = vst [vmem:[#allocation2 + $0xc] sm:$0xf] %v3739_v28  ;;  %v3732_v6 = vsel %vm9514_vm14, %v3535_v54, %v3731_v53  ;;  %v3543_v2 = vor.u32 %v3541_v10, %v3540_v39  ;;  %v3545_v47 = vrot.slane %v3540_v39, 4  ;;  %v7098_v20 = vpack.c.bf16 %v3386_v59, %v3386_v59 }
 0x284   : > { %3733 = vst [vmem:[#allocation2] sm:$0xf] %v3732_v6  ;;  %v3561_v32 = vsel %vm9521_vm15, %v3553_v44, %v3560_v12  ;;  %v3743_v42 = vsel %vm9453_vm10, %v3562_v15, %v3742_v62  ;;  %v3581_v1 = vshrl.u32 %v7100_v24, 16  ;;  %v3584_v29 = vshll.u32 %v7100_v24, 16  ;;  %v3749_v44 = vld [vmem:[#allocation2 + $0x20] sm:$0x1] }
 0x285   : > { %3741 = vst [vmem:[#allocation2 + $0x10] sm:$0xf] %v3561_v32  ;;  %3744 = vst [vmem:[#allocation2 + $0x14] sm:$0x1] %v3743_v42  ;;  %v3544_v49 = vsel %vm9521_vm15, %v3536_v60, %v3543_v2  ;;  %v3736_v30 = vsel %vm9453_vm10, %v3545_v47, %v3735_v4  ;;  %v3564_v63 = vshrl.u32 %v7098_v20, 16  ;;  %v7402_v35 = vpop.f32.mrb[8].mxu0  ;;  %v3369_v3 = vadd.f32 %v7399_v52, %v9505_v16 }
 0x286   : > { %3734 = vst [vmem:[#allocation2 + $0x4] sm:$0xf] %v3544_v49  ;;  %3737 = vst [vmem:[#allocation2 + $0x8] sm:$0x1] %v3736_v30  ;;  %v9537_v22 = vrot.slane %v3581_v1, 7  ;;  %v3367_v43 = vadd.f32 %v9505_v16, %v3275_v18  ;;  %v3372_v25 = vadd.f32 %v7402_v35, %v9505_v16  ;;  %v3288_v46 = vpop.f32.mrb[9].mxu0 }
 0x287   : > { %v3566_v37 = vrot.slane %v3564_v63, 7  ;;  %v3567_v55 = vshll.u32 %v7098_v20, 16  ;;  %v3370_v38 = vadd.f32 %v9505_v16, %v3288_v46  ;;  %v7403_v34 = vpop.f32.mrb[10].mxu0  ;;  %v3389_v41 = vmax.f32 %v3369_v3, 0.0  ;;  %v3766_v15 = vld [vmem:[#allocation2 + $0x3c] sm:$0xf] }
 0x288   : > { %v3586_v26 = vor.u32 %v3584_v29, %v9537_v22  ;;  %v3587_v51 = vrot.slane %v9537_v22, 4  ;;  %v3387_v45 = vmax.f32 %v3367_v43, 0.0  ;;  %v3291_v50 = vpop.f32.mrb[11].mxu0  ;;  %v3392_v40 = vmax.f32 %v3372_v25, 0.0  ;;  %v3759_v1 = vld [vmem:[#allocation2 + $0x30] sm:$0xf] }
 0x289   : > { %v3569_v27 = vor.u32 %v3567_v55, %v3566_v37  ;;  %v3570_v17 = vrot.slane %v3566_v37, 4  ;;  %v3390_v19 = vmax.f32 %v3370_v38, 0.0  ;;  %v7101_v48 = vpack.c.bf16 %v3389_v41, %v3389_v41 }
 0x28a   : > { %v3753_v0 = vsel %vm9514_vm14, %v3586_v26, %v3752_v57  ;;  %v7099_v61 = vpack.c.bf16 %v3387_v45, %v3387_v45  ;;  %v3373_v31 = vadd.f32 %v7403_v34, %v9505_v16  ;;  %v7104_v7 = vpack.c.bf16 %v3392_v40, %v3392_v40 }
 0x28b   : > { %3754 = vst [vmem:[#allocation2 + $0x24] sm:$0xf] %v3753_v0  ;;  %v3746_v5 = vsel %vm9514_vm14, %v3569_v27, %v3745_v13  ;;  %v7102_v14 = vpack.c.bf16 %v3390_v19, %v3390_v19  ;;  %v3371_v11 = vadd.f32 %v9505_v16, %v3291_v50  ;;  %v3589_v36 = vshrl.u32 %v7101_v48, 16 }
 0x28c   : > { %3747 = vst [vmem:[#allocation2 + $0x18] sm:$0xf] %v3746_v5  ;;  %v3592_v10 = vshll.u32 %v7101_v48, 16  ;;  %v3572_v9 = vshrl.u32 %v7099_v61, 16  ;;  %v3575_v52 = vshll.u32 %v7099_v61, 16  ;;  %v3615_v53 = vshrl.u32 %v7104_v7, 16 }
 0x28d   : > { %v3618_v58 = vshll.u32 %v7104_v7, 16  ;;  %v3598_v56 = vshrl.u32 %v7102_v14, 16  ;;  %v3601_v18 = vshll.u32 %v7102_v14, 16  ;;  %v7406_v54 = vpop.f32.mrb[12].mxu0  ;;  %v3591_v60 = vrot.slane %v3589_v36, 7 }
 0x28e   : > { %v3574_v62 = vrot.slane %v3572_v9, 7  ;;  %v3393_v39 = vmax.f32 %v3373_v31, 0.0  ;;  %v3391_v59 = vmax.f32 %v3371_v11, 0.0  ;;  %v3304_v28 = vpop.f32.mrb[13].mxu0  ;;  %v9551_v12 = vrot.slane %v3615_v53, 7 }
 0x28f   : > { %v9553_v4 = vrot.slane %v3598_v56, 7  ;;  %v3376_v24 = vadd.f32 %v7406_v54, %v9505_v16  ;;  %v3374_v6 = vadd.f32 %v9505_v16, %v3304_v28  ;;  %v7407_v2 = vpop.f32.mrb[14].mxu0  ;;  %v3594_v47 = vor.u32 %v3592_v10, %v3591_v60  ;;  %v3763_v7 = vld [vmem:[#allocation2 + $0x38] sm:$0x1] }
 0x290   : > { %v3596_v20 = vrot.slane %v3591_v60, 4  ;;  %v3577_v32 = vor.u32 %v3575_v52, %v3574_v62  ;;  %v3579_v42 = vrot.slane %v3574_v62, 4  ;;  %v3307_v49 = vpop.f32.mrb[15].mxu0  ;;  %v3620_v30 = vor.u32 %v3618_v58, %v9551_v12 }
 0x291   : > { %v3621_v29 = vrot.slane %v9551_v12, 4  ;;  %v3603_v63 = vor.u32 %v3601_v18, %v9553_v4  ;;  %v3604_v35 = vrot.slane %v9553_v4, 4  ;;  %v3595_v22 = vsel %vm9521_vm15, %v3587_v51, %v3594_v47  ;;  %v3780_v4 = vld [vmem:[#allocation2 + $0x54] sm:$0xf] }
 0x292   : > { %v3757_v3 = vsel %vm9453_vm10, %v3596_v20, %v3756_v33  ;;  %v3578_v43 = vsel %vm9521_vm15, %v3570_v17, %v3577_v32  ;;  %v3750_v25 = vsel %vm9453_vm10, %v3579_v42, %v3749_v44  ;;  %3755 = vst [vmem:[#allocation2 + $0x28] sm:$0xf] %v3595_v22  ;;  %v3767_v46 = vsel %vm9514_vm14, %v3620_v30, %v3766_v15  ;;  %v3770_v17 = vld [vmem:[#allocation2 + $0x44] sm:$0x1] }
 0x293   : > { %3758 = vst [vmem:[#allocation2 + $0x2c] sm:$0x1] %v3757_v3  ;;  %3748 = vst [vmem:[#allocation2 + $0x1c] sm:$0xf] %v3578_v43  ;;  %v3760_v57 = vsel %vm9514_vm14, %v3603_v63, %v3759_v1  ;;  %v7105_v37 = vpack.c.bf16 %v3393_v39, %v3393_v39  ;;  %v7103_v55 = vpack.c.bf16 %v3391_v59, %v3391_v59  ;;  %v3396_v38 = vmax.f32 %v3376_v24, 0.0 }
 0x294   : > { %3751 = vst [vmem:[#allocation2 + $0x20] sm:$0x1] %v3750_v25  ;;  %3768 = vst [vmem:[#allocation2 + $0x3c] sm:$0xf] %v3767_v46  ;;  %v3394_v34 = vmax.f32 %v3374_v6, 0.0  ;;  %v3377_v26 = vadd.f32 %v7407_v2, %v9505_v16  ;;  %v3375_v51 = vadd.f32 %v9505_v16, %v3307_v49 }
 0x295   : > { %3761 = vst [vmem:[#allocation2 + $0x30] sm:$0xf] %v3760_v57  ;;  %v3623_v13 = vshrl.u32 %v7105_v37, 16  ;;  %v3626_v41 = vshll.u32 %v7105_v37, 16  ;;  %v3606_v45 = vshrl.u32 %v7103_v55, 16  ;;  %v3609_v50 = vshll.u32 %v7103_v55, 16 }
 0x296   : > { %v7410_v27 = vpop.f32.mrb[16].mxu0  ;;  %v7108_v40 = vpack.c.bf16 %v3396_v38, %v3396_v38  ;;  %v7106_v19 = vpack.c.bf16 %v3394_v34, %v3394_v34  ;;  %v3397_v0 = vmax.f32 %v3377_v26, 0.0  ;;  %v3395_v48 = vmax.f32 %v3375_v51, 0.0  ;;  %v3773_v24 = vld [vmem:[#allocation2 + $0x48] sm:$0xf] }
 0x297   : > { %v3320_v61 = vpop.f32.mrb[17].mxu0  ;;  %v3625_v31 = vrot.slane %v3623_v13, 7  ;;  %v3608_v5 = vrot.slane %v3606_v45, 7  ;;  %v3380_v14 = vadd.f32 %v7410_v27, %v9505_v16  ;;  %v3784_v43 = vld [vmem:[#allocation2 + $0x5c] sm:$0x1] }
 0x298   : > { %v3378_v11 = vadd.f32 %v9505_v16, %v3320_v61  ;;  %v7411_v36 = vpop.f32.mrb[18].mxu0  ;;  %v3649_v10 = vshrl.u32 %v7108_v40, 16  ;;  %v3652_v9 = vshll.u32 %v7108_v40, 16  ;;  %v3632_v52 = vshrl.u32 %v7106_v19, 16  ;;  %v3777_v25 = vld [vmem:[#allocation2 + $0x50] sm:$0x1] }
 0x299   : > { %v3635_v33 = vshll.u32 %v7106_v19, 16  ;;  %v3323_v44 = vpop.f32.mrb[19].mxu0  ;;  %v3628_v53 = vor.u32 %v3626_v41, %v3625_v31  ;;  %v3630_v58 = vrot.slane %v3625_v31, 4  ;;  %v3611_v56 = vor.u32 %v3609_v50, %v3608_v5  ;;  %v3794_v31 = vld [vmem:[#allocation2 + $0x6c] sm:$0xf] }
 0x29a   : > { %v3613_v18 = vrot.slane %v3608_v5, 4  ;;  %v3651_v54 = vrot.slane %v3649_v10, 7  ;;  %v3634_v60 = vrot.slane %v3632_v52, 7  ;;  %v7109_v62 = vpack.c.bf16 %v3397_v0, %v3397_v0  ;;  %v3787_v5 = vld [vmem:[#allocation2 + $0x60] sm:$0xf] }
 0x29b   : > { %v7107_v39 = vpack.c.bf16 %v3395_v48, %v3395_v48  ;;  %v3629_v59 = vsel %vm9521_vm15, %v3621_v29, %v3628_v53  ;;  %v3771_v28 = vsel %vm9453_vm10, %v3630_v58, %v3770_v17  ;;  %v3612_v12 = vsel %vm9521_vm15, %v3604_v35, %v3611_v56 }
 0x29c   : > { %v3764_v15 = vsel %vm9453_vm10, %v3613_v18, %v3763_v7  ;;  %3769 = vst [vmem:[#allocation2 + $0x40] sm:$0xf] %v3629_v59  ;;  %3772 = vst [vmem:[#allocation2 + $0x44] sm:$0x1] %v3771_v28  ;;  %v3654_v6 = vor.u32 %v3652_v9, %v3651_v54  ;;  %v3637_v2 = vor.u32 %v3635_v33, %v3634_v60  ;;  %v3655_v47 = vrot.slane %v3651_v54, 4 }
 0x29d   : > { %3762 = vst [vmem:[#allocation2 + $0x34] sm:$0xf] %v3612_v12  ;;  %3765 = vst [vmem:[#allocation2 + $0x38] sm:$0x1] %v3764_v15  ;;  %v3638_v20 = vrot.slane %v3634_v60, 4  ;;  %v3657_v32 = vshrl.u32 %v7109_v62, 16  ;;  %v3381_v37 = vadd.f32 %v7411_v36, %v9505_v16  ;;  %v3379_v55 = vadd.f32 %v9505_v16, %v3323_v44 }
 0x29e   : > { %v3640_v42 = vshrl.u32 %v7107_v39, 16  ;;  %v3781_v1 = vsel %vm9514_vm14, %v3654_v6, %v3780_v4  ;;  %v3774_v49 = vsel %vm9514_vm14, %v3637_v2, %v3773_v24  ;;  %v3400_v30 = vmax.f32 %v3380_v14, 0.0  ;;  %v3798_v60 = vld [vmem:[#allocation2 + $0x74] sm:$0x1] }
 0x29f   : > { %v3398_v29 = vmax.f32 %v3378_v11, 0.0  ;;  %3782 = vst [vmem:[#allocation2 + $0x54] sm:$0xf] %v3781_v1  ;;  %3775 = vst [vmem:[#allocation2 + $0x48] sm:$0xf] %v3774_v49  ;;  %v3659_v63 = vrot.slane %v3657_v32, 7 }
 0x2a0   : > { %v3660_v35 = vshll.u32 %v7109_v62, 16  ;;  %v3642_v22 = vrot.slane %v3640_v42, 7  ;;  %v3643_v3 = vshll.u32 %v7107_v39, 16  ;;  %v7112_v46 = vpack.c.bf16 %v3400_v30, %v3400_v30  ;;  %v3791_v62 = vld [vmem:[#allocation2 + $0x68] sm:$0x1] }
 0x2a1   : > { %v7110_v57 = vpack.c.bf16 %v3398_v29, %v3398_v29  ;;  %v3664_v34 = vrot.slane %v3659_v63, 4  ;;  %v3401_v48 = vmax.f32 %v3381_v37, 0.0  ;;  %v3399_v61 = vmax.f32 %v3379_v55, 0.0 }
 0x2a2   : > { %v3662_v38 = vor.u32 %v3660_v35, %v3659_v63  ;;  %v3645_v26 = vor.u32 %v3643_v3, %v3642_v22  ;;  %v3647_v51 = vrot.slane %v3642_v22, 4  ;;  %v3683_v13 = vshrl.u32 %v7112_v46, 16 }
 0x2a3   : > { %v3686_v41 = vshll.u32 %v7112_v46, 16  ;;  %v3666_v45 = vshrl.u32 %v7110_v57, 16  ;;  %v3669_v50 = vshll.u32 %v7110_v57, 16  ;;  %v3785_v17 = vsel %vm9453_vm10, %v3664_v34, %v3784_v43 }
 0x2a4   : > { %v3663_v27 = vsel %vm9521_vm15, %v3655_v47, %v3662_v38  ;;  %v3646_v40 = vsel %vm9521_vm15, %v3638_v20, %v3645_v26  ;;  %v3778_v16 = vsel %vm9453_vm10, %v3647_v51, %v3777_v25  ;;  %3786 = vst [vmem:[#allocation2 + $0x5c] sm:$0x1] %v3785_v17  ;;  %v3685_v19 = vrot.slane %v3683_v13, 7 }
 0x2a5   : > { %3783 = vst [vmem:[#allocation2 + $0x58] sm:$0xf] %v3663_v27  ;;  %3776 = vst [vmem:[#allocation2 + $0x4c] sm:$0xf] %v3646_v40  ;;  %v3668_v0 = vrot.slane %v3666_v45, 7  ;;  %v7113_v11 = vpack.c.bf16 %v3401_v48, %v3401_v48  ;;  %v7111_v36 = vpack.c.bf16 %v3399_v61, %v3399_v61  ;;  %v8296_v6 = vmov (!%p6866_p10), 0  }
 0x2a6   : > { %3779 = vst [vmem:[#allocation2 + $0x50] sm:$0x1] %v3778_v16  ;;  %v3688_v7 = vor.u32 %v3686_v41, %v3685_v19  ;;  %v3689_v18 = vrot.slane %v3685_v19, 4  ;;  %3805 = vst [vmem:[#allocation2] sm:$0xf] (!%p6866_p10), %v8296_v6 }
 0x2a7   : > { %v3671_v14 = vor.u32 %v3669_v50, %v3668_v0  ;;  %v3691_v52 = vshrl.u32 %v7113_v11, 16  ;;  %v3674_v33 = vshrl.u32 %v7111_v36, 16  ;;  %v3694_v53 = vshll.u32 %v7113_v11, 16  ;;  %3806 = vst [vmem:[#allocation2 + $0x4] sm:$0xf] (!%p6866_p10), %v8296_v6 }
 0x2a8   : > { %v3795_v10 = vsel %vm9514_vm14, %v3688_v7, %v3794_v31  ;;  %v3677_v56 = vshll.u32 %v7111_v36, 16  ;;  %v3672_v54 = vrot.slane %v3668_v0, 4  ;;  %3807 = vst [vmem:[#allocation2 + $0x8] sm:$0x1] (!%p6866_p10), %v8296_v6 }
 0x2a9   : > { %v3788_v9 = vsel %vm9514_vm14, %v3671_v14, %v3787_v5  ;;  %3796 = vst [vmem:[#allocation2 + $0x6c] sm:$0xf] %v3795_v10  ;;  %v3693_v44 = vrot.slane %v3691_v52, 7  ;;  %v3676_v58 = vrot.slane %v3674_v33, 7  ;;  %3804 = sbr.rel (%p6866_p10) target bundleno = 688 (0x2b0), region = 56 }
 0x2aa   : > { %3789 = vst [vmem:[#allocation2 + $0x60] sm:$0xf] %v3788_v9 }
 0x2ab   : > { %v3696_v39 = vor.u32 %v3694_v53, %v3693_v44  ;;  %v3698_v59 = vrot.slane %v3693_v44, 4  ;;  %v3679_v28 = vor.u32 %v3677_v56, %v3676_v58  ;;  %v3681_v12 = vrot.slane %v3676_v58, 4 }
 0x2ad   : > { %v3697_v21 = vsel %vm9521_vm15, %v3689_v18, %v3696_v39  ;;  %v3799_v15 = vsel %vm9453_vm10, %v3698_v59, %v3798_v60  ;;  %v3680_v4 = vsel %vm9521_vm15, %v3672_v54, %v3679_v28  ;;  %v3792_v24 = vsel %vm9453_vm10, %v3681_v12, %v3791_v62 }
 0x2ae   : > { %3797 = vst [vmem:[#allocation2 + $0x70] sm:$0xf] %v3697_v21  ;;  %3800 = vst [vmem:[#allocation2 + $0x74] sm:$0x1] %v3799_v15 }
 0x2af   : > { %3790 = vst [vmem:[#allocation2 + $0x64] sm:$0xf] %v3680_v4  ;;  %3793 = vst [vmem:[#allocation2 + $0x68] sm:$0x1] %v3792_v24 }
 0x2b0 PF: > { %p6867_p12 = scmp.ne.s32.totalorder %s8275_s27, 1 }
 0x2b1   : > { %v8297_v23 = vmov (!%p6867_p12), 0  }
 0x2b2   : > { %3811 = sbr.rel (%p6867_p12) target bundleno = 697 (0x2b9), region = 60  ;;  %3813 = vst [vmem:[#allocation2 + $0x6c] sm:$0xf] (!%p6867_p12), %v8297_v23  ;;  %3814 = vst [vmem:[#allocation2 + $0x70] sm:$0xf] (!%p6867_p12), %v8297_v23 }
 0x2b3   : > { %3815 = vst [vmem:[#allocation2 + $0x74] sm:$0x1] (!%p6867_p12), %v8297_v23 }
 0x2b9 PF: > { %v7877_v8 = vld [vmem:[#allocation3 + $0x184] ss:$8 sps:$4 sm:$0xff]   ;;  %v7879_v2 = vld [vmem:[#allocation3 + $0x180] ss:$8 sps:$4 sm:$0xff]   ;;  %v7880_v47 = vld [vmem:[#allocation3 + $0x194] ss:$8 sps:$4 sm:$0xff]  }
 0x2ba   : > { %4684 = vmatprep.subr.bf16.mxu1 %v7877_v8  ;;  %v10198_v20 = vmov 0   ;;  %v7882_v32 = vld [vmem:[#allocation3 + $0x190] ss:$8 sps:$4 sm:$0xff]   ;;  %v7883_v42 = vld [vmem:[#allocation3 + $0x1a4] ss:$8 sps:$4 sm:$0xff]   ;;  %vm4049_vm1 = vcmask 1046528  }
 0x2bb   : > { %6075 = vmatprep.mubr.bf16.mxu0 %v10198_v20  ;;  %4685 = vmatpush1.bf16.msra.mxu1 %v7879_v2  ;;  %v7885_v1 = vld [vmem:[#allocation3 + $0x1a0] ss:$8 sps:$4 sm:$0xff]   ;;  %v7886_v49 = vld [vmem:[#allocation3 + $0x1b4] ss:$8 sps:$4 sm:$0xff]   ;;  %v7888_v30 = vld [vmem:[#allocation3 + $0x1b0] ss:$8 sps:$4 sm:$0xff]  }
 0x2bc   : > { %4686 = vmatprep.subr.bf16.mxu1 %v7880_v47  ;;  %v7889_v29 = vld [vmem:[#allocation3 + $0x1c4] ss:$8 sps:$4 sm:$0xff]   ;;  %v7891_v63 = vld [vmem:[#allocation3 + $0x1c0] ss:$8 sps:$4 sm:$0xff]   ;;  %v7892_v35 = vld [vmem:[#allocation3 + $0x1d4] ss:$8 sps:$4 sm:$0xff]  }
 0x2bd   : > { %v7894_v22 = vld [vmem:[#allocation3 + $0x1d0] ss:$8 sps:$4 sm:$0xff]   ;;  %v7895_v3 = vld [vmem:[#allocation3 + $0x1e4] ss:$8 sps:$4 sm:$0xff]   ;;  %v4131_v43 = vld [vmem:[#allocation2 + $0xc] sm:$0xf] }
 0x2be   : > { %v4132_v25 = vld [vmem:[#allocation2 + $0x10] sm:$0xf]  ;;  %v7926_v57 = vld [vmem:[#allocation2 + $0x14] ss:$0 sps:$4 sm:$0x11]   ;;  %s7089_s12 = sshll.u32 %s8279_s28, 5 }
 0x2bf   : > { %4687 = vmatpush1.bf16.msra.mxu1 %v7882_v32  ;;  %v9617_v46 = vcombine.low %v4131_v43, %v4132_v25  ;;  %v7897_v37 = vld [vmem:[#allocation3 + $0x1e0] ss:$8 sps:$4 sm:$0xff]   ;;  %v7898_v55 = vld [vmem:[#allocation3 + $0x1f4] ss:$8 sps:$4 sm:$0xff]   ;;  %v4243_v26 = vshll.u32 %v7926_v57, 16  ;;  %v4364_v52 = vrot.slane %v7926_v57, 1 }
 0x2c0   : > { %4688 = vmatprep.subr.bf16.mxu1 %v7883_v42  ;;  %v7900_v41 = vld [vmem:[#allocation3 + $0x1f0] ss:$8 sps:$4 sm:$0xff]   ;;  %vm3920_vm0 = vsmask.f32 7424  ;;  %v7901_v45 = vld [vmem:[#allocation3 + $0x204] ss:$8 sps:$4 sm:$0xff]  }
 0x2c1   : > { %v4236_v38 = vshrl.u32 %v9617_v46, 16  ;;  %v4238_v34 = vshll.u32 %v9617_v46, 16  ;;  %v4245_v13 = vrot.slane %v4243_v26, 1  ;;  %v7903_v17 = vld [vmem:[#allocation3 + $0x200] ss:$8 sps:$4 sm:$0xff]   ;;  %s6355_s28 = sshll.u32 %s9612_s11, 4  ;;  %s10122_s28 = int_to_ptr.vmem [resolvable:$true] %s6355_s28 }
 0x2c2   : > { %v7904_v40 = vld [vmem:[#allocation3 + $0x214] ss:$8 sps:$4 sm:$0xff]   ;;  %v7906_v16 = vld [vmem:[#allocation3 + $0x210] ss:$8 sps:$4 sm:$0xff]   ;;  %v7907_v19 = vld [vmem:[#allocation3 + $0x224] ss:$8 sps:$4 sm:$0xff]  }
 0x2c3   : > { %4689 = vmatpush1.bf16.msra.mxu1 %v7885_v1  ;;  %v4240_v51 = vrot.slane %v4238_v34, 1  ;;  %v7909_v0 = vld [vmem:[#allocation3 + $0x220] ss:$8 sps:$4 sm:$0xff]   ;;  %v7910_v48 = vld [vmem:[#allocation3 + $0x234] ss:$8 sps:$4 sm:$0xff]   ;;  %s10228_s10 = sand.u32 1, %s8267_s25  }
 0x2c4   : > { %4690 = vmatprep.subr.bf16.mxu1 %v7886_v49  ;;  %v7912_v61 = vld [vmem:[#allocation3 + $0x230] ss:$8 sps:$4 sm:$0xff]   ;;  %v7913_v31 = vld [vmem:[#allocation3 + $0x244] ss:$8 sps:$4 sm:$0xff]   ;;  %v4133_v5 = vld [vmem:[#allocation2 + $0x18] sm:$0xf] }
 0x2c5   : > { %v4241_v50 = vor.u32 %v4240_v51, %v4236_v38  ;;  %v4134_v7 = vld [vmem:[#allocation2 + $0x1c] sm:$0xf]  ;;  %v7915_v14 = vld [vmem:[#allocation3 + $0x240] ss:$8 sps:$4 sm:$0xff]   ;;  %v7916_v36 = vld [vmem:[#allocation3 + $0x254] ss:$8 sps:$4 sm:$0xff]  }
 0x2c6   : > { %v9622_v11 = vcombine.low %v4133_v5, %v4134_v7  ;;  %v4155_v10 = vld [vmem:[#allocation2 + $0xc] sm:$0xe]  ;;  %v7918_v9 = vld [vmem:[#allocation3 + $0x250] ss:$8 sps:$4 sm:$0xff]   ;;  %v4156_v56 = vld [vmem:[#allocation2 + $0x18] sm:$0xe] }
 0x2c7   : > { %4691 = vmatpush1.bf16.msra.mxu1 %v7888_v30  ;;  %v4246_v27 = vsel %vm3920_vm0, %v4241_v50, %v4245_v13  ;;  %v6908_v33 = vcombine.low %v4155_v10, %v4132_v25  ;;  %v7931_v44 = vld [vmem:[#allocation2 + $0x20] ss:$0 sps:$4 sm:$0x11]   ;;  %v7919_v18 = vld [vmem:[#allocation3 + $0x264] ss:$8 sps:$4 sm:$0xff]   ;;  %v6909_v60 = vcombine.low %v4156_v56, %v4134_v7  ;;  %s10128_s19 = scalar_lea.sflag [#allocation5], %s10228_s10 }
 0x2c8   : > { %4692 = vmatprep.subr.bf16.mxu1 %v7889_v29  ;;  %4716 = vmatprep.mubr.bf16.mxu1 %v4246_v27  ;;  %v4250_v53 = vshll.u32 %v9622_v11, 16  ;;  %v4135_v54 = vld [vmem:[#allocation2 + $0x24] sm:$0xf]  ;;  %v4367_v62 = vrot.slane %v7931_v44, 1  ;;  %v7921_v39 = vld [vmem:[#allocation3 + $0x260] ss:$8 sps:$4 sm:$0xff]  }
 0x2c9   : > { %v4363_v58 = vrot.slane %v6908_v33, 1  ;;  %v4136_v59 = vld [vmem:[#allocation2 + $0x28] sm:$0xf]  ;;  %v7936_v28 = vld [vmem:[#allocation2 + $0x2c] ss:$0 sps:$4 sm:$0x11]  }
 0x2ca   : > { %v4255_v21 = vshll.u32 %v7931_v44, 16  ;;  %v4366_v15 = vrot.slane %v6909_v60, 1  ;;  %v4157_v4 = vld [vmem:[#allocation2 + $0x24] sm:$0xe]  ;;  %v7922_v24 = vld [vmem:[#allocation3 + $0x274] ss:$8 sps:$4 sm:$0xff]   ;;  %v9629_v47 = vcombine.low %v4135_v54, %v4136_v59 }
 0x2cb   : > { %4693 = vmatpush1.bf16.msra.mxu1 %v7891_v63  ;;  %v9626_v12 = vsel %vm4049_vm1, %v4363_v58, %v4364_v52  ;;  %v4248_v6 = vshrl.u32 %v9622_v11, 16  ;;  %v4252_v23 = vrot.slane %v4250_v53, 1  ;;  %v6910_v8 = vcombine.low %v4157_v4, %v4136_v59  ;;  %v4138_v32 = vld [vmem:[#allocation2 + $0x34] sm:$0xf]  ;;  %v7924_v49 = vld [vmem:[#allocation3 + $0x270] ss:$8 sps:$4 sm:$0xff]  }
 0x2cc   : > { %4694 = vmatprep.subr.bf16.mxu1 %v7892_v35  ;;  %v4370_v2 = vrot.slane %v7936_v28, 1  ;;  %v9631_v42 = vld [vmem:[#allocation2 + $0x38] ss:$0 sps:$4 sm:$0x11]   ;;  %v9634_v1 = vsel %vm4049_vm1, %v4366_v15, %v4367_v62  ;;  %v4158_v29 = vld [vmem:[#allocation2 + $0x30] sm:$0xe] }
 0x2cd   : > { %v4369_v30 = vrot.slane %v6910_v8, 1  ;;  %v7929_v63 = vld [vmem:[#allocation3 + $0x284] ss:$8 sps:$4 sm:$0xff]   ;;  %v4257_v35 = vrot.slane %v4255_v21, 1  ;;  %v4373_v43 = vrot.slane %v9631_v42, 1  ;;  %v4262_v38 = vshll.u32 %v9629_v47, 16 }
 0x2ce   : > { %v4140_v25 = vld [vmem:[#allocation2 + $0x40] sm:$0xf]  ;;  %v9637_v57 = vld [vmem:[#allocation2 + $0x44] ss:$0 sps:$4 sm:$0x11]   ;;  %v4260_v13 = vshrl.u32 %v9629_v47, 16 }
 0x2cf   : > { %4695 = vmatpush1.bf16.msra.mxu1 %v7894_v22  ;;  %v4137_v22 = vld [vmem:[#allocation2 + $0x30] sm:$0xf]  ;;  %v4159_v26 = vld [vmem:[#allocation2 + $0x3c] sm:$0xe]  ;;  %v7927_v51 = vld [vmem:[#allocation3 + $0x280] ss:$8 sps:$4 sm:$0xff]  }
 0x2d0   : > { %4696 = vmatprep.subr.bf16.mxu1 %v7895_v3  ;;  %v6911_v3 = vcombine.low %v4158_v29, %v4138_v32  ;;  %v9645_v50 = vld [vmem:[#allocation2 + $0x4c] sm:$0xf]  ;;  %v9647_v27 = vld [vmem:[#allocation2 + $0x50] ss:$0 sps:$4 sm:$0x11]   ;;  %s8193_s23 = scalar_lea.vmem %s10122_s28, 2048 }
 0x2d1   : > { %v4379_v7 = vrot.slane %v9647_v27, 1  ;;  %v9659_v10 = vld [vmem:[#allocation2 + $0x5c] ss:$0 sps:$4 sm:$0x11]   ;;  %v4161_v44 = vld [vmem:[#allocation2 + $0x54] sm:$0xe]  ;;  %p8194_p0 = scmp.ne.s32.totalorder %s10122_s28, %s8193_s23 }
 0x2d2   : > { %v4372_v34 = vrot.slane %v6911_v3, 1  ;;  %v7939_v52 = vld [vmem:[#allocation3 + $0x2a4] ss:$8 sps:$4 sm:$0xff]   ;;  %v4382_v54 = vrot.slane %v9659_v10, 1  ;;  %v7937_v4 = vld [vmem:[#allocation3 + $0x2a0] ss:$8 sps:$4 sm:$0xff]  }
 0x2d3   : > { %4697 = vmatpush1.bf16.msra.mxu1 %v7897_v37  ;;  %v9640_v37 = vsel %vm4049_vm1, %v4369_v30, %v4370_v2  ;;  %v4139_v56 = vld [vmem:[#allocation2 + $0x3c] sm:$0xf]  ;;  %v9668_v62 = vld [vmem:[#allocation2 + $0x64] sm:$0xf]  ;;  %p10229_p2 = scmp.ne.s32.totalorder %s10205_s15, 0  ;;  %s8299_s20 = smov [#allocation6]  }
 0x2d4   : > { %4698 = vmatprep.subr.bf16.mxu1 %v7898_v55  ;;  %v4253_v55 = vor.u32 %v4252_v23, %v4248_v6  ;;  %v4279_v6 = vshll.u32 %v9631_v42, 16  ;;  %v7949_v3 = vld [vmem:[#allocation3 + $0x2c4] ss:$8 sps:$4 sm:$0xff]   ;;  %s8197_s13 = sshll.u32 %s8299_s20, 4  ;;  %s8198_s13 = int_to_ptr.vmem [resolvable:$false] %s8197_s13 }
 0x2d5   : > { %p8195_p5 = pnand %p8194_p0, %p10229_p2  ;;  %s8199_s30 = scalar_lea.vmem %s8198_s13, 4096 }
 0x2d6   : > { %p8200_p7 = scmp.lt.s32.totalorder %s10122_s28, %s8198_s13  ;;  %p8201_p9 = scmp.lt.s32.totalorder %s8199_s30, %s8193_s23 }
 0x2d7   : > { %4699 = vmatpush1.bf16.msra.mxu1 %v7900_v41  ;;  %v6912_v41 = vcombine.low %v4159_v26, %v4140_v25  ;;  %p8196_p6 = pneg %p8195_p5 }
 0x2d8   : > { %4700 = vmatprep.subr.bf16.mxu1 %v7901_v45  ;;  %v4376_v45 = vrot.slane %v9637_v57, 1  ;;  %p8202_p11 = por %p8201_p9, %p8200_p7 }
 0x2da   : > { %p8203_p13 = pnand %p8202_p11, %p8196_p6 }
 0x2db   : > { %4701 = vmatpush1.bf16.msra.mxu1 %v7903_v17  ;;  %v9650_v17 = vsel %vm4049_vm1, %v4372_v34, %v4373_v43  ;;  %v4141_v43 = vld [vmem:[#allocation2 + $0x48] sm:$0xf] }
 0x2dc   : > { %4702 = vmatprep.subr.bf16.mxu1 %v7904_v40  ;;  %v4267_v40 = vshll.u32 %v7936_v28, 16  ;;  %v4162_v28 = vld [vmem:[#allocation2 + $0x60] sm:$0xe]  ;;  %v6897_v26 = vcombine.low %v4141_v43, %v9645_v50  ;;  %v9715_v43 = vld [vmem:[#allocation2 + $0x14] ss:$0 sps:$4 sm:$0x11]  }
 0x2dd   : > { %v6915_v21 = vcombine.low %v4162_v28, %v9668_v62 }
 0x2de   : > { %v4269_v53 = vrot.slane %v4267_v40, 1 }
 0x2df   : > { %4703 = vmatpush1.bf16.msra.mxu1 %v7906_v16  ;;  %v9652_v16 = vcombine.low %v4137_v22, %v4138_v32  ;;  %v7944_v32 = vld [vmem:[#allocation3 + $0x2b4] ss:$8 sps:$4 sm:$0xff]   ;;  %v4384_v30 = vrot.slane %v6915_v21, 1 }
 0x2e0   : > { %4704 = vmatprep.subr.bf16.mxu1 %v7907_v19  ;;  %v4375_v19 = vrot.slane %v6912_v41, 1  ;;  %v7959_v41 = vld [vmem:[#allocation3 + $0x2e4] ss:$8 sps:$4 sm:$0xff]  }
 0x2e1   : > { %v4274_v58 = vshll.u32 %v9652_v16, 16 }
 0x2e3   : > { %4705 = vmatpush1.bf16.msra.mxu1 %v7909_v0  ;;  %v4160_v0 = vld [vmem:[#allocation2 + $0x48] sm:$0xe]  ;;  %v4276_v2 = vrot.slane %v4274_v58, 1 }
 0x2e4   : > { %4706 = vmatprep.subr.bf16.mxu1 %v7910_v48  ;;  %v4258_v48 = vsel %vm3920_vm0, %v4253_v55, %v4257_v35  ;;  %v6913_v5 = vcombine.low %v4160_v0, %v9645_v50  ;;  %v7942_v35 = vld [vmem:[#allocation3 + $0x2b0] ss:$8 sps:$4 sm:$0xff]   ;;  %v4143_v0 = vld [vmem:[#allocation2 + $0x54] sm:$0xf]  ;;  %v4303_v50 = vshll.u32 %v9647_v27, 16  ;;  %v4315_v27 = vshll.u32 %v9659_v10, 16 }
 0x2e6   : > { %v4378_v33 = vrot.slane %v6913_v5, 1 }
 0x2e7   : > { %4707 = vmatpush1.bf16.msra.mxu1 %v7912_v61  ;;  %v7934_v61 = vld [vmem:[#allocation3 + $0x294] ss:$8 sps:$4 sm:$0xff]  }
 0x2e8   : > { %4708 = vmatprep.subr.bf16.mxu1 %v7913_v31  ;;  %v4264_v31 = vrot.slane %v4262_v38, 1  ;;  %v7947_v38 = vld [vmem:[#allocation3 + $0x2c0] ss:$8 sps:$4 sm:$0xff]  }
 0x2ea   : > { %v4265_v60 = vor.u32 %v4264_v31, %v4260_v13  ;;  %v7952_v13 = vld [vmem:[#allocation3 + $0x2d0] ss:$8 sps:$4 sm:$0xff]   ;;  %v7964_v31 = vld [vmem:[#allocation3 + $0x2f4] ss:$8 sps:$4 sm:$0xff]  }
 0x2eb   : > { %4709 = vmatpush1.bf16.msra.mxu1 %v7915_v14  ;;  %v7932_v14 = vld [vmem:[#allocation3 + $0x290] ss:$8 sps:$4 sm:$0xff]  }
 0x2ec   : > { %4710 = vmatprep.subr.bf16.mxu1 %v7916_v36  ;;  %v9657_v36 = vld [vmem:[#allocation2 + $0x58] sm:$0xf]  ;;  %v4270_v8 = vsel %vm3920_vm0, %v4265_v60, %v4269_v53 }
 0x2ef   : > { %4711 = vmatpush1.bf16.msra.mxu1 %v7918_v9  ;;  %v9662_v9 = vsel %vm4049_vm1, %v4375_v19, %v4376_v45  ;;  %v4298_v19 = vshll.u32 %v6897_v26, 16 }
 0x2f0   : > { %4712 = vmatprep.subr.bf16.mxu1 %v7919_v18  ;;  %v6914_v18 = vcombine.low %v4161_v44, %v9657_v36  ;;  %v4305_v44 = vrot.slane %v4303_v50, 1  ;;  %v7992_v50 = vld [vmem:[#allocation3 + $0x74] ss:$8 sps:$4 sm:$0xff]  }
 0x2f1   : > { %v4300_v5 = vrot.slane %v4298_v19, 1  ;;  %v7980_v19 = vld [vmem:[#allocation3 + $0x40] ss:$8 sps:$4 sm:$0xff]  }
 0x2f2   : > { %v4381_v59 = vrot.slane %v6914_v18, 1 }
 0x2f3   : > { %4713 = vmatpush1.bf16.msra.mxu1 %v7921_v39  ;;  %v9670_v39 = vld [vmem:[#allocation2 + $0x68] ss:$0 sps:$4 sm:$0x11]  }
 0x2f4   : > { %4714 = vmatprep.subr.bf16.mxu1 %v7922_v24  ;;  %v4385_v15 = vrot.slane %v9670_v39, 1  ;;  %v4272_v24 = vshrl.u32 %v9652_v16, 16  ;;  %v9680_v23 = vsel %vm4049_vm1, %v4381_v59, %v4382_v54  ;;  %v4317_v54 = vrot.slane %v4315_v27, 1 }
 0x2f6   : > { %v9685_v29 = vsel %vm4049_vm1, %v4384_v30, %v4385_v15  ;;  %v4277_v42 = vor.u32 %v4276_v2, %v4272_v24  ;;  %v4327_v15 = vshll.u32 %v9670_v39, 16  ;;  %v7971_v30 = vld [vmem:[#allocation3 + $0x14] ss:$8 sps:$4 sm:$0xff]  }
 0x2f7   : > { %4715 = vmatpush1.bf16.msra.mxu1 %v7924_v49  ;;  %v6896_v49 = vcombine.low %v4139_v56, %v4140_v25 }
 0x2f8   : > { %4797 = vmatprep.subr.bf16.mxu1 %v7929_v63  ;;  %v4281_v63 = vrot.slane %v4279_v6, 1  ;;  %v4329_v24 = vrot.slane %v4327_v15, 1  ;;  %v9704_v6 = vld [vmem:[#allocation2 + $0x4] sm:$0xf]  ;;  %v9765_v15 = vld [vmem:[#allocation3 + $0x430] ss:$8 sps:$4 sm:$0xff]  }
 0x2f9   : > { %v4286_v22 = vshll.u32 %v6896_v49, 16  ;;  %v4284_v55 = vshrl.u32 %v6896_v49, 16 }
 0x2fa   : > { %4717 = vmatmul.mubr.bf16.vlgmr.msra.gmra.mrb[0].mxu1 %v9617_v46  ;;  %v9673_v46 = vsel %vm4049_vm1, %v4378_v33, %v4379_v7  ;;  %v4282_v25 = vsel %vm3920_vm0, %v4277_v42, %v4281_v63  ;;  %v7962_v7 = vld [vmem:[#allocation3 + $0x2f0] ss:$8 sps:$4 sm:$0xff]   ;;  %v7975_v42 = vld [vmem:[#allocation3 + $0x24] ss:$8 sps:$4 sm:$0xff]  }
 0x2fb   : > { %4798 = vmatpush1.bf16.msra.mxu1 %v7927_v51  ;;  %4726 = vmatprep.mubr.bf16.mxu1 %v4258_v48  ;;  %v4288_v34 = vrot.slane %v4286_v22, 1  ;;  %v7954_v51 = vld [vmem:[#allocation3 + $0x2d4] ss:$8 sps:$4 sm:$0xff]   ;;  %v4296_v48 = vshrl.u32 %v6897_v26, 16  ;;  %v9713_v22 = vld [vmem:[#allocation2 + $0x10] sm:$0xf] }
 0x2fc   : > { %4799 = vmatprep.subr.bf16.mxu1 %v7934_v61  ;;  %v7957_v61 = vld [vmem:[#allocation3 + $0x2e0] ss:$8 sps:$4 sm:$0xff]  }
 0x2fd   : > { %v4289_v45 = vor.u32 %v4288_v34, %v4284_v55  ;;  %v4301_v33 = vor.u32 %v4300_v5, %v4296_v48  ;;  %v4054_v34 = vrot.slane %v9715_v43, 1  ;;  %v7987_v5 = vld [vmem:[#allocation3 + $0x60] ss:$8 sps:$4 sm:$0xff]  }
 0x2ff   : > { %4800 = vmatpush1.bf16.msra.mxu1 %v7932_v14  ;;  %v4145_v14 = vld [vmem:[#allocation2 + $0x60] sm:$0xf]  ;;  %v4306_v56 = vsel %vm3920_vm0, %v4301_v33, %v4305_v44  ;;  %v8003_v44 = vld [vmem:[#allocation3 + $0xa4] ss:$8 sps:$4 sm:$0xff]  }
 0x300   : > { %4801 = vmatprep.subr.bf16.mxu1 %v7939_v52  ;;  %v7968_v52 = vld [vmem:[#allocation3 + $0x4] ss:$8 sps:$4 sm:$0xff]   ;;  %v9739_v33 = vld [vmem:[#allocation3 + $0x400] ss:$8 sps:$4 sm:$0xff]  }
 0x302   : > { %4727 = vmatmul.mubr.bf16.gmra.mrb[4].mxu1 %v9622_v11  ;;  %v4291_v11 = vshll.u32 %v9637_v57, 16 }
 0x303   : > { %4736 = vmatprep.mubr.bf16.mxu1 %v4270_v8  ;;  %4802 = vmatpush1.bf16.msra.mxu1 %v7937_v4  ;;  %v3840_v8 = vld [vmem:[#allocation2] sm:$0xe] }
 0x304   : > { %4803 = vmatprep.subr.bf16.mxu1 %v7944_v32  ;;  %v4293_v40 = vrot.slane %v4291_v11, 1  ;;  %v6884_v2 = vcombine.low %v3840_v8, %v9704_v6 }
 0x306   : > { %v4294_v57 = vsel %vm3920_vm0, %v4289_v45, %v4293_v40  ;;  %v4050_v32 = vrot.slane %v6884_v2, 1  ;;  %v9726_v45 = vld [vmem:[#allocation2 + $0x20] ss:$0 sps:$4 sm:$0x11]   ;;  %v9774_v2 = vld [vmem:[#allocation3 + $0x444] ss:$8 sps:$4 sm:$0xff]  }
 0x307   : > { %4804 = vmatpush1.bf16.msra.mxu1 %v7942_v35  ;;  %v7969_v35 = vld [vmem:[#allocation3 + $0x10] ss:$8 sps:$4 sm:$0xff]   ;;  %v4057_v48 = vrot.slane %v9726_v45, 1 }
 0x308   : > { %4805 = vmatprep.subr.bf16.mxu1 %v7949_v3  ;;  %v3841_v3 = vld [vmem:[#allocation2 + $0xc] sm:$0xe] }
 0x309   : > { %v6885_v55 = vcombine.low %v3841_v3, %v9713_v22  ;;  %v9785_v3 = vld [vmem:[#allocation3 + $0x450] ss:$8 sps:$4 sm:$0xff]  }
 0x30a   : > { %4737 = vmatmul.mubr.bf16.gmra.mrb[8].mxu1 %v9629_v47  ;;  %v6898_v47 = vcombine.low %v4143_v0, %v9657_v36  ;;  %v6899_v36 = vcombine.low %v4145_v14, %v9668_v62  ;;  %v9701_v62 = vld [vmem:[#allocation2 + $0x8] ss:$0 sps:$4 sm:$0x11]   ;;  %v7999_v14 = vld [vmem:[#allocation3 + $0x94] ss:$8 sps:$4 sm:$0xff]  }
 0x30b   : > { %4746 = vmatprep.mubr.bf16.mxu1 %v4282_v25  ;;  %4806 = vmatpush1.bf16.msra.mxu1 %v7947_v38  ;;  %v4051_v39 = vrot.slane %v9701_v62, 1  ;;  %v7973_v38 = vld [vmem:[#allocation3 + $0x20] ss:$8 sps:$4 sm:$0xff]   ;;  %v4053_v25 = vrot.slane %v6885_v55, 1  ;;  %v3929_v8 = vshll.u32 %v9701_v62, 16 }
 0x30c   : > { %4807 = vmatprep.subr.bf16.mxu1 %v7954_v51  ;;  %v4310_v53 = vshll.u32 %v6898_v47, 16  ;;  %v4308_v58 = vshrl.u32 %v6898_v47, 16  ;;  %v4322_v60 = vshll.u32 %v6899_v36, 16  ;;  %v4320_v28 = vshrl.u32 %v6899_v36, 16  ;;  %v7982_v51 = vld [vmem:[#allocation3 + $0x44] ss:$8 sps:$4 sm:$0xff]  }
 0x30d   : > { %v9709_v63 = vsel %vm4049_vm1, %v4050_v32, %v4051_v39  ;;  %v9720_v11 = vsel %vm4049_vm1, %v4053_v25, %v4054_v34  ;;  %v9776_v39 = vld [vmem:[#allocation3 + $0x440] ss:$8 sps:$4 sm:$0xff]   ;;  %v8011_v32 = vld [vmem:[#allocation3 + $0xd0] ss:$8 sps:$4 sm:$0xff]   ;;  %v3931_v62 = vrot.slane %v3929_v8, 1  ;;  %v3941_v25 = vshll.u32 %v9715_v43, 16 }
 0x30e   : > { %v4312_v18 = vrot.slane %v4310_v53, 1  ;;  %v4324_v21 = vrot.slane %v4322_v60, 1  ;;  %v9745_v53 = vld [vmem:[#allocation3 + $0x414] ss:$8 sps:$4 sm:$0xff]   ;;  %v8010_v60 = vld [vmem:[#allocation3 + $0xc4] ss:$8 sps:$4 sm:$0xff]  }
 0x30f   : > { %4808 = vmatpush1.bf16.msra.mxu1 %v7952_v13  ;;  %v9724_v13 = vld [vmem:[#allocation2 + $0x1c] sm:$0xf]  ;;  %v5377_v34 = vld [vmem:[#allocation2 + $0x18] sm:$0xf]  ;;  %v8030_v8 = vld [vmem:[#allocation3 + $0x114] ss:$8 sps:$4 sm:$0xff]  }
 0x310   : > { %4809 = vmatprep.subr.bf16.mxu1 %v7959_v41  ;;  %v4325_v4 = vor.u32 %v4324_v21, %v4320_v28  ;;  %v3842_v41 = vld [vmem:[#allocation2 + $0x18] sm:$0xe]  ;;  %v3818_v28 = vld [vmem:[#allocation2 + $0xc] sm:$0xf]  ;;  %v8025_v43 = vld [vmem:[#allocation3 + $0x104] ss:$8 sps:$4 sm:$0xff]  }
 0x311   : > { %v6886_v40 = vcombine.low %v3842_v41, %v9724_v13  ;;  %v9763_v21 = vld [vmem:[#allocation3 + $0x434] ss:$8 sps:$4 sm:$0xff]  }
 0x312   : > { %4747 = vmatmul.mubr.bf16.gmra.mrb[12].mxu1 %v9652_v16  ;;  %v4313_v16 = vor.u32 %v4312_v18, %v4308_v58  ;;  %v4330_v10 = vsel %vm3920_vm0, %v4325_v4, %v4329_v24  ;;  %v3816_v58 = vld [vmem:[#allocation2] sm:$0xf]  ;;  %v8013_v4 = vld [vmem:[#allocation3 + $0xd4] ss:$8 sps:$4 sm:$0xff]   ;;  %v9769_v24 = vcombine.low %v3818_v28, %v9713_v22  ;;  %v3820_v22 = vld [vmem:[#allocation2 + $0x18] sm:$0xf] }
 0x313   : > { %4756 = vmatprep.mubr.bf16.mxu1 %v4294_v57  ;;  %4810 = vmatpush1.bf16.msra.mxu1 %v7957_v61  ;;  %v4056_v0 = vrot.slane %v6886_v40, 1  ;;  %v7989_v57 = vld [vmem:[#allocation3 + $0x64] ss:$8 sps:$4 sm:$0xff]   ;;  %v8001_v18 = vld [vmem:[#allocation3 + $0xa0] ss:$8 sps:$4 sm:$0xff]   ;;  %v9751_v27 = vcombine.low %v3816_v58, %v9704_v6  ;;  %v9792_v41 = vcombine.low %v3820_v22, %v9724_v13  ;;  %v3953_v28 = vshll.u32 %v9726_v45, 16 }
 0x314   : > { %4811 = vmatprep.subr.bf16.mxu1 %v7964_v31  ;;  %v4318_v59 = vsel %vm3920_vm0, %v4313_v16, %v4317_v54  ;;  %v7983_v31 = vld [vmem:[#allocation3 + $0x50] ss:$8 sps:$4 sm:$0xff]   ;;  %v9756_v16 = vld [vmem:[#allocation3 + $0x420] ss:$8 sps:$4 sm:$0xff]   ;;  %v3934_v55 = vshrl.u32 %v9769_v24, 16 }
 0x315   : > { %v9731_v61 = vsel %vm4049_vm1, %v4056_v0, %v4057_v48  ;;  %v8004_v54 = vld [vmem:[#allocation3 + $0xb0] ss:$8 sps:$4 sm:$0xff]   ;;  %v9795_v40 = vld [vmem:[#allocation3 + $0x464] ss:$8 sps:$4 sm:$0xff]   ;;  %v9799_v48 = vld [vmem:[#allocation3 + $0x460] ss:$8 sps:$4 sm:$0xff]  }
 0x316   : > { %v8018_v0 = vld [vmem:[#allocation3 + $0xf0] ss:$8 sps:$4 sm:$0xff]   ;;  %v8023_v58 = vld [vmem:[#allocation3 + $0x100] ss:$8 sps:$4 sm:$0xff]   ;;  %v8035_v45 = vld [vmem:[#allocation3 + $0x124] ss:$8 sps:$4 sm:$0xff]  }
 0x317   : > { %4812 = vmatpush1.bf16.msra.mxu1 %v7962_v7  ;;  %v7996_v7 = vld [vmem:[#allocation3 + $0x84] ss:$8 sps:$4 sm:$0xff]   ;;  %v9826_v22 = vld [vmem:[#allocation2 + $0x2c] ss:$0 sps:$4 sm:$0x11]  }
 0x318   : > { %5150 = vmatprep.subr.bf16.mxu1 %v7968_v52  ;;  %v9737_v52 = vld [vmem:[#allocation3 + $0x404] ss:$8 sps:$4 sm:$0xff]  }
 0x319   : > { %6043 = vmatprep.subr.bf16.mxu0 %v9737_v52 }
 0x31a   : > { %4757 = vmatmul.mubr.bf16.gmra.mrb[16].mxu1 %v6896_v49  ;;  %v7966_v49 = vld [vmem:[#allocation3] ss:$8 sps:$4 sm:$0xff]   ;;  %6044 = vmatpush1.bf16.msra.mxu0 %v9739_v33 }
 0x31b   : > { %4766 = vmatprep.mubr.bf16.mxu1 %v4306_v56  ;;  %v9747_v56 = vld [vmem:[#allocation3 + $0x410] ss:$8 sps:$4 sm:$0xff]   ;;  %6045 = vmatprep.subr.bf16.mxu0 %v9745_v53 }
 0x31e   : > { %6046 = vmatpush1.bf16.msra.mxu0 %v9747_v56 }
 0x322   : > { %4767 = vmatmul.mubr.bf16.gmra.mrb[20].mxu1 %v6897_v26  ;;  %v7976_v26 = vld [vmem:[#allocation3 + $0x30] ss:$8 sps:$4 sm:$0xff]  }
 0x323   : > { %4776 = vmatprep.mubr.bf16.mxu1 %v4318_v59  ;;  %v3924_v59 = vshll.u32 %v9751_v27, 16 }
 0x325   : > { %v3926_v6 = vrot.slane %v3924_v59, 1 }
 0x32a   : > { %4777 = vmatmul.mubr.bf16.gmra.mrb[24].mxu1 %v6898_v47  ;;  %v7990_v47 = vld [vmem:[#allocation3 + $0x70] ss:$8 sps:$4 sm:$0xff]  }
 0x32b   : > { %4786 = vmatprep.mubr.bf16.mxu1 %v4330_v10  ;;  %v3922_v10 = vshrl.u32 %v9751_v27, 16 }
 0x332   : > { %4787 = vmatmul.mubr.bf16.gmra.mrb[28].mxu1 %v6899_v36  ;;  %v9754_v36 = vld [vmem:[#allocation3 + $0x424] ss:$8 sps:$4 sm:$0xff]  }
 0x333   : > { %4829 = vmatprep.mubr.bf16.mxu1 %v10198_v20  ;;  %6047 = vmatprep.subr.bf16.mxu0 %v9754_v36 }
 0x334   : > { %6048 = vmatpush1.bf16.msra.mxu0 %v9756_v16 }
 0x335   : > { %6049 = vmatprep.subr.bf16.mxu0 %v9763_v21 }
 0x338   : > { %6050 = vmatpush1.bf16.msra.mxu0 %v9765_v15 }
 0x339   : > { %6051 = vmatprep.subr.bf16.mxu0 %v9774_v2 }
 0x33a   : > { %4830 = vmatmul.mubr.bf16.vlgmr.msra.gmra.mrb[0].mxu1 %v9626_v12  ;;  %v7978_v12 = vld [vmem:[#allocation3 + $0x34] ss:$8 sps:$4 sm:$0xff]  }
 0x33b   : > { %5151 = vmatpush1.bf16.msra.mxu1 %v7966_v49  ;;  %4839 = vmatprep.mubr.bf16.mxu1 %v10198_v20  ;;  %v3936_v49 = vshll.u32 %v9769_v24, 16 }
 0x33c   : > { %5152 = vmatprep.subr.bf16.mxu1 %v7971_v30  ;;  %v8017_v30 = vld [vmem:[#allocation3 + $0xe4] ss:$8 sps:$4 sm:$0xff]   ;;  %6052 = vmatpush1.bf16.msra.mxu0 %v9776_v39 }
 0x33f   : > { %5153 = vmatpush1.bf16.msra.mxu1 %v7969_v35  ;;  %v3927_v35 = vor.u32 %v3926_v6, %v3922_v10  ;;  %v5379_v10 = vld [vmem:[#allocation2 + $0x24] sm:$0xf]  ;;  %v5380_v6 = vld [vmem:[#allocation2 + $0x28] sm:$0xf] }
 0x340   : > { %5154 = vmatprep.subr.bf16.mxu1 %v7975_v42  ;;  %v9783_v42 = vld [vmem:[#allocation3 + $0x454] ss:$8 sps:$4 sm:$0xff]  }
 0x341   : > { %6053 = vmatprep.subr.bf16.mxu0 %v9783_v42 }
 0x342   : > { %4840 = vmatmul.mubr.bf16.gmra.mrb[4].mxu1 %v9634_v1  ;;  %v7985_v1 = vld [vmem:[#allocation3 + $0x54] ss:$8 sps:$4 sm:$0xff]   ;;  %6054 = vmatpush1.bf16.msra.mxu0 %v9785_v3 }
 0x343   : > { %5155 = vmatpush1.bf16.msra.mxu1 %v7973_v38  ;;  %4849 = vmatprep.mubr.bf16.mxu1 %v10198_v20  ;;  %v3938_v38 = vrot.slane %v3936_v49, 1 }
 0x344   : > { %5156 = vmatprep.subr.bf16.mxu1 %v7978_v12  ;;  %v5378_v12 = vld [vmem:[#allocation2 + $0x1c] sm:$0xf]  ;;  %6055 = vmatprep.subr.bf16.mxu0 %v9795_v40 }
 0x345   : > { %v3939_v13 = vor.u32 %v3938_v38, %v3934_v55  ;;  %v8145_v55 = vld [vmem:[#allocation2 + $0x2c] ss:$0 sps:$4 sm:$0x11]  }
 0x346   : > { %6056 = vmatpush1.bf16.msra.mxu0 %v9799_v48 }
 0x347   : > { %5157 = vmatpush1.bf16.msra.mxu1 %v7976_v26  ;;  %v8020_v26 = vld [vmem:[#allocation3 + $0xf4] ss:$8 sps:$4 sm:$0xff]  }
 0x348   : > { %5158 = vmatprep.subr.bf16.mxu1 %v7982_v51  ;;  %v3932_v51 = vsel %vm3920_vm0, %v3927_v35, %v3931_v62  ;;  %v9824_v35 = vcombine.low %v5379_v10, %v5380_v6  ;;  %v8028_v62 = vld [vmem:[#allocation3 + $0x110] ss:$8 sps:$4 sm:$0xff]   ;;  %v9847_v10 = vld [vmem:[#allocation2 + $0x38] ss:$0 sps:$4 sm:$0x11]  }
 0x34a   : > { %4850 = vmatmul.mubr.bf16.gmra.mrb[8].mxu1 %v9640_v37  ;;  %v7994_v37 = vld [vmem:[#allocation3 + $0x80] ss:$8 sps:$4 sm:$0xff]   ;;  %v5496_v38 = vshll.u32 %v9824_v35, 16 }
 0x34b   : > { %5159 = vmatpush1.bf16.msra.mxu1 %v7980_v19  ;;  %4859 = vmatprep.mubr.bf16.mxu1 %v10198_v20  ;;  %v9797_v19 = vcombine.low %v5377_v34, %v5378_v12 }
 0x34c   : > { %5160 = vmatprep.subr.bf16.mxu1 %v7985_v1  ;;  %v8142_v1 = vld [vmem:[#allocation2 + $0x20] ss:$0 sps:$4 sm:$0x11]  }
 0x34f   : > { %5161 = vmatpush1.bf16.msra.mxu1 %v7983_v31  ;;  %v5484_v31 = vshll.u32 %v9797_v19, 16 }
 0x350   : > { %5162 = vmatprep.subr.bf16.mxu1 %v7989_v57  ;;  %v3943_v57 = vrot.slane %v3941_v25, 1  ;;  %v3955_v25 = vrot.slane %v3953_v28, 1 }
 0x352   : > { %4860 = vmatmul.mubr.bf16.gmra.mrb[12].mxu1 %v9650_v17  ;;  %v7997_v17 = vld [vmem:[#allocation3 + $0x90] ss:$8 sps:$4 sm:$0xff]   ;;  %v3944_v59 = vsel %vm3920_vm0, %v3939_v13, %v3943_v57  ;;  %v8033_v13 = vld [vmem:[#allocation3 + $0x120] ss:$8 sps:$4 sm:$0xff]  }
 0x353   : > { %5163 = vmatpush1.bf16.msra.mxu1 %v7987_v5  ;;  %4869 = vmatprep.mubr.bf16.mxu1 %v10198_v20  ;;  %v3822_v5 = vld [vmem:[#allocation2 + $0x24] sm:$0xf] }
 0x354   : > { %5164 = vmatprep.subr.bf16.mxu1 %v7992_v50  ;;  %v9804_v50 = vld [vmem:[#allocation2 + $0x28] sm:$0xf] }
 0x357   : > { %5165 = vmatpush1.bf16.msra.mxu1 %v7990_v47  ;;  %v3948_v47 = vshll.u32 %v9792_v41, 16 }
 0x358   : > { %5166 = vmatprep.subr.bf16.mxu1 %v7996_v7  ;;  %v9808_v7 = vld [vmem:[#allocation3 + $0x474] ss:$8 sps:$4 sm:$0xff]  }
 0x359   : > { %6057 = vmatprep.subr.bf16.mxu0 %v9808_v7 }
 0x35a   : > { %4870 = vmatmul.mubr.bf16.gmra.mrb[16].mxu1 %v9662_v9  ;;  %v8006_v9 = vld [vmem:[#allocation3 + $0xb4] ss:$8 sps:$4 sm:$0xff]  }
 0x35b   : > { %5167 = vmatpush1.bf16.msra.mxu1 %v7994_v37  ;;  %4879 = vmatprep.mubr.bf16.mxu1 %v10198_v20  ;;  %v5486_v37 = vrot.slane %v5484_v31, 1 }
 0x35c   : > { %5168 = vmatprep.subr.bf16.mxu1 %v7999_v14  ;;  %v5489_v14 = vshll.u32 %v8142_v1, 16 }
 0x35f   : > { %5169 = vmatpush1.bf16.msra.mxu1 %v7997_v17  ;;  %v9811_v17 = vld [vmem:[#allocation3 + $0x470] ss:$8 sps:$4 sm:$0xff]  }
 0x360   : > { %5170 = vmatprep.subr.bf16.mxu1 %v8003_v44  ;;  %v5401_v44 = vld [vmem:[#allocation2 + $0x18] sm:$0xe]  ;;  %6058 = vmatpush1.bf16.msra.mxu0 %v9811_v17 }
 0x362   : > { %4880 = vmatmul.mubr.bf16.gmra.mrb[20].mxu1 %v9673_v46  ;;  %v8008_v46 = vld [vmem:[#allocation3 + $0xc0] ss:$8 sps:$4 sm:$0xff]  }
 0x363   : > { %5171 = vmatpush1.bf16.msra.mxu1 %v8001_v18  ;;  %4889 = vmatprep.mubr.bf16.mxu1 %v10198_v20  ;;  %v3946_v18 = vshrl.u32 %v9792_v41, 16 }
 0x364   : > { %5172 = vmatprep.subr.bf16.mxu1 %v8006_v9 }
 0x367   : > { %5173 = vmatpush1.bf16.msra.mxu1 %v8004_v54  ;;  %v5491_v54 = vrot.slane %v5489_v14, 1 }
 0x368   : > { %5174 = vmatprep.subr.bf16.mxu1 %v8010_v60  ;;  %v7028_v60 = vcombine.low %v5401_v44, %v5378_v12  ;;  %v3824_v12 = vld [vmem:[#allocation2 + $0x30] sm:$0xf]  ;;  %v5613_v44 = vrot.slane %v8145_v55, 1 }
 0x36a   : > { %4890 = vmatmul.mubr.bf16.gmra.mrb[24].mxu1 %v9680_v23  ;;  %v8015_v23 = vld [vmem:[#allocation3 + $0xe0] ss:$8 sps:$4 sm:$0xff]  }
 0x36b   : > { %5175 = vmatpush1.bf16.msra.mxu1 %v8008_v46  ;;  %4899 = vmatprep.mubr.bf16.mxu1 %v10198_v20  ;;  %v9818_v46 = vcombine.low %v3822_v5, %v9804_v50  ;;  %v3965_v5 = vshll.u32 %v9826_v22, 16 }
 0x36c   : > { %5176 = vmatprep.subr.bf16.mxu1 %v8013_v4  ;;  %v5610_v4 = vrot.slane %v8142_v1, 1  ;;  %v5402_v1 = vld [vmem:[#allocation2 + $0x24] sm:$0xe] }
 0x36d   : > { %v3960_v34 = vshll.u32 %v9818_v46, 16  ;;  %v7029_v31 = vcombine.low %v5402_v1, %v5380_v6  ;;  %v3958_v57 = vshrl.u32 %v9818_v46, 16 }
 0x36f   : > { %5177 = vmatpush1.bf16.msra.mxu1 %v8011_v32  ;;  %v3950_v32 = vrot.slane %v3948_v47, 1  ;;  %v5612_v14 = vrot.slane %v7029_v31, 1 }
 0x370   : > { %5178 = vmatprep.subr.bf16.mxu1 %v8017_v30  ;;  %v5609_v30 = vrot.slane %v7028_v60, 1  ;;  %v8040_v60 = vld [vmem:[#allocation3 + $0x134] ss:$8 sps:$4 sm:$0xff]  }
 0x371   : > { %v5614_v6 = vsel %vm4049_vm1, %v5612_v14, %v5613_v44 }
 0x372   : > { %4900 = vmatmul.mubr.bf16.gmra.mrb[28].mxu1 %v9685_v29  ;;  %v5482_v29 = vshrl.u32 %v9797_v19, 16 }
 0x373   : > { %5179 = vmatpush1.bf16.msra.mxu1 %v8015_v23  ;;  %5182 = vmatprep.mubr.bf16.mxu1 %v3932_v51  ;;  %v5611_v23 = vsel %vm4049_vm1, %v5609_v30, %v5610_v4  ;;  %v3951_v51 = vor.u32 %v3950_v32, %v3946_v18  ;;  %v5382_v18 = vld [vmem:[#allocation2 + $0x34] sm:$0xf]  ;;  %v8038_v4 = vld [vmem:[#allocation3 + $0x130] ss:$8 sps:$4 sm:$0xff]  }
 0x374   : > { %5180 = vmatprep.subr.bf16.mxu1 %v8020_v26  ;;  %v5487_v9 = vor.u32 %v5486_v37, %v5482_v29  ;;  %v5494_v26 = vshrl.u32 %v9824_v35, 16  ;;  %6076 = vmatmul.mubr.bf16.vlgmr.msra.gmra.mrb[20].mxu0 %v5611_v23  ;;  %v3826_v23 = vld [vmem:[#allocation2 + $0x3c] sm:$0xf] }
 0x375   : > { %6085 = vmatprep.mubr.bf16.mxu0 %v10198_v20 }
 0x376   : > { %v9822_v49 = vsel %vm3920_vm0, %v5487_v9, %v5491_v54  ;;  %v3956_v9 = vsel %vm3920_vm0, %v3951_v51, %v3955_v25  ;;  %v3962_v54 = vrot.slane %v3960_v34, 1  ;;  %v8045_v25 = vld [vmem:[#allocation3 + $0x144] ss:$8 sps:$4 sm:$0xff]  }
 0x377   : > { %5181 = vmatpush1.bf16.msra.mxu1 %v8018_v0  ;;  %v9833_v0 = vld [vmem:[#allocation2 + $0x34] sm:$0xf] }
 0x378   : > { %5263 = vmatprep.subr.bf16.mxu1 %v8025_v43  ;;  %v5501_v43 = vshll.u32 %v8145_v55, 16  ;;  %v9839_v37 = vcombine.low %v3824_v12, %v9833_v0  ;;  %v9854_v55 = vld [vmem:[#allocation2 + $0x40] sm:$0xf] }
 0x379   : > { %v9860_v1 = vcombine.low %v3826_v23, %v9854_v55  ;;  %v9875_v23 = vld [vmem:[#allocation2 + $0x4c] sm:$0xf] }
 0x37a   : > { %5183 = vmatmul.mubr.bf16.vlgmr.msra.gmra.mrb[0].mxu1 %v9751_v27  ;;  %v5498_v27 = vrot.slane %v5496_v38, 1  ;;  %v5503_v29 = vrot.slane %v5501_v43, 1  ;;  %v3963_v38 = vor.u32 %v3962_v54, %v3958_v57  ;;  %v8043_v43 = vld [vmem:[#allocation3 + $0x140] ss:$8 sps:$4 sm:$0xff]  }
 0x37b   : > { %5264 = vmatpush1.bf16.msra.mxu1 %v8023_v58  ;;  %5192 = vmatprep.mubr.bf16.mxu1 %v3944_v59  ;;  %v5381_v58 = vld [vmem:[#allocation2 + $0x30] sm:$0xf] }
 0x37c   : > { %5265 = vmatprep.subr.bf16.mxu1 %v8030_v8  ;;  %v5499_v47 = vor.u32 %v5498_v27, %v5494_v26  ;;  %v9845_v28 = vcombine.low %v5381_v58, %v5382_v18  ;;  %v8148_v8 = vld [vmem:[#allocation2 + $0x38] ss:$0 sps:$4 sm:$0x11]   ;;  %6086 = vmatmul.mubr.bf16.gmra.mrb[24].mxu0 %v5614_v6  ;;  %v3977_v26 = vshll.u32 %v9847_v10, 16  ;;  %v3970_v27 = vshrl.u32 %v9839_v37, 16 }
 0x37d   : > { %v5513_v12 = vshll.u32 %v8148_v8, 16  ;;  %6095 = vmatprep.mubr.bf16.mxu0 %v10198_v20  ;;  %v8050_v58 = vld [vmem:[#allocation3 + $0x154] ss:$8 sps:$4 sm:$0xff]  }
 0x37e   : > { %v9843_v59 = vsel %vm3920_vm0, %v5499_v47, %v5503_v29  ;;  %v5506_v32 = vshrl.u32 %v9845_v28, 16  ;;  %v5508_v30 = vshll.u32 %v9845_v28, 16  ;;  %v5383_v47 = vld [vmem:[#allocation2 + $0x3c] sm:$0xf]  ;;  %v5384_v29 = vld [vmem:[#allocation2 + $0x40] sm:$0xf] }
 0x37f   : > { %5266 = vmatpush1.bf16.msra.mxu1 %v8028_v62  ;;  %v3967_v62 = vrot.slane %v3965_v5, 1  ;;  %v5616_v5 = vrot.slane %v8148_v8, 1  ;;  %v3979_v54 = vrot.slane %v3977_v26, 1  ;;  %v8151_v8 = vld [vmem:[#allocation2 + $0x44] ss:$0 sps:$4 sm:$0x11]  }
 0x380   : > { %5267 = vmatprep.subr.bf16.mxu1 %v8035_v45  ;;  %v3972_v45 = vshll.u32 %v9839_v37, 16  ;;  %v5510_v34 = vrot.slane %v5508_v30, 1 }
 0x381   : > { %v3968_v14 = vsel %vm3920_vm0, %v3963_v38, %v3967_v62  ;;  %v8048_v62 = vld [vmem:[#allocation3 + $0x150] ss:$8 sps:$4 sm:$0xff]  }
 0x382   : > { %5193 = vmatmul.mubr.bf16.gmra.mrb[4].mxu1 %v9769_v24  ;;  %v5403_v24 = vld [vmem:[#allocation2 + $0x30] sm:$0xe]  ;;  %v5511_v31 = vor.u32 %v5510_v34, %v5506_v32  ;;  %v3974_v44 = vrot.slane %v3972_v45, 1  ;;  %v3828_v45 = vld [vmem:[#allocation2 + $0x48] sm:$0xf] }
 0x383   : > { %5202 = vmatprep.mubr.bf16.mxu1 %v3956_v9  ;;  %5268 = vmatpush1.bf16.msra.mxu1 %v8033_v13  ;;  %v7030_v51 = vcombine.low %v5403_v24, %v5382_v18  ;;  %v5515_v13 = vrot.slane %v5513_v12, 1  ;;  %v9866_v9 = vcombine.low %v5383_v47, %v5384_v29  ;;  %v5525_v12 = vshll.u32 %v8151_v8, 16 }
 0x384   : > { %5269 = vmatprep.subr.bf16.mxu1 %v8040_v60  ;;  %v9868_v60 = vld [vmem:[#allocation2 + $0x44] ss:$0 sps:$4 sm:$0x11]   ;;  %v3975_v38 = vor.u32 %v3974_v44, %v3970_v27  ;;  %v3982_v24 = vshrl.u32 %v9860_v1, 16  ;;  %v6874_v27 = vcombine.low %v3828_v45, %v9875_v23  ;;  %v5619_v47 = vrot.slane %v8151_v8, 1 }
 0x385   : > { %v5615_v57 = vrot.slane %v7030_v51, 1  ;;  %v9864_v18 = vsel %vm3920_vm0, %v5511_v31, %v5515_v13  ;;  %v5518_v32 = vshrl.u32 %v9866_v9, 16  ;;  %v5520_v30 = vshll.u32 %v9866_v9, 16  ;;  %v5386_v44 = vld [vmem:[#allocation2 + $0x4c] sm:$0xf] }
 0x386   : > { %v3989_v31 = vshll.u32 %v9868_v60, 16 }
 0x387   : > { %5270 = vmatpush1.bf16.msra.mxu1 %v8038_v4  ;;  %v5617_v6 = vsel %vm4049_vm1, %v5615_v57, %v5616_v5  ;;  %v3984_v4 = vshll.u32 %v9860_v1, 16  ;;  %v5522_v34 = vrot.slane %v5520_v30, 1  ;;  %v5527_v57 = vrot.slane %v5525_v12, 1  ;;  %v8064_v12 = vld [vmem:[#allocation3 + $0x304] ss:$8 sps:$4 sm:$0xff]  }
 0x388   : > { %5271 = vmatprep.subr.bf16.mxu1 %v8045_v25  ;;  %v8055_v25 = vld [vmem:[#allocation3 + $0x164] ss:$8 sps:$4 sm:$0xff]   ;;  %6096 = vmatmul.mubr.bf16.gmra.mrb[28].mxu0 %v5617_v6  ;;  %v8060_v6 = vld [vmem:[#allocation3 + $0x174] ss:$8 sps:$4 sm:$0xff]  }
 0x389   : > { %6105 = vmatprep.mubr.bf16.mxu0 %v10198_v20  ;;  %v3986_v51 = vrot.slane %v3984_v4, 1  ;;  %v5523_v13 = vor.u32 %v5522_v34, %v5518_v32  ;;  %v3991_v32 = vrot.slane %v3989_v31, 1  ;;  %v9893_v31 = vld [vmem:[#allocation2 + $0x58] sm:$0xf] }
 0x38a   : > { %5203 = vmatmul.mubr.bf16.gmra.mrb[8].mxu1 %v9792_v41  ;;  %v5404_v41 = vld [vmem:[#allocation2 + $0x3c] sm:$0xe] }
 0x38b   : > { %5212 = vmatprep.mubr.bf16.mxu1 %v3968_v14  ;;  %5272 = vmatpush1.bf16.msra.mxu1 %v8043_v43  ;;  %v7031_v26 = vcombine.low %v5404_v41, %v5384_v29  ;;  %v8053_v43 = vld [vmem:[#allocation3 + $0x160] ss:$8 sps:$4 sm:$0xff]   ;;  %v5385_v14 = vld [vmem:[#allocation2 + $0x48] sm:$0xf]  ;;  %v9883_v30 = vsel %vm3920_vm0, %v5523_v13, %v5527_v57  ;;  %v3987_v34 = vor.u32 %v3986_v51, %v3982_v24  ;;  %v3994_v51 = vshrl.u32 %v6874_v27, 16 }
 0x38c   : > { %5273 = vmatprep.subr.bf16.mxu1 %v8050_v58  ;;  %v3980_v58 = vsel %vm3920_vm0, %v3975_v38, %v3979_v54  ;;  %v9885_v29 = vcombine.low %v5385_v14, %v5386_v44  ;;  %v9891_v54 = vld [vmem:[#allocation2 + $0x50] ss:$0 sps:$4 sm:$0x11]   ;;  %v3996_v38 = vshll.u32 %v6874_v27, 16  ;;  %v5405_v13 = vld [vmem:[#allocation2 + $0x48] sm:$0xe] }
 0x38d   : > { %v5618_v5 = vrot.slane %v7031_v26, 1  ;;  %v7032_v57 = vcombine.low %v5405_v13, %v5386_v44  ;;  %v3992_v24 = vsel %vm3920_vm0, %v3987_v34, %v3991_v32  ;;  %v10227_v13 = vmov 0  }
 0x38e   : > { %v5530_v45 = vshrl.u32 %v9885_v29, 16  ;;  %v5532_v8 = vshll.u32 %v9885_v29, 16 }
 0x38f   : > { %5274 = vmatpush1.bf16.msra.mxu1 %v8048_v62  ;;  %v5620_v4 = vsel %vm4049_vm1, %v5618_v5, %v5619_v47  ;;  %v8154_v62 = vld [vmem:[#allocation2 + $0x50] ss:$0 sps:$4 sm:$0x11]  }
 0x390   : > { %5275 = vmatprep.subr.bf16.mxu1 %v8055_v25  ;;  %v8058_v25 = vld [vmem:[#allocation3 + $0x170] ss:$8 sps:$4 sm:$0xff]   ;;  %6106 = vmatmul.mubr.bf16.gmra.mrb[32].mxu0 %v5620_v4  ;;  %v5534_v41 = vrot.slane %v5532_v8, 1  ;;  %v5537_v26 = vshll.u32 %v8154_v62, 16  ;;  %v5622_v14 = vrot.slane %v8154_v62, 1 }
 0x391   : > { %6115 = vmatprep.mubr.bf16.mxu0 %v10198_v20 }
 0x392   : > { %5213 = vmatmul.mubr.bf16.gmra.mrb[12].mxu1 %v9818_v46  ;;  %v3830_v46 = vld [vmem:[#allocation2 + $0x54] sm:$0xf]  ;;  %v5535_v5 = vor.u32 %v5534_v41, %v5530_v45  ;;  %v5539_v47 = vrot.slane %v5537_v26, 1  ;;  %v9904_v45 = vld [vmem:[#allocation2 + $0x5c] ss:$0 sps:$4 sm:$0x11]  }
 0x393   : > { %5222 = vmatprep.mubr.bf16.mxu1 %v3980_v58  ;;  %5276 = vmatpush1.bf16.msra.mxu1 %v8053_v43  ;;  %v5621_v43 = vrot.slane %v7032_v57, 1  ;;  %v3998_v58 = vrot.slane %v3996_v38, 1  ;;  %v6875_v4 = vcombine.low %v3830_v46, %v9893_v31  ;;  %v8062_v46 = vld [vmem:[#allocation3 + $0x300] ss:$8 sps:$4 sm:$0xff]   ;;  %v8065_v57 = vld [vmem:[#allocation3 + $0x310] ss:$8 sps:$4 sm:$0xff]  }
 0x394   : > { %5277 = vmatprep.subr.bf16.mxu1 %v8060_v6  ;;  %v4001_v6 = vshll.u32 %v9891_v54, 16  ;;  %v9900_v8 = vsel %vm3920_vm0, %v5535_v5, %v5539_v47  ;;  %v8069_v5 = vld [vmem:[#allocation3 + $0x320] ss:$8 sps:$4 sm:$0xff]   ;;  %v8074_v47 = vld [vmem:[#allocation3 + $0x334] ss:$8 sps:$4 sm:$0xff]  }
 0x395   : > { %v5623_v20 = vsel %vm4049_vm1, %v5621_v43, %v5622_v14  ;;  %v3999_v44 = vor.u32 %v3998_v58, %v3994_v51  ;;  %v4008_v34 = vshll.u32 %v6875_v4, 16  ;;  %v4006_v38 = vshrl.u32 %v6875_v4, 16  ;;  %v3843_v51 = vld [vmem:[#allocation2 + $0x24] sm:$0xe]  ;;  %v8081_v14 = vld [vmem:[#allocation3 + $0x354] ss:$8 sps:$4 sm:$0xff]  }
 0x396   : > { %v4003_v32 = vrot.slane %v4001_v6, 1  ;;  %v6887_v43 = vcombine.low %v3843_v51, %v9804_v50  ;;  %v8079_v58 = vld [vmem:[#allocation3 + $0x350] ss:$8 sps:$4 sm:$0xff]   ;;  %v4060_v6 = vrot.slane %v9826_v22, 1  ;;  %v8092_v22 = vld [vmem:[#allocation3 + $0x384] ss:$8 sps:$4 sm:$0xff]  }
 0x397   : > { %5278 = vmatpush1.bf16.msra.mxu1 %v8058_v25  ;;  %v4010_v25 = vrot.slane %v4008_v34, 1  ;;  %v8083_v34 = vld [vmem:[#allocation3 + $0x360] ss:$8 sps:$4 sm:$0xff]  }
 0x398   : > { %5930 = vmatprep.subr.bf16.mxu1 %v8064_v12  ;;  %6116 = vmatmul.mubr.bf16.gmra.mrb[36].mxu0 %v5623_v20  ;;  %v4004_v62 = vsel %vm3920_vm0, %v3999_v44, %v4003_v32  ;;  %v4013_v12 = vshll.u32 %v9904_v45, 16  ;;  %v8067_v20 = vld [vmem:[#allocation3 + $0x314] ss:$8 sps:$4 sm:$0xff]   ;;  %v3844_v44 = vld [vmem:[#allocation2 + $0x30] sm:$0xe] }
 0x399   : > { %v4011_v41 = vor.u32 %v4010_v25, %v4006_v38  ;;  %v6888_v50 = vcombine.low %v3844_v44, %v9833_v0  ;;  %v4063_v25 = vrot.slane %v9847_v10, 1  ;;  %v8098_v0 = vld [vmem:[#allocation3 + $0x394] ss:$8 sps:$4 sm:$0xff]   ;;  %v8105_v10 = vld [vmem:[#allocation3 + $0x3a4] ss:$8 sps:$4 sm:$0xff]   ;;  %v4072_v44 = vrot.slane %v9904_v45, 1 }
 0x39a   : > { %5223 = vmatmul.mubr.bf16.gmra.mrb[16].mxu1 %v9839_v37  ;;  %v4015_v26 = vrot.slane %v4013_v12, 1  ;;  %v3845_v12 = vld [vmem:[#allocation2 + $0x3c] sm:$0xe] }
 0x39b   : > { %5232 = vmatprep.mubr.bf16.mxu1 %v3992_v24  ;;  %v8078_v24 = vld [vmem:[#allocation3 + $0x344] ss:$8 sps:$4 sm:$0xff]   ;;  %v4062_v38 = vrot.slane %v6888_v50, 1  ;;  %v8137_v50 = vld [vmem:[#allocation3 + $0x3f4] ss:$8 sps:$4 sm:$0xff]  }
 0x39c   : > { %v4016_v37 = vsel %vm3920_vm0, %v4011_v41, %v4015_v26  ;;  %v8090_v26 = vld [vmem:[#allocation3 + $0x380] ss:$8 sps:$4 sm:$0xff]  }
 0x39d   : > { %v4064_v41 = vsel %vm4049_vm1, %v4062_v38, %v4063_v25 }
 0x3a2   : > { %5233 = vmatmul.mubr.bf16.gmra.mrb[20].mxu1 %v9860_v1  ;;  %v8071_v1 = vld [vmem:[#allocation3 + $0x324] ss:$8 sps:$4 sm:$0xff]  }
 0x3a3   : > { %5242 = vmatprep.mubr.bf16.mxu1 %v4004_v62  ;;  %v8088_v62 = vld [vmem:[#allocation3 + $0x374] ss:$8 sps:$4 sm:$0xff]  }
 0x3aa   : > { %5243 = vmatmul.mubr.bf16.gmra.mrb[24].mxu1 %v6874_v27  ;;  %v8072_v27 = vld [vmem:[#allocation3 + $0x330] ss:$8 sps:$4 sm:$0xff]  }
 0x3ab   : > { %5252 = vmatprep.mubr.bf16.mxu1 %v4016_v37  ;;  %v6889_v37 = vcombine.low %v3845_v12, %v9854_v55  ;;  %v8111_v55 = vld [vmem:[#allocation3 + $0x3b4] ss:$8 sps:$4 sm:$0xff]  }
 0x3b2   : > { %5253 = vmatmul.mubr.bf16.gmra.mrb[28].mxu1 %v6875_v4  ;;  %v8085_v4 = vld [vmem:[#allocation3 + $0x364] ss:$8 sps:$4 sm:$0xff]  }
 0x3b3   : > { %5295 = vmatprep.mubr.bf16.mxu1 %v10227_v13 }
 0x3ba   : > { %5296 = vmatmul.mubr.bf16.vlgmr.msra.gmra.mrb[0].mxu1 %v9709_v63  ;;  %v8076_v63 = vld [vmem:[#allocation3 + $0x340] ss:$8 sps:$4 sm:$0xff]  }
 0x3bb   : > { %5931 = vmatpush1.bf16.msra.mxu1 %v8062_v46  ;;  %5305 = vmatprep.mubr.bf16.mxu1 %v10227_v13  ;;  %v8096_v46 = vld [vmem:[#allocation3 + $0x390] ss:$8 sps:$4 sm:$0xff]  }
 0x3bc   : > { %5932 = vmatprep.subr.bf16.mxu1 %v8067_v20  ;;  %v4065_v20 = vrot.slane %v6889_v37, 1 }
 0x3bf   : > { %5933 = vmatpush1.bf16.msra.mxu1 %v8065_v57  ;;  %v4066_v57 = vrot.slane %v9868_v60, 1  ;;  %v8118_v60 = vld [vmem:[#allocation3 + $0x3c4] ss:$8 sps:$4 sm:$0xff]  }
 0x3c0   : > { %5934 = vmatprep.subr.bf16.mxu1 %v8071_v1  ;;  %v3846_v1 = vld [vmem:[#allocation2 + $0x48] sm:$0xe] }
 0x3c2   : > { %5306 = vmatmul.mubr.bf16.gmra.mrb[4].mxu1 %v9720_v11  ;;  %v4059_v11 = vrot.slane %v6887_v43, 1  ;;  %v3847_v43 = vld [vmem:[#allocation2 + $0x54] sm:$0xe] }
 0x3c3   : > { %5935 = vmatpush1.bf16.msra.mxu1 %v8069_v5  ;;  %5315 = vmatprep.mubr.bf16.mxu1 %v10227_v13  ;;  %v4067_v5 = vsel %vm4049_vm1, %v4065_v20, %v4066_v57 }
 0x3c4   : > { %5936 = vmatprep.subr.bf16.mxu1 %v8074_v47  ;;  %v4061_v32 = vsel %vm4049_vm1, %v4059_v11, %v4060_v6  ;;  %v8103_v47 = vld [vmem:[#allocation3 + $0x3a0] ss:$8 sps:$4 sm:$0xff]   ;;  %v6891_v11 = vcombine.low %v3847_v43, %v9893_v31  ;;  %v8122_v6 = vld [vmem:[#allocation3 + $0x3d0] ss:$8 sps:$4 sm:$0xff]  }
 0x3c5   : > { %v8135_v31 = vld [vmem:[#allocation3 + $0x3f0] ss:$8 sps:$4 sm:$0xff]  }
 0x3c7   : > { %5937 = vmatpush1.bf16.msra.mxu1 %v8072_v27  ;;  %v6890_v27 = vcombine.low %v3846_v1, %v9875_v23  ;;  %v8124_v23 = vld [vmem:[#allocation3 + $0x3d4] ss:$8 sps:$4 sm:$0xff]  }
 0x3c8   : > { %5938 = vmatprep.subr.bf16.mxu1 %v8078_v24  ;;  %v8109_v24 = vld [vmem:[#allocation3 + $0x3b0] ss:$8 sps:$4 sm:$0xff]  }
 0x3c9   : > { %v4068_v51 = vrot.slane %v6890_v27, 1 }
 0x3ca   : > { %5316 = vmatmul.mubr.bf16.gmra.mrb[8].mxu1 %v9731_v61  ;;  %v8086_v61 = vld [vmem:[#allocation3 + $0x370] ss:$8 sps:$4 sm:$0xff]  }
 0x3cb   : > { %5939 = vmatpush1.bf16.msra.mxu1 %v8076_v63  ;;  %5325 = vmatprep.mubr.bf16.mxu1 %v10227_v13  ;;  %v4069_v63 = vrot.slane %v9891_v54, 1  ;;  %v8131_v54 = vld [vmem:[#allocation3 + $0x3e4] ss:$8 sps:$4 sm:$0xff]  }
 0x3cc   : > { %5940 = vmatprep.subr.bf16.mxu1 %v8081_v14 }
 0x3cd   : > { %v4070_v14 = vsel %vm4049_vm1, %v4068_v51, %v4069_v63 }
 0x3cf   : > { %5941 = vmatpush1.bf16.msra.mxu1 %v8079_v58  ;;  %v8116_v58 = vld [vmem:[#allocation3 + $0x3c0] ss:$8 sps:$4 sm:$0xff]  }
 0x3d0   : > { %5942 = vmatprep.subr.bf16.mxu1 %v8085_v4  ;;  %v4071_v4 = vrot.slane %v6891_v11, 1 }
 0x3d2   : > { %5326 = vmatmul.mubr.bf16.gmra.mrb[12].mxu1 %v4061_v32  ;;  %v4073_v32 = vsel %vm4049_vm1, %v4071_v4, %v4072_v44 }
 0x3d3   : > { %5943 = vmatpush1.bf16.msra.mxu1 %v8083_v34  ;;  %5335 = vmatprep.mubr.bf16.mxu1 %v10227_v13  ;;  %v8129_v34 = vld [vmem:[#allocation3 + $0x3e0] ss:$8 sps:$4 sm:$0xff]  }
 0x3d4   : > { %5944 = vmatprep.subr.bf16.mxu1 %v8088_v62 }
 0x3d7   : > { %5945 = vmatpush1.bf16.msra.mxu1 %v8086_v61 }
 0x3d8   : > { %5946 = vmatprep.subr.bf16.mxu1 %v8092_v22 }
 0x3da   : > { %5336 = vmatmul.mubr.bf16.gmra.mrb[16].mxu1 %v4064_v41 }
 0x3db   : > { %5947 = vmatpush1.bf16.msra.mxu1 %v8090_v26  ;;  %5345 = vmatprep.mubr.bf16.mxu1 %v10227_v13  ;;  %v5406_v26 = vld [vmem:[#allocation2 + $0x54] sm:$0xe] }
 0x3dc   : > { %5948 = vmatprep.subr.bf16.mxu1 %v8098_v0 }
 0x3df   : > { %5949 = vmatpush1.bf16.msra.mxu1 %v8096_v46  ;;  %v5407_v46 = vld [vmem:[#allocation2 + $0x60] sm:$0xe] }
 0x3e0   : > { %5950 = vmatprep.subr.bf16.mxu1 %v8105_v10 }
 0x3e2   : > { %5346 = vmatmul.mubr.bf16.gmra.mrb[20].mxu1 %v4067_v5  ;;  %v5408_v5 = vld [vmem:[#allocation2 + $0x6c] sm:$0xe] }
 0x3e3   : > { %5951 = vmatpush1.bf16.msra.mxu1 %v8103_v47  ;;  %5355 = vmatprep.mubr.bf16.mxu1 %v10227_v13 }
 0x3e4   : > { %5952 = vmatprep.subr.bf16.mxu1 %v8111_v55 }
 0x3e7   : > { %5953 = vmatpush1.bf16.msra.mxu1 %v8109_v24 }
 0x3e8   : > { %5954 = vmatprep.subr.bf16.mxu1 %v8118_v60 }
 0x3ea   : > { %5356 = vmatmul.mubr.bf16.gmra.mrb[24].mxu1 %v4070_v14 }
 0x3eb   : > { %5955 = vmatpush1.bf16.msra.mxu1 %v8116_v58  ;;  %5365 = vmatprep.mubr.bf16.mxu1 %v10227_v13 }
 0x3ec   : > { %5956 = vmatprep.subr.bf16.mxu1 %v8124_v23 }
 0x3ef   : > { %5957 = vmatpush1.bf16.msra.mxu1 %v8122_v6 }
 0x3f0   : > { %5958 = vmatprep.subr.bf16.mxu1 %v8131_v54 }
 0x3f2   : > { %5366 = vmatmul.mubr.bf16.gmra.mrb[28].mxu1 %v4073_v32 }
 0x3f3   : > { %5959 = vmatpush1.bf16.msra.mxu1 %v8129_v34  ;;  %5962 = vmatprep.mubr.bf16.mxu1 %v9822_v49 }
 0x3f4   : > { %5960 = vmatprep.subr.bf16.mxu1 %v8137_v50 }
 0x3f7   : > { %5961 = vmatpush1.bf16.msra.mxu1 %v8135_v31 }
 0x3f8   : > { %7412 = vmatprep.subr.bf16.mxu1 %v9737_v52  ;;  %v5387_v52 = vld [vmem:[#allocation2 + $0x54] sm:$0xf] }
 0x3fa   : > { %5963 = vmatmul.mubr.bf16.vlgmr.msra.gmra.mrb[0].mxu1 %v9797_v19  ;;  %v5388_v19 = vld [vmem:[#allocation2 + $0x58] sm:$0xf] }
 0x3fb   : > { %7420 = vmatpush1.bf16.msra.mxu1 %v9739_v33  ;;  %5972 = vmatprep.mubr.bf16.mxu1 %v9843_v59  ;;  %v7017_v33 = vcombine.low %v5387_v52, %v5388_v19  ;;  %v8159_v59 = vld [vmem:[#allocation2 + $0x68] ss:$0 sps:$4 sm:$0x11]  }
 0x3fc   : > { %7413 = vmatprep.subr.bf16.mxu1 %v9745_v53  ;;  %v8157_v53 = vld [vmem:[#allocation2 + $0x5c] ss:$0 sps:$4 sm:$0x11]   ;;  %v5561_v45 = vshll.u32 %v8159_v59, 16  ;;  %v5628_v1 = vrot.slane %v8159_v59, 1 }
 0x3fd   : > { %v5625_v0 = vrot.slane %v8157_v53, 1  ;;  %v10005_v59 = vld [vmem:[%s8473_s26 + $0x1] ss:$0 sm:$0xff] }
 0x3fe   : > { %v5563_v62 = vrot.slane %v5561_v45, 1 }
 0x3ff   : > { %7421 = vmatpush1.bf16.msra.mxu1 %v9747_v56  ;;  %v5544_v56 = vshll.u32 %v7017_v33, 16 }
 0x400   : > { %7414 = vmatprep.subr.bf16.mxu1 %v9754_v36  ;;  %v5389_v36 = vld [vmem:[#allocation2 + $0x60] sm:$0xf] }
 0x401   : > { %v5546_v49 = vrot.slane %v5544_v56, 1  ;;  %v6190_v56 = vlaneseq }
 0x402   : > { %5973 = vmatmul.mubr.bf16.gmra.mrb[4].mxu1 %v9824_v35  ;;  %v5549_v35 = vshll.u32 %v8157_v53, 16 }
 0x403   : > { %5982 = vmatprep.mubr.bf16.mxu1 %v9864_v18  ;;  %7422 = vmatpush1.bf16.msra.mxu1 %v9756_v16  ;;  %v5390_v16 = vld [vmem:[#allocation2 + $0x64] sm:$0xf]  ;;  %v5392_v18 = vld [vmem:[#allocation2 + $0x70] sm:$0xf] }
 0x404   : > { %7415 = vmatprep.subr.bf16.mxu1 %v9763_v21  ;;  %v5542_v21 = vshrl.u32 %v7017_v33, 16  ;;  %v7034_v57 = vcombine.low %v5407_v46, %v5390_v16  ;;  %v7035_v27 = vcombine.low %v5408_v5, %v5392_v18 }
 0x406   : > { %v5627_v10 = vrot.slane %v7034_v57, 1  ;;  %v5630_v55 = vrot.slane %v7035_v27, 1 }
 0x407   : > { %7423 = vmatpush1.bf16.msra.mxu1 %v9765_v15  ;;  %v7018_v15 = vcombine.low %v5389_v36, %v5390_v16  ;;  %v6191_v36 = vshrl.u32 %v6190_v56, 7  ;;  %v6232_v16 = vld [vmem:[%s8478_s5] sm:$0xff]  ;;  %v6237_v56 = vld [vmem:[%s8478_s5 + $0x28] sm:$0xff] }
 0x408   : > { %7416 = vmatprep.subr.bf16.mxu1 %v9774_v2  ;;  %v5547_v2 = vor.u32 %v5546_v49, %v5542_v21  ;;  %v5629_v47 = vsel %vm4049_vm1, %v5627_v10, %v5628_v1  ;;  %v9997_v21 = vld [vmem:[%s8473_s26] ss:$0 sm:$0xff]  ;;  %s7114_s26 = sshll.u32 %s8275_s27, 4 }
 0x409   : > { %v6192_v49 = vsub.s32 0, %v6191_v36 }
 0x40a   : > { %5983 = vmatmul.mubr.bf16.gmra.mrb[8].mxu1 %v9845_v28  ;;  %v5391_v28 = vld [vmem:[#allocation2 + $0x6c] sm:$0xf] }
 0x40b   : > { %5992 = vmatprep.mubr.bf16.mxu1 %v9883_v30  ;;  %7424 = vmatpush1.bf16.msra.mxu1 %v9776_v39  ;;  %v5551_v39 = vrot.slane %v5549_v35, 1  ;;  %v6188_v35 = vld [vmem:[%s10186_s6] sm:$0x3] }
 0x40c   : > { %7417 = vmatprep.subr.bf16.mxu1 %v9783_v42  ;;  %v5556_v42 = vshll.u32 %v7018_v15, 16 }
 0x40d   : > { %v5552_v30 = vsel %vm3920_vm0, %v5547_v2, %v5551_v39  ;;  %v6233_v2 = vld [vmem:[%s8478_s5 + $0x8] sm:$0xff]  ;;  %v6254_v39 = vsub.f32 %v6232_v16, %v9997_v21 }
 0x40f   : > { %7425 = vmatpush1.bf16.msra.mxu1 %v9785_v3  ;;  %v5554_v3 = vshrl.u32 %v7018_v15, 16 }
 0x410   : > { %7418 = vmatprep.subr.bf16.mxu1 %v9795_v40  ;;  %v5558_v40 = vrot.slane %v5556_v42, 1  ;;  %v10007_v42 = vrot.slane %v6188_v35, %v6192_v49 }
 0x412   : > { %5993 = vmatmul.mubr.bf16.gmra.mrb[12].mxu1 %v9866_v9  ;;  %v7019_v9 = vcombine.low %v5391_v28, %v5392_v18  ;;  %v6255_v28 = vsub.f32 %v6233_v2, %v9997_v21 }
 0x413   : > { %6002 = vmatprep.mubr.bf16.mxu1 %v9900_v8  ;;  %7426 = vmatpush1.bf16.msra.mxu1 %v9799_v48  ;;  %v5559_v8 = vor.u32 %v5558_v40, %v5554_v3  ;;  %v8161_v48 = vld [vmem:[#allocation2 + $0x74] ss:$0 sps:$4 sm:$0x11]   ;;  %v6274_v40 = vmul.f32 %v10005_v59, %v6254_v39 }
 0x414   : > { %7419 = vmatprep.subr.bf16.mxu1 %v9808_v7  ;;  %v5568_v61 = vshll.u32 %v7019_v9, 16  ;;  %v5566_v7 = vshrl.u32 %v7019_v9, 16  ;;  %v5573_v22 = vshll.u32 %v8161_v48, 16  ;;  %v5631_v24 = vrot.slane %v8161_v48, 1 }
 0x415   : > { %v5564_v38 = vsel %vm3920_vm0, %v5559_v8, %v5563_v62  ;;  %v6234_v62 = vld [vmem:[%s8478_s5 + $0x10] sm:$0xff] }
 0x416   : > { %v5570_v25 = vrot.slane %v5568_v61, 1  ;;  %v5632_v51 = vsel %vm4049_vm1, %v5630_v55, %v5631_v24  ;;  %v6236_v55 = vld [vmem:[%s8478_s5 + $0x20] sm:$0xff] }
 0x417   : > { %7427 = vmatpush1.bf16.msra.mxu1 %v9811_v17  ;;  %v5575_v17 = vrot.slane %v5573_v22, 1 }
 0x418   : > { %v5571_v12 = vor.u32 %v5570_v25, %v5566_v7 }
 0x41a   : > { %6003 = vmatmul.mubr.bf16.gmra.mrb[16].mxu1 %v9885_v29  ;;  %v5576_v41 = vsel %vm3920_vm0, %v5571_v12, %v5575_v17  ;;  %v7033_v29 = vcombine.low %v5406_v26, %v5388_v19  ;;  %v6235_v12 = vld [vmem:[%s8478_s5 + $0x18] sm:$0xff]  ;;  %v6256_v26 = vsub.f32 %v6234_v62, %v9997_v21 }
 0x41b   : > { %6012 = vmatprep.mubr.bf16.mxu1 %v5552_v30  ;;  %v6257_v46 = vsub.f32 %v6235_v12, %v9997_v21 }
 0x41c   : > { %v5624_v37 = vrot.slane %v7033_v29, 1  ;;  %v6276_v1 = vmul.f32 %v10005_v59, %v6256_v26 }
 0x41e   : > { %v5626_v20 = vsel %vm4049_vm1, %v5624_v37, %v5625_v0 }
 0x422   : > { %6013 = vmatmul.mubr.bf16.gmra.mrb[20].mxu1 %v7017_v33 }
 0x423   : > { %6022 = vmatprep.mubr.bf16.mxu1 %v5564_v38  ;;  %v6275_v38 = vmul.f32 %v10005_v59, %v6255_v28 }
 0x42a   : > { %6023 = vmatmul.mubr.bf16.gmra.mrb[24].mxu1 %v7018_v15  ;;  %v6196_v15 = vsub.s32 1, %v6191_v36 }
 0x42b   : > { %6032 = vmatprep.mubr.bf16.mxu1 %v5576_v41 }
 0x42c   : > { %v10010_v30 = vrot.slane %v6188_v35, %v6196_v15 }
 0x432   : > { %6033 = vmatmul.mubr.bf16.gmra.mrb[28].mxu1 %v7019_v9 }
 0x433   : > { %6125 = vmatprep.mubr.bf16.mxu1 %v10227_v13 }
 0x43a   : > { %6126 = vmatmul.mubr.bf16.vlgmr.msra.gmra.mrb[20].mxu1 %v5626_v20 }
 0x43b   : > { %6135 = vmatprep.mubr.bf16.mxu1 %v10227_v13 }
 0x442   : > { %6136 = vmatmul.mubr.bf16.gmra.mrb[24].mxu1 %v5629_v47 }
 0x443   : > { %6145 = vmatprep.mubr.bf16.mxu1 %v10227_v13 }
 0x447   : > { %v6077_v63 = vpop.f32.mrb[20].mxu0 }
 0x448   : > { %v6079_v60 = vpop.f32.mrb[21].mxu0 }
 0x449   : > { %v6081_v43 = vpop.f32.mrb[22].mxu0 }
 0x44a   : > { %6146 = vmatmul.mubr.bf16.gmra.mrb[28].mxu1 %v5632_v51  ;;  %v6083_v14 = vpop.f32.mrb[23].mxu0 }
 0x44f   : > { %v6087_v58 = vpop.f32.mrb[24].mxu0 }
 0x450   : > { %v6089_v11 = vpop.f32.mrb[25].mxu0 }
 0x451   : > { %v6091_v23 = vpop.f32.mrb[26].mxu0 }
 0x452   : > { %v6093_v6 = vpop.f32.mrb[27].mxu0 }
 0x45b   : > { %v9971_v4 = vpop.f32.mrb[28].mxu0 }
 0x45c   : > { %v9973_v44 = vpop.f32.mrb[29].mxu0 }
 0x45d   : > { %v9975_v13 = vpop.f32.mrb[30].mxu0 }
 0x45e   : > { %v9977_v54 = vpop.f32.mrb[31].mxu0 }
 0x463   : > { %v9979_v32 = vpop.f32.mrb[32].mxu0 }
 0x464   : > { %v9981_v34 = vpop.f32.mrb[33].mxu0 }
 0x465   : > { %v9983_v50 = vpop.f32.mrb[34].mxu0 }
 0x466   : > { %v9985_v31 = vpop.f32.mrb[35].mxu0 }
 0x46b   : > { %v9987_v52 = vpop.f32.mrb[36].mxu0 }
 0x46c   : > { %v9989_v19 = vpop.f32.mrb[37].mxu0 }
 0x46d   : > { %v9991_v33 = vpop.f32.mrb[38].mxu0 }
 0x46e   : > { %v9993_v53 = vpop.f32.mrb[39].mxu0 }
 0x4cd   : > { %v5964_v18 = vpop.f32.mrb[0].mxu1 }
 0x4ce   : > { %v6078_v3 = vadd.f32 %v6077_v63, %v5964_v18  ;;  %v5966_v45 = vpop.f32.mrb[1].mxu1  ;;  %v6277_v63 = vmul.f32 %v10005_v59, %v6257_v46  ;;  %v6240_v46 = vld [vmem:[%s8478_s5 + $0x40] sm:$0xff] }
 0x4cf   : > { %v6080_v9 = vadd.f32 %v6079_v60, %v5966_v45  ;;  %v5968_v8 = vpop.f32.mrb[2].mxu1 }
 0x4d0   : > { %v6200_v48 = vadd.f32 %v10007_v42, %v6078_v3  ;;  %v6082_v61 = vadd.f32 %v6081_v43, %v5968_v8  ;;  %v5970_v7 = vpop.f32.mrb[3].mxu1 }
 0x4d1   : > { %v6201_v25 = vadd.f32 %v10010_v30, %v6080_v9  ;;  %v6084_v22 = vadd.f32 %v6083_v14, %v5970_v7 }
 0x4d2   : > { %v6290_v17 = vmul.f32 %v6274_v40, %v6200_v48  ;;  %v6202_v41 = vadd.f32 %v10007_v42, %v6082_v61  ;;  %v6238_v40 = vld [vmem:[%s8478_s5 + $0x30] sm:$0xff]  ;;  %v6239_v61 = vld [vmem:[%s8478_s5 + $0x38] sm:$0xff] }
 0x4d3   : > { %v6203_v29 = vadd.f32 %v10010_v30, %v6084_v22  ;;  %v6260_v7 = vsub.f32 %v6238_v40, %v9997_v21 }
 0x4d4   : > { %v6306_v37 = vadd.f32 %v6290_v17, %v6201_v25  ;;  %v6291_v0 = vmul.f32 %v6275_v38, %v6202_v41 }
 0x4d5   : > { %v5974_v20 = vpop.f32.mrb[4].mxu1  ;;  %v6280_v26 = vmul.f32 %v10005_v59, %v6260_v7 }
 0x4d6   : > { %6322 = vst [vmem:[%s9612_s11] sm:$0xff] %v6306_v37  ;;  %v6307_v57 = vadd.f32 %v6291_v0, %v6203_v29  ;;  %v6088_v10 = vadd.f32 %v6087_v58, %v5974_v20  ;;  %v5976_v5 = vpop.f32.mrb[5].mxu1 }
 0x4d7   : > { %v6090_v47 = vadd.f32 %v6089_v11, %v5976_v5  ;;  %v5978_v27 = vpop.f32.mrb[6].mxu1  ;;  %v6258_v11 = vsub.f32 %v6236_v55, %v9997_v21  ;;  %v6262_v55 = vsub.f32 %v6240_v46, %v9997_v21 }
 0x4d8   : > { %6323 = vst [vmem:[%s9612_s11 + $0x8] sm:$0xff] %v6307_v57  ;;  %v6204_v24 = vadd.f32 %v10007_v42, %v6088_v10  ;;  %v6092_v51 = vadd.f32 %v6091_v23, %v5978_v27  ;;  %v5980_v60 = vpop.f32.mrb[7].mxu1  ;;  %v6259_v23 = vsub.f32 %v6237_v56, %v9997_v21 }
 0x4d9   : > { %v6205_v43 = vadd.f32 %v10010_v30, %v6090_v47  ;;  %v6094_v14 = vadd.f32 %v6093_v6, %v5980_v60  ;;  %v6278_v39 = vmul.f32 %v10005_v59, %v6258_v11  ;;  %v6241_v47 = vld [vmem:[%s8478_s5 + $0x48] sm:$0xff] }
 0x4da   : > { %v6292_v58 = vmul.f32 %v6276_v1, %v6204_v24  ;;  %v6206_v36 = vadd.f32 %v10007_v42, %v6092_v51  ;;  %v6279_v8 = vmul.f32 %v10005_v59, %v6259_v23 }
 0x4db   : > { %v6207_v16 = vadd.f32 %v10010_v30, %v6094_v14 }
 0x4dc   : > { %v6308_v49 = vadd.f32 %v6292_v58, %v6205_v43  ;;  %v6293_v35 = vmul.f32 %v6277_v63, %v6206_v36 }
 0x4dd   : > { %v5984_v15 = vpop.f32.mrb[8].mxu1 }
 0x4de   : > { %6324 = vst [vmem:[%s9612_s11 + $0x10] sm:$0xff] %v6308_v49  ;;  %v6309_v2 = vadd.f32 %v6293_v35, %v6207_v16  ;;  %v6098_v6 = vadd.f32 %v9971_v4, %v5984_v15  ;;  %v5986_v28 = vpop.f32.mrb[9].mxu1 }
 0x4df   : > { %v6100_v18 = vadd.f32 %v9973_v44, %v5986_v28  ;;  %v5988_v3 = vpop.f32.mrb[10].mxu1 }
 0x4e0   : > { %6325 = vst [vmem:[%s9612_s11 + $0x18] sm:$0xff] %v6309_v2  ;;  %v6208_v45 = vadd.f32 %v10007_v42, %v6098_v6  ;;  %v6102_v9 = vadd.f32 %v9975_v13, %v5988_v3  ;;  %v5990_v62 = vpop.f32.mrb[11].mxu1  ;;  %v6261_v13 = vsub.f32 %v6239_v61, %v9997_v21 }
 0x4e1   : > { %v6209_v48 = vadd.f32 %v10010_v30, %v6100_v18  ;;  %v6104_v4 = vadd.f32 %v9977_v54, %v5990_v62  ;;  %v6243_v18 = vld [vmem:[%s8478_s5 + $0x58] sm:$0xff] }
 0x4e2   : > { %v6294_v38 = vmul.f32 %v6278_v39, %v6208_v45  ;;  %v6210_v44 = vadd.f32 %v10007_v42, %v6102_v9  ;;  %v6281_v10 = vmul.f32 %v10005_v59, %v6261_v13  ;;  %v6265_v40 = vsub.f32 %v6243_v18, %v9997_v21  ;;  %v6244_v9 = vld [vmem:[%s8478_s5 + $0x60] sm:$0xff] }
 0x4e3   : > { %v6211_v25 = vadd.f32 %v10010_v30, %v6104_v4 }
 0x4e4   : > { %v6310_v22 = vadd.f32 %v6294_v38, %v6209_v48  ;;  %v6295_v12 = vmul.f32 %v6279_v8, %v6210_v44  ;;  %v6285_v48 = vmul.f32 %v10005_v59, %v6265_v40  ;;  %v6245_v38 = vld [vmem:[%s8478_s5 + $0x68] sm:$0xff] }
 0x4e5   : > { %v5994_v17 = vpop.f32.mrb[12].mxu1 }
 0x4e6   : > { %6326 = vst [vmem:[%s9612_s11 + $0x20] sm:$0xff] %v6310_v22  ;;  %v6311_v41 = vadd.f32 %v6295_v12, %v6211_v25  ;;  %v6108_v54 = vadd.f32 %v9979_v32, %v5994_v17  ;;  %v5996_v29 = vpop.f32.mrb[13].mxu1  ;;  %v6266_v22 = vsub.f32 %v6244_v9, %v9997_v21 }
 0x4e7   : > { %v6110_v37 = vadd.f32 %v9981_v34, %v5996_v29  ;;  %v5998_v0 = vpop.f32.mrb[14].mxu1 }
 0x4e8   : > { %6327 = vst [vmem:[%s9612_s11 + $0x28] sm:$0xff] %v6311_v41  ;;  %v6212_v20 = vadd.f32 %v10007_v42, %v6108_v54  ;;  %v6112_v57 = vadd.f32 %v9983_v50, %v5998_v0  ;;  %v6000_v1 = vpop.f32.mrb[15].mxu1  ;;  %v6263_v50 = vsub.f32 %v6241_v47, %v9997_v21  ;;  %v6267_v41 = vsub.f32 %v6245_v38, %v9997_v21 }
 0x4e9   : > { %v6213_v5 = vadd.f32 %v10010_v30, %v6110_v37  ;;  %v6114_v32 = vadd.f32 %v9985_v31, %v6000_v1  ;;  %v6282_v31 = vmul.f32 %v10005_v59, %v6262_v55  ;;  %v6246_v37 = vld [vmem:[%s8478_s5 + $0x70] sm:$0xff]  ;;  %v6247_v1 = vld [vmem:[%s8478_s5 + $0x78] sm:$0xff] }
 0x4ea   : > { %v6296_v27 = vmul.f32 %v6280_v26, %v6212_v20  ;;  %v6214_v34 = vadd.f32 %v10007_v42, %v6112_v57  ;;  %v6283_v49 = vmul.f32 %v10005_v59, %v6263_v50  ;;  %v6286_v26 = vmul.f32 %v10005_v59, %v6266_v22 }
 0x4eb   : > { %v6215_v24 = vadd.f32 %v10010_v30, %v6114_v32  ;;  %v6287_v20 = vmul.f32 %v10005_v59, %v6267_v41 }
 0x4ec   : > { %v6312_v51 = vadd.f32 %v6296_v27, %v6213_v5  ;;  %v6297_v63 = vmul.f32 %v6281_v10, %v6214_v34  ;;  %v6268_v27 = vsub.f32 %v6246_v37, %v9997_v21 }
 0x4ed   : > { %v6004_v60 = vpop.f32.mrb[16].mxu1 }
 0x4ee   : > { %6328 = vst [vmem:[%s9612_s11 + $0x30] sm:$0xff] %v6312_v51  ;;  %v6313_v43 = vadd.f32 %v6297_v63, %v6215_v24  ;;  %v6118_v14 = vadd.f32 %v9987_v52, %v6004_v60  ;;  %v6006_v56 = vpop.f32.mrb[17].mxu1  ;;  %v6269_v51 = vsub.f32 %v6247_v1, %v9997_v21  ;;  %v6288_v50 = vmul.f32 %v10005_v59, %v6268_v27 }
 0x4ef   : > { %v6120_v58 = vadd.f32 %v9989_v19, %v6006_v56  ;;  %v6008_v36 = vpop.f32.mrb[18].mxu1 }
 0x4f0   : > { %6329 = vst [vmem:[%s9612_s11 + $0x38] sm:$0xff] %v6313_v43  ;;  %v6216_v11 = vadd.f32 %v10007_v42, %v6118_v14  ;;  %v6122_v16 = vadd.f32 %v9991_v33, %v6008_v36  ;;  %v6010_v35 = vpop.f32.mrb[19].mxu1  ;;  %v6242_v33 = vld [vmem:[%s8478_s5 + $0x50] sm:$0xff]  ;;  %s6352_s5 = sadd.s32 %s7114_s26, %s7089_s12 }
 0x4f1   : > { %v6217_v52 = vadd.f32 %v10010_v30, %v6120_v58  ;;  %v6124_v23 = vadd.f32 %v9993_v53, %v6010_v35  ;;  %v6264_v3 = vsub.f32 %v6242_v33, %v9997_v21  ;;  %s7090_s27 = sshll.u32 %s6352_s5, 7 }
 0x4f2   : > { %v6298_v15 = vmul.f32 %v6282_v31, %v6216_v11  ;;  %v6218_v19 = vadd.f32 %v10007_v42, %v6122_v16  ;;  %v6289_v31 = vmul.f32 %v10005_v59, %v6269_v51  ;;  %s10120_s18 = scalar_lea.hbm %s10187_s7, %s7090_s27 }
 0x4f3   : > { %v6219_v2 = vadd.f32 %v10010_v30, %v6124_v23  ;;  %v6284_v45 = vmul.f32 %v10005_v59, %v6264_v3 }
 0x4f4   : > { %v6314_v6 = vadd.f32 %v6298_v15, %v6217_v52  ;;  %v6299_v39 = vmul.f32 %v6283_v49, %v6218_v19 }
 0x4f6   : > { %6330 = vst [vmem:[%s9612_s11 + $0x40] sm:$0xff] %v6314_v6  ;;  %v6315_v28 = vadd.f32 %v6299_v39, %v6219_v2 }
 0x4f8   : > { %6331 = vst [vmem:[%s9612_s11 + $0x48] sm:$0xff] %v6315_v28 }
 0x50d   : > { %v6127_v53 = vpop.f32.mrb[20].mxu1 }
 0x50e   : > { %v6220_v8 = vadd.f32 %v10007_v42, %v6127_v53  ;;  %v6129_v62 = vpop.f32.mrb[21].mxu1 }
 0x50f   : > { %v6221_v4 = vadd.f32 %v10010_v30, %v6129_v62  ;;  %v6131_v61 = vpop.f32.mrb[22].mxu1 }
 0x510   : > { %v6300_v44 = vmul.f32 %v6284_v45, %v6220_v8  ;;  %v6222_v7 = vadd.f32 %v10007_v42, %v6131_v61  ;;  %v6133_v25 = vpop.f32.mrb[23].mxu1 }
 0x511   : > { %v6223_v12 = vadd.f32 %v10010_v30, %v6133_v25 }
 0x512   : > { %v6316_v13 = vadd.f32 %v6300_v44, %v6221_v4  ;;  %v6301_v17 = vmul.f32 %v6285_v48, %v6222_v7 }
 0x514   : > { %6332 = vst [vmem:[%s9612_s11 + $0x50] sm:$0xff] %v6316_v13  ;;  %v6317_v54 = vadd.f32 %v6301_v17, %v6223_v12 }
 0x515   : > { %v6137_v29 = vpop.f32.mrb[24].mxu1 }
 0x516   : > { %6333 = vst [vmem:[%s9612_s11 + $0x58] sm:$0xff] %v6317_v54  ;;  %v6224_v0 = vadd.f32 %v10007_v42, %v6137_v29  ;;  %v6139_v46 = vpop.f32.mrb[25].mxu1 }
 0x517   : > { %v6225_v57 = vadd.f32 %v10010_v30, %v6139_v46  ;;  %v6141_v10 = vpop.f32.mrb[26].mxu1 }
 0x518   : > { %v6302_v5 = vmul.f32 %v6286_v26, %v6224_v0  ;;  %v6226_v32 = vadd.f32 %v10007_v42, %v6141_v10  ;;  %v6143_v47 = vpop.f32.mrb[27].mxu1 }
 0x519   : > { %v6227_v34 = vadd.f32 %v10010_v30, %v6143_v47 }
 0x51a   : > { %v6318_v55 = vadd.f32 %v6302_v5, %v6225_v57  ;;  %v6303_v24 = vmul.f32 %v6287_v20, %v6226_v32 }
 0x51c   : > { %6334 = vst [vmem:[%s9612_s11 + $0x60] sm:$0xff] %v6318_v55  ;;  %v6319_v63 = vadd.f32 %v6303_v24, %v6227_v34 }
 0x51d   : > { %v6147_v60 = vpop.f32.mrb[28].mxu1 }
 0x51e   : > { %6335 = vst [vmem:[%s9612_s11 + $0x68] sm:$0xff] %v6319_v63  ;;  %v6228_v43 = vadd.f32 %v10007_v42, %v6147_v60  ;;  %v6149_v14 = vpop.f32.mrb[29].mxu1 }
 0x51f   : > { %v6229_v21 = vadd.f32 %v10010_v30, %v6149_v14  ;;  %v6151_v56 = vpop.f32.mrb[30].mxu1 }
 0x520   : > { %v6304_v58 = vmul.f32 %v6288_v50, %v6228_v43  ;;  %v6230_v36 = vadd.f32 %v10007_v42, %v6151_v56  ;;  %v6153_v11 = vpop.f32.mrb[31].mxu1 }
 0x521   : > { %v6231_v16 = vadd.f32 %v10010_v30, %v6153_v11 }
 0x522   : > { %v6320_v49 = vadd.f32 %v6304_v58, %v6229_v21  ;;  %v6305_v35 = vmul.f32 %v6289_v31, %v6230_v36 }
 0x524   : > { %6336 = vst [vmem:[%s9612_s11 + $0x70] sm:$0xff] %v6320_v49  ;;  %v6321_v59 = vadd.f32 %v6305_v35, %v6231_v16 }
 0x526   : > { %6337 = vst [vmem:[%s9612_s11 + $0x78] sm:$0xff] %v6321_v59 }
 0x527   : > { %8206 = shalt.err (!%p8203_p13)
}
 0x528   : > { %s8207_s29 = scalar_lea.hbm %s10120_s18, 2048  ;;  %s8211_s9 = scalar_lea.hbm %s10187_s7, 8192 }
 0x529   : > { %p8208_p1 = scmp.ne.s32.totalorder %s10120_s18, %s8207_s29  ;;  %p8212_p8 = scmp.lt.u32.totalorder %s10120_s18, %s10187_s7 }
 0x52a   : > { %p8213_p10 = scmp.lt.u32.totalorder %s8211_s9, %s8207_s29  ;;  %p8215_p0 = scmp.lt.u32.totalorder %s8207_s29, %s10120_s18 }
 0x52b   : > { %p8209_p4 = pnand %p8208_p1, %p10229_p2 }
 0x52c   : > { %p8214_p12 = por %p8213_p10, %p8212_p8 }
 0x52d   : > { %p8210_p3 = pneg %p8209_p4 }
 0x52e   : > { %p8216_p5 = por %p8215_p0, %p8214_p12 }
 0x530   : > { %p8217_p6 = pnand %p8216_p5, %p8210_p3 }
 0x532   : > { %8220 = shalt.err (!%p8217_p6)
}
 0x533   : > { %s8300_s12 = smov 128   ;;  %s8301_s5 = smov 8  }
 0x534   : > { %7762 = dma.vmem_to_hbm [thread:$0]  (%p10229_p2), %s10122_s28, 2048, %s10120_s18, %s10128_s19, %s8300_s12, %s8300_s12, %s8301_s5  }
 0x535 PF: > { %p7774_p7 = scmp.ge.s32.totalorder %s8291_s8, 2  ;;  %s6370_s27 = sand.u32 1, %s8263_s24  }
 0x536   : > { %p10230_p9 = scmp.ne.s32.totalorder %s10207_s16, 0  ;;  %s6371_s14 = scalar_lea.sflag [#allocation5], %s6370_s27 }
 0x538   : > { %p7769_p11 = pnand %p7774_p7, %p10230_p9 }
 0x53a   : > { %8258 = dma.done.wait (!%p7769_p11), %s6371_s14, 2048  }
 0x53b   : > { %8260 = vsyncadd (!%p7769_p11), %s6371_s14, 4294965248  ;;  %s21_s8 = sadd.s32 1, %s8291_s8   ;;  %s10231_s17 = sld [smem:[#allocation9_spill]] }
 0x53c   : > { %p18_p13 = scmp.ge.s32.totalorder %s21_s8, 6   ;;  %s10232_s26 = sld [smem:[#allocation14_spill]] }
 0x53d   : > { %s10233_s27 = sld [smem:[#allocation10_spill]]  ;;  %s10234_s28 = sld [smem:[#allocation11_spill]] }
 0x53e   : > { %s10235_s29 = sld [smem:[#allocation12_spill]]  ;;  %s10236_s30 = sld [smem:[#allocation13_spill]] }
 0x53f   : > { %s10237_s24 = smov %s8267_s25  ;;  %20 = sbr.rel (!%p18_p13) target bundleno = 8 (0x8), region = 118 }
 0x541   : > { %s10238_s25 = smov %s10231_s17 }
 0x546   :  { %6376 = vsyncpa [#allocation4], 1 }
 0x547   :  { %6378 = vsyncpa [#allocation4 + $0x1], 1 }
 0x548   :  { %6379 = vsyncpa [#allocation5], 1 }
 0x549   :  { %6381 = vsyncpa [#allocation5 + $0x1], 1 }

</bundles_post_ra>
